<compile_context>
chip_gen: v6e
topology: v6e:2x2x1
jax: 0.10.0
libtpu: 0.0.40
codegen_flags: <defaults>
</compile_context>

<pallas_src>
import functools
import math

import jax
import jax.numpy as jnp
import numpy as np
from jax import lax
from jax.experimental import pallas as pl
from jax.experimental.pallas import tpu as pltpu

LN_EPS = 1e-5  # torch nn.LayerNorm default

# rows of the packed (num_vecs, emb) per-channel parameter slab
_VEC_ORDER = ("ln1_g", "ln1_b",
              "dwq_b", "pwq_b",
              "dwk_b", "pwk_b",
              "dwv_b", "pwv_b",
              "lnq_g", "lnq_b",
              "lnk_g", "lnk_b",
              "lnv_g", "lnv_b",
              "ln2_g", "ln2_b",
              "f1_b", "f2_b")
_V = {name: i for i, name in enumerate(_VEC_ORDER)}


# ---------------------------- Pallas kernel ----------------------------

def _mhsa_ffn_kernel(x_ref, vec_ref, dw_ref, mat_ref, ffdw_ref, f2w_ref,
                     o_ref, padc_ref, padh_ref, qkv_ref,
                     *, heads, stride, ds_k, ff_k, expansion):
    f32, bf16 = jnp.float32, jnp.bfloat16
    L, C = x_ref.shape[1], x_ref.shape[2]
    N = L - 1
    hdim = C // heads                 # NOTE: production dims should keep C%128==0
    hid = C * expansion
    p_ds = (ds_k - 1) // 2
    p_ff = (ff_k - 1) // 2
    n_k = (N + 2 * p_ds - ds_k) // stride + 1     # K/V body length (== torch conv1d)
    Lk = 1 + n_k
    scale = 1.0 / math.sqrt(hdim)

    def vrow(name):                               # point-of-use (C,) parameter read
        return vec_ref[_V[name], :]

    def ln(y, g, b):
        mu = jnp.mean(y, axis=-1, keepdims=True)
        var = jnp.mean(jnp.square(y - mu), axis=-1, keepdims=True)
        return (y - mu) * lax.rsqrt(var + LN_EPS) * g + b

    def mxu(a, w):                                # bf16 MXU operands, f32 accumulation
        return jnp.dot(a.astype(bf16), w.astype(bf16),
                       preferred_element_type=f32)

    def row0_mask(n_rows):                        # True on sublane row 0 only
        return lax.broadcasted_iota(jnp.int32, (n_rows, 1), 0) == 0

    x = x_ref[0].astype(f32)                      # (L, C)

    # ---------------- MHSA branch ----------------
    xn = ln(x, vrow("ln1_g"), vrow("ln1_b"))      # LN1 over all rows (cls incl.)
    cls = xn[0:1, :]

    # Padded depthwise-conv input.  Row layout:
    #   [0 : stride+p_ds)              zeros (junk + top pad; cls lands here)
    #   [stride+p_ds : stride+p_ds+N)  body rows
    #   [stride+p_ds+N : end)          zeros (bottom pad)
    # The `stride` extra rows on top let every conv emit its full output height
    # (incl. a junk row 0 that is later replaced by the cls row), so all q/k/v
    # staging stores start at sublane offset 0 (dense, unmasked).
    padc_ref[pl.ds(stride + p_ds - 1, L), :] = xn
    padc_ref[0:stride + p_ds, :] = jnp.zeros((stride + p_ds, C), f32)
    padc_ref[stride + p_ds + N:, :] = jnp.zeros((p_ds, C), f32)
    # NOTE: invariant pad rows are re-zeroed every grid step on purpose; a
    # pl.when(program_id==0) init is unsafe under megacore "parallel" sharding
    # (a core that never runs program 0 would read uninitialized scratch).

    def dw_conv(tap_idx, bias_name, s, n_out, start_off):
        acc = jnp.zeros((n_out, C), f32)
        for j in range(ds_k):                     # statically unrolled taps
            if s == 1:
                rows = padc_ref[pl.ds(start_off + j, n_out), :]
            else:                                 # strided sublane read (no gather matmul)
                rows = padc_ref[pl.ds(start_off + j, n_out, stride=s), :]
            acc = acc + rows * dw_ref[tap_idx, j, :]
        return acc + vrow(bias_name)

    def dsconv(tap_idx, mat_idx, dwb, pwb, lng, lnb, s, n_out, start_off):
        y = dw_conv(tap_idx, dwb, s, n_out, start_off)
        y = mxu(y, mat_ref[mat_idx]) + vrow(pwb)  # pointwise conv
        return ln(y, vrow(lng), vrow(lnb))

    # row 0 of each result is junk (reads only zeroed pad / early body rows,
    # always finite) and is overwritten with the cls token below.
    q_f = dsconv(0, 0, "dwq_b", "pwq_b", "lnq_g", "lnq_b", 1, L, stride - 1)
    k_f = dsconv(1, 1, "dwk_b", "pwk_b", "lnk_g", "lnk_b", stride, Lk, 0)
    v_f = dsconv(2, 2, "dwv_b", "pwv_b", "lnv_g", "lnv_b", stride, Lk, 0)

    # Dense, offset-0 bf16 staging (the MXU consumes bf16 anyway); attention
    # scale 1/sqrt(hdim) folded into q once.
    qkv_ref[0] = (jnp.where(row0_mask(L), cls, q_f) * scale).astype(bf16)
    qkv_ref[1, 0:Lk, :] = jnp.where(row0_mask(Lk), cls, k_f).astype(bf16)
    qkv_ref[2, 0:Lk, :] = jnp.where(row0_mask(Lk), cls, v_f).astype(bf16)

    # Per-head attention.  Head outputs are staged at their lane offset so w_o
    # is applied ONCE with full contraction depth C (much better MXU occupancy
    # than heads separate K=hdim matmuls, and no (L,C) f32 read-modify-write
    # accumulator passes).
    for h in range(heads):
        lo = h * hdim
        qh = qkv_ref[0, :, lo:lo + hdim]                          # (L,  hdim) bf16
        kh = qkv_ref[1, 0:Lk, lo:lo + hdim]                       # (Lk, hdim) bf16
        vh = qkv_ref[2, 0:Lk, lo:lo + hdim]
        s_qk = lax.dot_general(qh, kh, (((1,), (1,)), ((), ())),
                               preferred_element_type=f32)        # (L, Lk)
        m = jnp.max(s_qk, axis=-1, keepdims=True)
        p_exp = jnp.exp(s_qk - m)
        # TODO(synk): MCDropout on attn (training-mode dropout) omitted (p = 0).
        r = pl.reciprocal(jnp.sum(p_exp, axis=-1, keepdims=True), approx=True)
        oh = jnp.dot(p_exp.astype(bf16), vh, preferred_element_type=f32) * r
        qkv_ref[3, :, lo:lo + hdim] = oh.astype(bf16)

    mhsa = jnp.dot(qkv_ref[3], mat_ref[3], preferred_element_type=f32)   # w_o, (L, C)
    # TODO(synk): MCDropout after w_o omitted (p = 0).

    x2 = x + mhsa                                                  # residual 1

    # ---------------- MixFFN branch ----------------
    fin = ln(x2, vrow("ln2_g"), vrow("ln2_b"))                     # LN2 over all rows
    # linear1 stays (C, C); the groups=C channel expansion is realised by
    # replicating h1 into `expansion` lane blocks (blocked channel order).
    # fdw_w / fdw_b / f2_w were host-permuted to the matching blocked order.
    h1 = mxu(fin, mat_ref[4]) + vrow("f1_b")                       # (L, C); row0 junk
    for e_blk in range(expansion):
        padh_ref[pl.ds(p_ff, L), pl.ds(e_blk * C, C)] = h1
    padh_ref[0:p_ff + 1, :] = jnp.zeros((p_ff + 1, hid), f32)
    padh_ref[p_ff + 1 + N:, :] = jnp.zeros((p_ff, hid), f32)

    hc = jnp.zeros((L, hid), f32)
    for j in range(ff_k):                                          # depthwise taps
        hc = hc + padh_ref[pl.ds(j, L), :] * ffdw_ref[j, :]
    hc = hc + ffdw_ref[ff_k, :]
    # tanh-GELU (EUP slot) instead of exact erf (long VALU polynomial);
    # ~1e-3 abs deviation from torch's exact nn.GELU -- swap back to lax.erf
    # if bit-parity is required.
    c0 = math.sqrt(2.0 / math.pi)
    hg = 0.5 * hc * (1.0 + jnp.tanh(c0 * (hc + 0.044715 * hc * hc * hc)))
    # TODO(synk): MCDropout after GELU omitted (p = 0).
    h2 = mxu(hg, f2w_ref[...]) + vrow("f2_b")                      # (L, C); row0 junk

    # Single dense, offset-0 (L, C) output store; cls row selected by row mask.
    out = x2 + jnp.where(row0_mask(L), fin, h2)
    o_ref[0] = out.astype(o_ref.dtype)


# ---------------------------- host-side packing ----------------------------

def _prepare_weights(p, expansion):
    emb = p["ln1_g"].shape[-1]
    hid = emb * expansion
    vec_c = jnp.stack([p[name].reshape(emb) for name in _VEC_ORDER],
                      axis=0).astype(jnp.float32)                       # (18, emb)
    dw = jnp.stack([p["dwq_w"], p["dwk_w"], p["dwv_w"]],
                   axis=0).astype(jnp.float32)                          # (3, k, emb)
    mats = jnp.stack([p["pwq_w"], p["pwk_w"], p["pwv_w"], p["wo_w"], p["f1_w"]],
                     axis=0).astype(jnp.bfloat16)                       # (5, emb, emb)
    # groups=emb conv: hid channel j reads emb channel j//E (interleaved order).
    # Permute hid channels from interleaved [c*E+e] to blocked [e*C+c] order so
    # the kernel can replicate h1 into E contiguous lane blocks (exact relabel).
    perm = np.arange(hid).reshape(emb, expansion).T.reshape(-1)
    ffdw = jnp.concatenate([p["fdw_w"][:, perm],
                            p["fdw_b"].reshape(1, hid)[:, perm]],
                           axis=0).astype(jnp.float32)                  # (ff_k+1, hid)
    f2_w = p["f2_w"][perm, :].astype(jnp.bfloat16)                      # (hid, emb)
    return vec_c, dw, mats, ffdw, f2_w


def _const_spec(shape):
    zero = (0,) * len(shape)
    # constant index_map => block never changes; single-buffer it (halves the
    # weight VMEM footprint vs the default double-buffering).
    return pl.BlockSpec(shape, lambda i, _z=zero: _z,
                        pipeline_mode=pl.Buffered(1))


def _vmem_limit_bytes(weights, seq, emb, hid, n, p_ds, p_ff, stride):
    weight_bytes = sum(int(np.prod(w.shape)) * w.dtype.itemsize for w in weights)
    io_bytes = 2 * 2 * seq * emb * 4                       # double-buffered x + out
    scratch_bytes = ((n + 2 * p_ds + stride) * emb * 4
                     + (n + 2 * p_ff + 1) * hid * 4
                     + 4 * seq * emb * 2)
    temp_bytes = 6 * seq * hid * 4 + 12 * seq * emb * 4    # compiler temporaries
    need = weight_bytes + io_bytes + scratch_bytes + temp_bytes + (4 << 20)
    # keep <= 48 MiB so it also fits v7x's 64 MiB physical VMEM (v5e/v6e: 128 MiB)
    return int(min(max(need, 24 << 20), 48 << 20))


def mhsa_to_ffn_block(x, params, *, heads, stride, expansion=4):
    b, seq, emb = x.shape
    ds_k = params["dwq_w"].shape[0]
    ff_k = params["fdw_w"].shape[0]
    assert emb % heads == 0
    assert ds_k % 2 == 1 and ds_k >= 3 and ff_k % 2 == 1 and ff_k >= 3
    assert stride >= 1
    hid = emb * expansion
    n = seq - 1
    p_ds = (ds_k - 1) // 2
    p_ff = (ff_k - 1) // 2
    n_k = (n + 2 * p_ds - ds_k) // stride + 1
    lk = 1 + n_k
    hdim = emb // heads

    weights = _prepare_weights(params, expansion)
    kernel = functools.partial(_mhsa_ffn_kernel, heads=heads, stride=stride,
                               ds_k=ds_k, ff_k=ff_k, expansion=expansion)

    in_specs = [pl.BlockSpec((1, seq, emb), lambda i: (i, 0, 0))]
    in_specs += [_const_spec(w.shape) for w in weights]
    out_spec = pl.BlockSpec((1, seq, emb), lambda i: (i, 0, 0))

    flops = 2 * b * (seq * emb * emb                      # q pointwise
                     + 2 * lk * emb * emb                 # k, v pointwise
                     + heads * 2 * seq * lk * hdim        # qk^T + attn@v
                     + seq * emb * emb                    # w_o
                     + seq * emb * emb                    # f1
                     + seq * hid * emb                    # f2
                     + ds_k * (seq + 2 * lk) * emb + ff_k * seq * hid)
    transcendentals = b * (heads * seq * lk + seq * hid)
    weight_bytes = sum(int(np.prod(w.shape)) * w.dtype.itemsize for w in weights)
    bytes_accessed = int(8 * b * seq * emb + weight_bytes)

    return pl.pallas_call(
        kernel,
        out_shape=jax.ShapeDtypeStruct((b, seq, emb), x.dtype),
        grid_spec=pltpu.PrefetchScalarGridSpec(
            num_scalar_prefetch=0,
            grid=(b,),                      # "parallel" -> both TCs on v7x
            in_specs=in_specs,
            out_specs=out_spec,
            scratch_shapes=[
                pltpu.VMEM((n + 2 * p_ds + stride, emb), jnp.float32),  # padded conv in
                pltpu.VMEM((n + 2 * p_ff + 1, hid), jnp.float32),       # padded FFN in
                pltpu.VMEM((4, seq, emb), jnp.bfloat16),                # q/k/v/head-out
            ]),
        compiler_params=pltpu.CompilerParams(
            dimension_semantics=("parallel",),
            vmem_limit_bytes=_vmem_limit_bytes(weights, seq, emb, hid, n,
                                               p_ds, p_ff, stride)),
        cost_estimate=pl.CostEstimate(flops=int(flops),
                                      transcendentals=int(transcendentals),
                                      bytes_accessed=bytes_accessed),
    )(x, *weights)


def vit_encoder_block(x, block_params, *, heads, stride, expansion=4):
    for p in block_params:
        x = mhsa_to_ffn_block(x, p, heads=heads, stride=stride,
                              expansion=expansion)
    return x


# ---------------------------- pure-JAX reference ----------------------------

def _reference_block(x, p, *, heads, stride, expansion):
    c = x.shape[-1]
    hdim = c // heads

    def ln(y, g, b):
        mu = jnp.mean(y, axis=-1, keepdims=True)
        var = jnp.mean(jnp.square(y - mu), axis=-1, keepdims=True)
        return (y - mu) * lax.rsqrt(var + LN_EPS) * g + b

    def dwconv(y, w, bias, s):
        kk = w.shape[0]
        pd = (kk - 1) // 2
        ypad = jnp.pad(y, ((0, 0), (pd, pd), (0, 0)))
        n_out = (y.shape[1] + 2 * pd - kk) // s + 1
        acc = jnp.zeros((y.shape[0], n_out, y.shape[-1]), jnp.float32)
        for j in range(kk):
            acc = acc + ypad[:, j:j + (n_out - 1) * s + 1:s, :] * w[j]
        return acc + bias

    xn = ln(x, p["ln1_g"], p["ln1_b"])
    cls = xn[:, :1]
    body = xn[:, 1:]
    q = ln(dwconv(body, p["dwq_w"], p["dwq_b"], 1) @ p["pwq_w"] + p["pwq_b"],
           p["lnq_g"], p["lnq_b"])
    k = ln(dwconv(body, p["dwk_w"], p["dwk_b"], stride) @ p["pwk_w"] + p["pwk_b"],
           p["lnk_g"], p["lnk_b"])
    v = ln(dwconv(body, p["dwv_w"], p["dwv_b"], stride) @ p["pwv_w"] + p["pwv_b"],
           p["lnv_g"], p["lnv_b"])
    q = jnp.concatenate([cls, q], axis=1)
    k = jnp.concatenate([cls, k], axis=1)
    v = jnp.concatenate([cls, v], axis=1)
    bsz, l, _ = q.shape
    lk = k.shape[1]
    qh = q.reshape(bsz, l, heads, hdim).transpose(0, 2, 1, 3)
    kh = k.reshape(bsz, lk, heads, hdim).transpose(0, 2, 1, 3)
    vh = v.reshape(bsz, lk, heads, hdim).transpose(0, 2, 1, 3)
    dots = jnp.einsum("bhqd,bhkd->bhqk", qh, kh) / math.sqrt(hdim)
    attn = jax.nn.softmax(dots, axis=-1)
    outh = jnp.einsum("bhqk,bhkd->bhqd", attn, vh)
    mhsa = outh.transpose(0, 2, 1, 3).reshape(bsz, l, c) @ p["wo_w"]
    x2 = x + mhsa

    fin = ln(x2, p["ln2_g"], p["ln2_b"])
    fcls = fin[:, :1]
    fbody = fin[:, 1:]
    h1 = fbody @ p["f1_w"] + p["f1_b"]
    he = jnp.repeat(h1, expansion, axis=-1)      # groups=emb channel expansion
    hc = dwconv(he, p["fdw_w"], p["fdw_b"], 1)
    hg = 0.5 * hc * (1.0 + lax.erf(hc / math.sqrt(2.0)))   # exact GELU (torch)
    h2 = hg @ p["f2_w"] + p["f2_b"]
    ffn = jnp.concatenate([fcls, h2], axis=1)
    return ffn + x2


def _reference_forward(x, block_params, *, heads, stride, expansion=4):
    y = x
    for p in block_params:
        y = _reference_block(y, p, heads=heads, stride=stride,
                             expansion=expansion)
    return y


# ---------------------------- parameter init ----------------------------

def init_block_params(key, emb, heads, ds_k, ff_k, expansion):
    assert emb % heads == 0
    assert ds_k % 2 == 1 and ff_k % 2 == 1
    hid = emb * expansion
    shapes = {
        "ln1_g": (1, emb), "ln1_b": (1, emb),
        "dwq_w": (ds_k, emb), "dwq_b": (1, emb),
        "pwq_w": (emb, emb), "pwq_b": (1, emb),
        "dwk_w": (ds_k, emb), "dwk_b": (1, emb),
        "pwk_w": (emb, emb), "pwk_b": (1, emb),
        "dwv_w": (ds_k, emb), "dwv_b": (1, emb),
        "pwv_w": (emb, emb), "pwv_b": (1, emb),
        "lnq_g": (1, emb), "lnq_b": (1, emb),
        "lnk_g": (1, emb), "lnk_b": (1, emb),
        "lnv_g": (1, emb), "lnv_b": (1, emb),
        "wo_w": (emb, emb),
        "ln2_g": (1, emb), "ln2_b": (1, emb),
        "f1_w": (emb, emb), "f1_b": (1, emb),
        "fdw_w": (ff_k, hid), "fdw_b": (1, hid),
        "f2_w": (hid, emb), "f2_b": (1, emb),
    }
    keys = jax.random.split(key, len(shapes))
    params = {}
    for (name, shape), k in zip(shapes.items(), keys):
        if name.endswith("_g"):       # LayerNorm gamma
            params[name] = (jnp.ones(shape, jnp.float32)
                            + 0.05 * jax.random.normal(k, shape, jnp.float32))
        elif name.endswith("_b"):     # biases / LayerNorm beta
            params[name] = 0.05 * jax.random.normal(k, shape, jnp.float32)
        else:                         # weights
            params[name] = 0.08 * jax.random.normal(k, shape, jnp.float32)
    return params


# ---------------------------- demo / check ----------------------------

if __name__ == "__main__":
    EMB, HEADS, DS_K, FF_K, STRIDE, BLOCKS = 32, 4, 3, 3, 2, 2
    B, N_PATCH = 2, 16
    L = 1 + N_PATCH  # cls token + patches

    key = jax.random.PRNGKey(0)
    kx, kp = jax.random.split(key)
    x = jax.random.normal(kx, (B, L, EMB), jnp.float32)
    block_params = [
        init_block_params(jax.random.fold_in(kp, i), EMB, HEADS, DS_K, FF_K, 4)
        for i in range(BLOCKS)
    ]

    @jax.jit
    def run_kernel(xx):
        return vit_encoder_block(xx, block_params, heads=HEADS, stride=STRIDE,
                                 expansion=4)

    out = jax.block_until_ready(run_kernel(x))
    assert out.shape == (B, L, EMB)

    @jax.jit
    def run_ref(xx):
        return _reference_forward(xx, block_params, heads=HEADS, stride=STRIDE,
                                  expansion=4)

    ref = jax.block_until_ready(run_ref(x))
    # deviations come from bf16 MXU operands, approx reciprocal and tanh-GELU
    np.testing.assert_allclose(np.asarray(out), np.asarray(ref),
                               atol=3e-2, rtol=3e-2)
    print("KERNEL_OK")
</pallas_src>

<mosaic_0001>
module attributes {stable_mosaic.version = 11 : i64} {
  func.func @_mhsa_ffn_kernel(%arg0: i32, %arg1: memref<1x17x32xf32, #tpu.memory_space<vmem>>, %arg2: memref<18x32xf32, #tpu.memory_space<vmem>>, %arg3: memref<3x3x32xf32, #tpu.memory_space<vmem>>, %arg4: memref<5x32x32xbf16, #tpu.memory_space<vmem>>, %arg5: memref<4x128xf32, #tpu.memory_space<vmem>>, %arg6: memref<128x32xbf16, #tpu.memory_space<vmem>>, %arg7: memref<1x17x32xf32, #tpu.memory_space<vmem>>, %arg8: memref<20x32xf32, #tpu.memory_space<vmem>>, %arg9: memref<19x128xf32, #tpu.memory_space<vmem>>, %arg10: memref<4x17x32xbf16, #tpu.memory_space<vmem>>) attributes {dimension_semantics = [#tpu.dimension_semantics<parallel>], iteration_bounds = array<i64: 2>, scalar_prefetch = 0 : i64, scratch_operands = 3 : i64, tpu.core_type = #tpu.core_type<tc>, window_params = [{transform_indices = @transform_0, window_bounds = array<i64: 1, 17, 32>}, {pipeline_mode = #tpu.pipeline_mode<synchronous>, transform_indices = @transform_1, window_bounds = array<i64: 18, 32>}, {pipeline_mode = #tpu.pipeline_mode<synchronous>, transform_indices = @transform_2, window_bounds = array<i64: 3, 3, 32>}, {pipeline_mode = #tpu.pipeline_mode<synchronous>, transform_indices = @transform_3, window_bounds = array<i64: 5, 32, 32>}, {pipeline_mode = #tpu.pipeline_mode<synchronous>, transform_indices = @transform_4, window_bounds = array<i64: 4, 128>}, {pipeline_mode = #tpu.pipeline_mode<synchronous>, transform_indices = @transform_5, window_bounds = array<i64: 128, 32>}, {transform_indices = @transform_6, window_bounds = array<i64: 1, 17, 32>}]} {
    %c0 = arith.constant 0 : index
    %c0_0 = arith.constant 0 : index
    %c0_1 = arith.constant 0 : index
    %0 = vector.load %arg1[%c0, %c0_0, %c0_1] : memref<1x17x32xf32, #tpu.memory_space<vmem>>, vector<1x17x32xf32>
    %1 = vector.shape_cast %0 : vector<1x17x32xf32> to vector<17x32xf32>
    %c0_2 = arith.constant 0 : index
    %c0_3 = arith.constant 0 : index
    %2 = vector.load %arg2[%c0_2, %c0_3] : memref<18x32xf32, #tpu.memory_space<vmem>>, vector<1x32xf32>
    %3 = vector.shape_cast %2 : vector<1x32xf32> to vector<32xf32>
    %c1 = arith.constant 1 : index
    %c0_4 = arith.constant 0 : index
    %4 = vector.load %arg2[%c1, %c0_4] : memref<18x32xf32, #tpu.memory_space<vmem>>, vector<1x32xf32>
    %5 = vector.shape_cast %4 : vector<1x32xf32> to vector<32xf32>
    %cst = arith.constant dense<0.000000e+00> : vector<17xf32>
    %6 = vector.multi_reduction <add>, %1, %cst [1] : vector<17x32xf32> to vector<17xf32>
    %7 = vector.shape_cast %6 : vector<17xf32> to vector<17x1xf32>
    %cst_5 = arith.constant 3.200000e+01 : f32
    %8 = vector.broadcast %cst_5 : f32 to vector<17x1xf32>
    %9 = arith.divf %7, %8 : vector<17x1xf32>
    %10 = vector.broadcast %9 : vector<17x1xf32> to vector<17x32xf32>
    %11 = arith.subf %1, %10 : vector<17x32xf32>
    %12 = arith.mulf %11, %11 : vector<17x32xf32>
    %cst_6 = arith.constant dense<0.000000e+00> : vector<17xf32>
    %13 = vector.multi_reduction <add>, %12, %cst_6 [1] : vector<17x32xf32> to vector<17xf32>
    %14 = vector.shape_cast %13 : vector<17xf32> to vector<17x1xf32>
    %cst_7 = arith.constant 3.200000e+01 : f32
    %15 = vector.broadcast %cst_7 : f32 to vector<17x1xf32>
    %16 = arith.divf %14, %15 : vector<17x1xf32>
    %17 = vector.broadcast %9 : vector<17x1xf32> to vector<17x32xf32>
    %18 = arith.subf %1, %17 : vector<17x32xf32>
    %cst_8 = arith.constant 9.99999974E-6 : f32
    %19 = vector.broadcast %cst_8 : f32 to vector<17x1xf32>
    %20 = arith.addf %16, %19 : vector<17x1xf32>
    %21 = math.rsqrt %20 : vector<17x1xf32>
    %22 = vector.broadcast %21 : vector<17x1xf32> to vector<17x32xf32>
    %23 = arith.mulf %18, %22 : vector<17x32xf32>
    %24 = vector.shape_cast %3 : vector<32xf32> to vector<1x32xf32>
    %25 = vector.broadcast %24 : vector<1x32xf32> to vector<17x32xf32>
    %26 = arith.mulf %23, %25 : vector<17x32xf32>
    %27 = vector.shape_cast %5 : vector<32xf32> to vector<1x32xf32>
    %28 = vector.broadcast %27 : vector<1x32xf32> to vector<17x32xf32>
    %29 = arith.addf %26, %28 : vector<17x32xf32>
    %30 = vector.extract_strided_slice %29 {offsets = [0, 0], sizes = [1, 32], strides = [1, 1]} : vector<17x32xf32> to vector<1x32xf32>
    %c2 = arith.constant 2 : index
    %c0_9 = arith.constant 0 : index
    %31 = vector.load %arg8[%c2, %c0_9] : memref<20x32xf32, #tpu.memory_space<vmem>>, vector<17x32xf32>
    tpu.vector_store %arg8[%c2, %c0_9], %29 {strides = array<i32>} : memref<20x32xf32, #tpu.memory_space<vmem>>, vector<17x32xf32>,
    %cst_10 = arith.constant 0.000000e+00 : f32
    %32 = vector.broadcast %cst_10 : f32 to vector<3x32xf32>
    %c0_11 = arith.constant 0 : index
    %c0_12 = arith.constant 0 : index
    %33 = vector.load %arg8[%c0_11, %c0_12] : memref<20x32xf32, #tpu.memory_space<vmem>>, vector<3x32xf32>
    tpu.vector_store %arg8[%c0_11, %c0_12], %32 {strides = array<i32>} : memref<20x32xf32, #tpu.memory_space<vmem>>, vector<3x32xf32>,
    %cst_13 = arith.constant 0.000000e+00 : f32
    %34 = vector.broadcast %cst_13 : f32 to vector<1x32xf32>
    %c19 = arith.constant 19 : index
    %c0_14 = arith.constant 0 : index
    %35 = vector.load %arg8[%c19, %c0_14] : memref<20x32xf32, #tpu.memory_space<vmem>>, vector<1x32xf32>
    tpu.vector_store %arg8[%c19, %c0_14], %34 {strides = array<i32>} : memref<20x32xf32, #tpu.memory_space<vmem>>, vector<1x32xf32>,
    %cst_15 = arith.constant 0.000000e+00 : f32
    %36 = vector.broadcast %cst_15 : f32 to vector<17x32xf32>
    %c1_16 = arith.constant 1 : index
    %c0_17 = arith.constant 0 : index
    %37 = vector.load %arg8[%c1_16, %c0_17] : memref<20x32xf32, #tpu.memory_space<vmem>>, vector<17x32xf32>
    %c0_18 = arith.constant 0 : index
    %c0_19 = arith.constant 0 : index
    %c0_20 = arith.constant 0 : index
    %38 = vector.load %arg3[%c0_18, %c0_19, %c0_20] : memref<3x3x32xf32, #tpu.memory_space<vmem>>, vector<1x1x32xf32>
    %39 = vector.shape_cast %38 : vector<1x1x32xf32> to vector<32xf32>
    %40 = vector.shape_cast %39 : vector<32xf32> to vector<1x32xf32>
    %41 = vector.broadcast %40 : vector<1x32xf32> to vector<17x32xf32>
    %42 = arith.mulf %37, %41 : vector<17x32xf32>
    %43 = arith.addf %36, %42 : vector<17x32xf32>
    %c2_21 = arith.constant 2 : index
    %c0_22 = arith.constant 0 : index
    %44 = vector.load %arg8[%c2_21, %c0_22] : memref<20x32xf32, #tpu.memory_space<vmem>>, vector<17x32xf32>
    %c0_23 = arith.constant 0 : index
    %c1_24 = arith.constant 1 : index
    %c0_25 = arith.constant 0 : index
    %45 = vector.load %arg3[%c0_23, %c1_24, %c0_25] : memref<3x3x32xf32, #tpu.memory_space<vmem>>, vector<1x1x32xf32>
    %46 = vector.shape_cast %45 : vector<1x1x32xf32> to vector<32xf32>
    %47 = vector.shape_cast %46 : vector<32xf32> to vector<1x32xf32>
    %48 = vector.broadcast %47 : vector<1x32xf32> to vector<17x32xf32>
    %49 = arith.mulf %44, %48 : vector<17x32xf32>
    %50 = arith.addf %43, %49 : vector<17x32xf32>
    %c3 = arith.constant 3 : index
    %c0_26 = arith.constant 0 : index
    %51 = vector.load %arg8[%c3, %c0_26] : memref<20x32xf32, #tpu.memory_space<vmem>>, vector<17x32xf32>
    %c0_27 = arith.constant 0 : index
    %c2_28 = arith.constant 2 : index
    %c0_29 = arith.constant 0 : index
    %52 = vector.load %arg3[%c0_27, %c2_28, %c0_29] : memref<3x3x32xf32, #tpu.memory_space<vmem>>, vector<1x1x32xf32>
    %53 = vector.shape_cast %52 : vector<1x1x32xf32> to vector<32xf32>
    %54 = vector.shape_cast %53 : vector<32xf32> to vector<1x32xf32>
    %55 = vector.broadcast %54 : vector<1x32xf32> to vector<17x32xf32>
    %56 = arith.mulf %51, %55 : vector<17x32xf32>
    %57 = arith.addf %50, %56 : vector<17x32xf32>
    %c2_30 = arith.constant 2 : index
    %c0_31 = arith.constant 0 : index
    %58 = vector.load %arg2[%c2_30, %c0_31] : memref<18x32xf32, #tpu.memory_space<vmem>>, vector<1x32xf32>
    %59 = vector.shape_cast %58 : vector<1x32xf32> to vector<32xf32>
    %60 = vector.shape_cast %59 : vector<32xf32> to vector<1x32xf32>
    %61 = vector.broadcast %60 : vector<1x32xf32> to vector<17x32xf32>
    %62 = arith.addf %57, %61 : vector<17x32xf32>
    %c0_32 = arith.constant 0 : index
    %c0_33 = arith.constant 0 : index
    %c0_34 = arith.constant 0 : index
    %63 = vector.load %arg4[%c0_32, %c0_33, %c0_34] : memref<5x32x32xbf16, #tpu.memory_space<vmem>>, vector<1x32x32xbf16>
    %64 = vector.shape_cast %63 : vector<1x32x32xbf16> to vector<32x32xbf16>
    %65 = arith.truncf %62 : vector<17x32xf32> to vector<17x32xbf16>
    %cst_35 = arith.constant dense<0.000000e+00> : vector<17x32xf32>
    %66 = tpu.matmul %65, %64, %cst_35 {dimension_numbers = #tpu.dot_dimension_numbers<[1], [0], [0], [1], [0, 0, 1, 1], [], []>} : vector<17x32xbf16>, vector<32x32xbf16>, vector<17x32xf32> -> vector<17x32xf32>
    %c3_36 = arith.constant 3 : index
    %c0_37 = arith.constant 0 : index
    %67 = vector.load %arg2[%c3_36, %c0_37] : memref<18x32xf32, #tpu.memory_space<vmem>>, vector<1x32xf32>
    %68 = vector.shape_cast %67 : vector<1x32xf32> to vector<32xf32>
    %69 = vector.shape_cast %68 : vector<32xf32> to vector<1x32xf32>
    %70 = vector.broadcast %69 : vector<1x32xf32> to vector<17x32xf32>
    %71 = arith.addf %66, %70 : vector<17x32xf32>
    %c8 = arith.constant 8 : index
    %c0_38 = arith.constant 0 : index
    %72 = vector.load %arg2[%c8, %c0_38] : memref<18x32xf32, #tpu.memory_space<vmem>>, vector<1x32xf32>
    %73 = vector.shape_cast %72 : vector<1x32xf32> to vector<32xf32>
    %c9 = arith.constant 9 : index
    %c0_39 = arith.constant 0 : index
    %74 = vector.load %arg2[%c9, %c0_39] : memref<18x32xf32, #tpu.memory_space<vmem>>, vector<1x32xf32>
    %75 = vector.shape_cast %74 : vector<1x32xf32> to vector<32xf32>
    %cst_40 = arith.constant dense<0.000000e+00> : vector<17xf32>
    %76 = vector.multi_reduction <add>, %71, %cst_40 [1] : vector<17x32xf32> to vector<17xf32>
    %77 = vector.shape_cast %76 : vector<17xf32> to vector<17x1xf32>
    %cst_41 = arith.constant 3.200000e+01 : f32
    %78 = vector.broadcast %cst_41 : f32 to vector<17x1xf32>
    %79 = arith.divf %77, %78 : vector<17x1xf32>
    %80 = vector.broadcast %79 : vector<17x1xf32> to vector<17x32xf32>
    %81 = arith.subf %71, %80 : vector<17x32xf32>
    %82 = arith.mulf %81, %81 : vector<17x32xf32>
    %cst_42 = arith.constant dense<0.000000e+00> : vector<17xf32>
    %83 = vector.multi_reduction <add>, %82, %cst_42 [1] : vector<17x32xf32> to vector<17xf32>
    %84 = vector.shape_cast %83 : vector<17xf32> to vector<17x1xf32>
    %cst_43 = arith.constant 3.200000e+01 : f32
    %85 = vector.broadcast %cst_43 : f32 to vector<17x1xf32>
    %86 = arith.divf %84, %85 : vector<17x1xf32>
    %87 = vector.broadcast %79 : vector<17x1xf32> to vector<17x32xf32>
    %88 = arith.subf %71, %87 : vector<17x32xf32>
    %cst_44 = arith.constant 9.99999974E-6 : f32
    %89 = vector.broadcast %cst_44 : f32 to vector<17x1xf32>
    %90 = arith.addf %86, %89 : vector<17x1xf32>
    %91 = math.rsqrt %90 : vector<17x1xf32>
    %92 = vector.broadcast %91 : vector<17x1xf32> to vector<17x32xf32>
    %93 = arith.mulf %88, %92 : vector<17x32xf32>
    %94 = vector.shape_cast %73 : vector<32xf32> to vector<1x32xf32>
    %95 = vector.broadcast %94 : vector<1x32xf32> to vector<17x32xf32>
    %96 = arith.mulf %93, %95 : vector<17x32xf32>
    %97 = vector.shape_cast %75 : vector<32xf32> to vector<1x32xf32>
    %98 = vector.broadcast %97 : vector<1x32xf32> to vector<17x32xf32>
    %99 = arith.addf %96, %98 : vector<17x32xf32>
    %cst_45 = arith.constant 0.000000e+00 : f32
    %100 = vector.broadcast %cst_45 : f32 to vector<9x32xf32>
    %c0_46 = arith.constant 0 : index
    %c0_47 = arith.constant 0 : index
    %101 = tpu.strided_load %arg8[%c0_46, %c0_47] {strides = array<i32: 2, 1>} : memref<20x32xf32, #tpu.memory_space<vmem>>, vector<9x32xf32>
    %c1_48 = arith.constant 1 : index
    %c0_49 = arith.constant 0 : index
    %c0_50 = arith.constant 0 : index
    %102 = vector.load %arg3[%c1_48, %c0_49, %c0_50] : memref<3x3x32xf32, #tpu.memory_space<vmem>>, vector<1x1x32xf32>
    %103 = vector.shape_cast %102 : vector<1x1x32xf32> to vector<32xf32>
    %104 = vector.shape_cast %103 : vector<32xf32> to vector<1x32xf32>
    %105 = vector.broadcast %104 : vector<1x32xf32> to vector<9x32xf32>
    %106 = arith.mulf %101, %105 : vector<9x32xf32>
    %107 = arith.addf %100, %106 : vector<9x32xf32>
    %c1_51 = arith.constant 1 : index
    %c0_52 = arith.constant 0 : index
    %108 = tpu.strided_load %arg8[%c1_51, %c0_52] {strides = array<i32: 2, 1>} : memref<20x32xf32, #tpu.memory_space<vmem>>, vector<9x32xf32>
    %c1_53 = arith.constant 1 : index
    %c1_54 = arith.constant 1 : index
    %c0_55 = arith.constant 0 : index
    %109 = vector.load %arg3[%c1_53, %c1_54, %c0_55] : memref<3x3x32xf32, #tpu.memory_space<vmem>>, vector<1x1x32xf32>
    %110 = vector.shape_cast %109 : vector<1x1x32xf32> to vector<32xf32>
    %111 = vector.shape_cast %110 : vector<32xf32> to vector<1x32xf32>
    %112 = vector.broadcast %111 : vector<1x32xf32> to vector<9x32xf32>
    %113 = arith.mulf %108, %112 : vector<9x32xf32>
    %114 = arith.addf %107, %113 : vector<9x32xf32>
    %c2_56 = arith.constant 2 : index
    %c0_57 = arith.constant 0 : index
    %115 = tpu.strided_load %arg8[%c2_56, %c0_57] {strides = array<i32: 2, 1>} : memref<20x32xf32, #tpu.memory_space<vmem>>, vector<9x32xf32>
    %c1_58 = arith.constant 1 : index
    %c2_59 = arith.constant 2 : index
    %c0_60 = arith.constant 0 : index
    %116 = vector.load %arg3[%c1_58, %c2_59, %c0_60] : memref<3x3x32xf32, #tpu.memory_space<vmem>>, vector<1x1x32xf32>
    %117 = vector.shape_cast %116 : vector<1x1x32xf32> to vector<32xf32>
    %118 = vector.shape_cast %117 : vector<32xf32> to vector<1x32xf32>
    %119 = vector.broadcast %118 : vector<1x32xf32> to vector<9x32xf32>
    %120 = arith.mulf %115, %119 : vector<9x32xf32>
    %121 = arith.addf %114, %120 : vector<9x32xf32>
    %c4 = arith.constant 4 : index
    %c0_61 = arith.constant 0 : index
    %122 = vector.load %arg2[%c4, %c0_61] : memref<18x32xf32, #tpu.memory_space<vmem>>, vector<1x32xf32>
    %123 = vector.shape_cast %122 : vector<1x32xf32> to vector<32xf32>
    %124 = vector.shape_cast %123 : vector<32xf32> to vector<1x32xf32>
    %125 = vector.broadcast %124 : vector<1x32xf32> to vector<9x32xf32>
    %126 = arith.addf %121, %125 : vector<9x32xf32>
    %c1_62 = arith.constant 1 : index
    %c0_63 = arith.constant 0 : index
    %c0_64 = arith.constant 0 : index
    %127 = vector.load %arg4[%c1_62, %c0_63, %c0_64] : memref<5x32x32xbf16, #tpu.memory_space<vmem>>, vector<1x32x32xbf16>
    %128 = vector.shape_cast %127 : vector<1x32x32xbf16> to vector<32x32xbf16>
    %129 = arith.truncf %126 : vector<9x32xf32> to vector<9x32xbf16>
    %cst_65 = arith.constant dense<0.000000e+00> : vector<9x32xf32>
    %130 = tpu.matmul %129, %128, %cst_65 {dimension_numbers = #tpu.dot_dimension_numbers<[1], [0], [0], [1], [0, 0, 1, 1], [], []>} : vector<9x32xbf16>, vector<32x32xbf16>, vector<9x32xf32> -> vector<9x32xf32>
    %c5 = arith.constant 5 : index
    %c0_66 = arith.constant 0 : index
    %131 = vector.load %arg2[%c5, %c0_66] : memref<18x32xf32, #tpu.memory_space<vmem>>, vector<1x32xf32>
    %132 = vector.shape_cast %131 : vector<1x32xf32> to vector<32xf32>
    %133 = vector.shape_cast %132 : vector<32xf32> to vector<1x32xf32>
    %134 = vector.broadcast %133 : vector<1x32xf32> to vector<9x32xf32>
    %135 = arith.addf %130, %134 : vector<9x32xf32>
    %c10 = arith.constant 10 : index
    %c0_67 = arith.constant 0 : index
    %136 = vector.load %arg2[%c10, %c0_67] : memref<18x32xf32, #tpu.memory_space<vmem>>, vector<1x32xf32>
    %137 = vector.shape_cast %136 : vector<1x32xf32> to vector<32xf32>
    %c11 = arith.constant 11 : index
    %c0_68 = arith.constant 0 : index
    %138 = vector.load %arg2[%c11, %c0_68] : memref<18x32xf32, #tpu.memory_space<vmem>>, vector<1x32xf32>
    %139 = vector.shape_cast %138 : vector<1x32xf32> to vector<32xf32>
    %cst_69 = arith.constant dense<0.000000e+00> : vector<9xf32>
    %140 = vector.multi_reduction <add>, %135, %cst_69 [1] : vector<9x32xf32> to vector<9xf32>
    %141 = vector.shape_cast %140 : vector<9xf32> to vector<9x1xf32>
    %cst_70 = arith.constant 3.200000e+01 : f32
    %142 = vector.broadcast %cst_70 : f32 to vector<9x1xf32>
    %143 = arith.divf %141, %142 : vector<9x1xf32>
    %144 = vector.broadcast %143 : vector<9x1xf32> to vector<9x32xf32>
    %145 = arith.subf %135, %144 : vector<9x32xf32>
    %146 = arith.mulf %145, %145 : vector<9x32xf32>
    %cst_71 = arith.constant dense<0.000000e+00> : vector<9xf32>
    %147 = vector.multi_reduction <add>, %146, %cst_71 [1] : vector<9x32xf32> to vector<9xf32>
    %148 = vector.shape_cast %147 : vector<9xf32> to vector<9x1xf32>
    %cst_72 = arith.constant 3.200000e+01 : f32
    %149 = vector.broadcast %cst_72 : f32 to vector<9x1xf32>
    %150 = arith.divf %148, %149 : vector<9x1xf32>
    %151 = vector.broadcast %143 : vector<9x1xf32> to vector<9x32xf32>
    %152 = arith.subf %135, %151 : vector<9x32xf32>
    %cst_73 = arith.constant 9.99999974E-6 : f32
    %153 = vector.broadcast %cst_73 : f32 to vector<9x1xf32>
    %154 = arith.addf %150, %153 : vector<9x1xf32>
    %155 = math.rsqrt %154 : vector<9x1xf32>
    %156 = vector.broadcast %155 : vector<9x1xf32> to vector<9x32xf32>
    %157 = arith.mulf %152, %156 : vector<9x32xf32>
    %158 = vector.shape_cast %137 : vector<32xf32> to vector<1x32xf32>
    %159 = vector.broadcast %158 : vector<1x32xf32> to vector<9x32xf32>
    %160 = arith.mulf %157, %159 : vector<9x32xf32>
    %161 = vector.shape_cast %139 : vector<32xf32> to vector<1x32xf32>
    %162 = vector.broadcast %161 : vector<1x32xf32> to vector<9x32xf32>
    %163 = arith.addf %160, %162 : vector<9x32xf32>
    %cst_74 = arith.constant 0.000000e+00 : f32
    %164 = vector.broadcast %cst_74 : f32 to vector<9x32xf32>
    %c0_75 = arith.constant 0 : index
    %c0_76 = arith.constant 0 : index
    %165 = tpu.strided_load %arg8[%c0_75, %c0_76] {strides = array<i32: 2, 1>} : memref<20x32xf32, #tpu.memory_space<vmem>>, vector<9x32xf32>
    %c2_77 = arith.constant 2 : index
    %c0_78 = arith.constant 0 : index
    %c0_79 = arith.constant 0 : index
    %166 = vector.load %arg3[%c2_77, %c0_78, %c0_79] : memref<3x3x32xf32, #tpu.memory_space<vmem>>, vector<1x1x32xf32>
    %167 = vector.shape_cast %166 : vector<1x1x32xf32> to vector<32xf32>
    %168 = vector.shape_cast %167 : vector<32xf32> to vector<1x32xf32>
    %169 = vector.broadcast %168 : vector<1x32xf32> to vector<9x32xf32>
    %170 = arith.mulf %165, %169 : vector<9x32xf32>
    %171 = arith.addf %164, %170 : vector<9x32xf32>
    %c1_80 = arith.constant 1 : index
    %c0_81 = arith.constant 0 : index
    %172 = tpu.strided_load %arg8[%c1_80, %c0_81] {strides = array<i32: 2, 1>} : memref<20x32xf32, #tpu.memory_space<vmem>>, vector<9x32xf32>
    %c2_82 = arith.constant 2 : index
    %c1_83 = arith.constant 1 : index
    %c0_84 = arith.constant 0 : index
    %173 = vector.load %arg3[%c2_82, %c1_83, %c0_84] : memref<3x3x32xf32, #tpu.memory_space<vmem>>, vector<1x1x32xf32>
    %174 = vector.shape_cast %173 : vector<1x1x32xf32> to vector<32xf32>
    %175 = vector.shape_cast %174 : vector<32xf32> to vector<1x32xf32>
    %176 = vector.broadcast %175 : vector<1x32xf32> to vector<9x32xf32>
    %177 = arith.mulf %172, %176 : vector<9x32xf32>
    %178 = arith.addf %171, %177 : vector<9x32xf32>
    %c2_85 = arith.constant 2 : index
    %c0_86 = arith.constant 0 : index
    %179 = tpu.strided_load %arg8[%c2_85, %c0_86] {strides = array<i32: 2, 1>} : memref<20x32xf32, #tpu.memory_space<vmem>>, vector<9x32xf32>
    %c2_87 = arith.constant 2 : index
    %c2_88 = arith.constant 2 : index
    %c0_89 = arith.constant 0 : index
    %180 = vector.load %arg3[%c2_87, %c2_88, %c0_89] : memref<3x3x32xf32, #tpu.memory_space<vmem>>, vector<1x1x32xf32>
    %181 = vector.shape_cast %180 : vector<1x1x32xf32> to vector<32xf32>
    %182 = vector.shape_cast %181 : vector<32xf32> to vector<1x32xf32>
    %183 = vector.broadcast %182 : vector<1x32xf32> to vector<9x32xf32>
    %184 = arith.mulf %179, %183 : vector<9x32xf32>
    %185 = arith.addf %178, %184 : vector<9x32xf32>
    %c6 = arith.constant 6 : index
    %c0_90 = arith.constant 0 : index
    %186 = vector.load %arg2[%c6, %c0_90] : memref<18x32xf32, #tpu.memory_space<vmem>>, vector<1x32xf32>
    %187 = vector.shape_cast %186 : vector<1x32xf32> to vector<32xf32>
    %188 = vector.shape_cast %187 : vector<32xf32> to vector<1x32xf32>
    %189 = vector.broadcast %188 : vector<1x32xf32> to vector<9x32xf32>
    %190 = arith.addf %185, %189 : vector<9x32xf32>
    %c2_91 = arith.constant 2 : index
    %c0_92 = arith.constant 0 : index
    %c0_93 = arith.constant 0 : index
    %191 = vector.load %arg4[%c2_91, %c0_92, %c0_93] : memref<5x32x32xbf16, #tpu.memory_space<vmem>>, vector<1x32x32xbf16>
    %192 = vector.shape_cast %191 : vector<1x32x32xbf16> to vector<32x32xbf16>
    %193 = arith.truncf %190 : vector<9x32xf32> to vector<9x32xbf16>
    %cst_94 = arith.constant dense<0.000000e+00> : vector<9x32xf32>
    %194 = tpu.matmul %193, %192, %cst_94 {dimension_numbers = #tpu.dot_dimension_numbers<[1], [0], [0], [1], [0, 0, 1, 1], [], []>} : vector<9x32xbf16>, vector<32x32xbf16>, vector<9x32xf32> -> vector<9x32xf32>
    %c7 = arith.constant 7 : index
    %c0_95 = arith.constant 0 : index
    %195 = vector.load %arg2[%c7, %c0_95] : memref<18x32xf32, #tpu.memory_space<vmem>>, vector<1x32xf32>
    %196 = vector.shape_cast %195 : vector<1x32xf32> to vector<32xf32>
    %197 = vector.shape_cast %196 : vector<32xf32> to vector<1x32xf32>
    %198 = vector.broadcast %197 : vector<1x32xf32> to vector<9x32xf32>
    %199 = arith.addf %194, %198 : vector<9x32xf32>
    %c12 = arith.constant 12 : index
    %c0_96 = arith.constant 0 : index
    %200 = vector.load %arg2[%c12, %c0_96] : memref<18x32xf32, #tpu.memory_space<vmem>>, vector<1x32xf32>
    %201 = vector.shape_cast %200 : vector<1x32xf32> to vector<32xf32>
    %c13 = arith.constant 13 : index
    %c0_97 = arith.constant 0 : index
    %202 = vector.load %arg2[%c13, %c0_97] : memref<18x32xf32, #tpu.memory_space<vmem>>, vector<1x32xf32>
    %203 = vector.shape_cast %202 : vector<1x32xf32> to vector<32xf32>
    %cst_98 = arith.constant dense<0.000000e+00> : vector<9xf32>
    %204 = vector.multi_reduction <add>, %199, %cst_98 [1] : vector<9x32xf32> to vector<9xf32>
    %205 = vector.shape_cast %204 : vector<9xf32> to vector<9x1xf32>
    %cst_99 = arith.constant 3.200000e+01 : f32
    %206 = vector.broadcast %cst_99 : f32 to vector<9x1xf32>
    %207 = arith.divf %205, %206 : vector<9x1xf32>
    %208 = vector.broadcast %207 : vector<9x1xf32> to vector<9x32xf32>
    %209 = arith.subf %199, %208 : vector<9x32xf32>
    %210 = arith.mulf %209, %209 : vector<9x32xf32>
    %cst_100 = arith.constant dense<0.000000e+00> : vector<9xf32>
    %211 = vector.multi_reduction <add>, %210, %cst_100 [1] : vector<9x32xf32> to vector<9xf32>
    %212 = vector.shape_cast %211 : vector<9xf32> to vector<9x1xf32>
    %cst_101 = arith.constant 3.200000e+01 : f32
    %213 = vector.broadcast %cst_101 : f32 to vector<9x1xf32>
    %214 = arith.divf %212, %213 : vector<9x1xf32>
    %215 = vector.broadcast %207 : vector<9x1xf32> to vector<9x32xf32>
    %216 = arith.subf %199, %215 : vector<9x32xf32>
    %cst_102 = arith.constant 9.99999974E-6 : f32
    %217 = vector.broadcast %cst_102 : f32 to vector<9x1xf32>
    %218 = arith.addf %214, %217 : vector<9x1xf32>
    %219 = math.rsqrt %218 : vector<9x1xf32>
    %220 = vector.broadcast %219 : vector<9x1xf32> to vector<9x32xf32>
    %221 = arith.mulf %216, %220 : vector<9x32xf32>
    %222 = vector.shape_cast %201 : vector<32xf32> to vector<1x32xf32>
    %223 = vector.broadcast %222 : vector<1x32xf32> to vector<9x32xf32>
    %224 = arith.mulf %221, %223 : vector<9x32xf32>
    %225 = vector.shape_cast %203 : vector<32xf32> to vector<1x32xf32>
    %226 = vector.broadcast %225 : vector<1x32xf32> to vector<9x32xf32>
    %227 = arith.addf %224, %226 : vector<9x32xf32>
    %228 = tpu.iota {dimensions = array<i32: 0>} : vector<17x1xi32>
    %c0_i32 = arith.constant 0 : i32
    %229 = vector.broadcast %c0_i32 : i32 to vector<17x1xi32>
    %230 = arith.cmpi eq, %228, %229 : vector<17x1xi32>
    %231 = vector.shape_cast %230 : vector<17x1xi1> to vector<17x1xi1>
    %232 = vector.broadcast %231 : vector<17x1xi1> to vector<17x32xi1>
    %233 = vector.shape_cast %30 : vector<1x32xf32> to vector<1x32xf32>
    %234 = vector.broadcast %233 : vector<1x32xf32> to vector<17x32xf32>
    %235 = arith.select %232, %234, %99 : vector<17x32xi1>, vector<17x32xf32>
    %cst_103 = arith.constant 0.353553385 : f32
    %236 = vector.broadcast %cst_103 : f32 to vector<17x32xf32>
    %237 = arith.mulf %235, %236 : vector<17x32xf32>
    %238 = arith.truncf %237 : vector<17x32xf32> to vector<17x32xbf16>
    %c0_104 = arith.constant 0 : index
    %c0_105 = arith.constant 0 : index
    %c0_106 = arith.constant 0 : index
    %239 = vector.load %arg10[%c0_104, %c0_105, %c0_106] : memref<4x17x32xbf16, #tpu.memory_space<vmem>>, vector<1x17x32xbf16>
    %240 = vector.shape_cast %239 : vector<1x17x32xbf16> to vector<17x32xbf16>
    %241 = vector.shape_cast %238 : vector<17x32xbf16> to vector<1x17x32xbf16>
    tpu.vector_store %arg10[%c0_104, %c0_105, %c0_106], %241 {strides = array<i32>} : memref<4x17x32xbf16, #tpu.memory_space<vmem>>, vector<1x17x32xbf16>,
    %242 = tpu.iota {dimensions = array<i32: 0>} : vector<9x1xi32>
    %c0_i32_107 = arith.constant 0 : i32
    %243 = vector.broadcast %c0_i32_107 : i32 to vector<9x1xi32>
    %244 = arith.cmpi eq, %242, %243 : vector<9x1xi32>
    %245 = vector.shape_cast %244 : vector<9x1xi1> to vector<9x1xi1>
    %246 = vector.broadcast %245 : vector<9x1xi1> to vector<9x32xi1>
    %247 = vector.shape_cast %30 : vector<1x32xf32> to vector<1x32xf32>
    %248 = vector.broadcast %247 : vector<1x32xf32> to vector<9x32xf32>
    %249 = arith.select %246, %248, %163 : vector<9x32xi1>, vector<9x32xf32>
    %250 = arith.truncf %249 : vector<9x32xf32> to vector<9x32xbf16>
    %c1_108 = arith.constant 1 : index
    %c0_109 = arith.constant 0 : index
    %c0_110 = arith.constant 0 : index
    %251 = vector.load %arg10[%c1_108, %c0_109, %c0_110] : memref<4x17x32xbf16, #tpu.memory_space<vmem>>, vector<1x9x32xbf16>
    %252 = vector.shape_cast %251 : vector<1x9x32xbf16> to vector<9x32xbf16>
    %253 = vector.shape_cast %250 : vector<9x32xbf16> to vector<1x9x32xbf16>
    tpu.vector_store %arg10[%c1_108, %c0_109, %c0_110], %253 {strides = array<i32>} : memref<4x17x32xbf16, #tpu.memory_space<vmem>>, vector<1x9x32xbf16>,
    %254 = tpu.iota {dimensions = array<i32: 0>} : vector<9x1xi32>
    %c0_i32_111 = arith.constant 0 : i32
    %255 = vector.broadcast %c0_i32_111 : i32 to vector<9x1xi32>
    %256 = arith.cmpi eq, %254, %255 : vector<9x1xi32>
    %257 = vector.shape_cast %256 : vector<9x1xi1> to vector<9x1xi1>
    %258 = vector.broadcast %257 : vector<9x1xi1> to vector<9x32xi1>
    %259 = vector.shape_cast %30 : vector<1x32xf32> to vector<1x32xf32>
    %260 = vector.broadcast %259 : vector<1x32xf32> to vector<9x32xf32>
    %261 = arith.select %258, %260, %227 : vector<9x32xi1>, vector<9x32xf32>
    %262 = arith.truncf %261 : vector<9x32xf32> to vector<9x32xbf16>
    %c2_112 = arith.constant 2 : index
    %c0_113 = arith.constant 0 : index
    %c0_114 = arith.constant 0 : index
    %263 = vector.load %arg10[%c2_112, %c0_113, %c0_114] : memref<4x17x32xbf16, #tpu.memory_space<vmem>>, vector<1x9x32xbf16>
    %264 = vector.shape_cast %263 : vector<1x9x32xbf16> to vector<9x32xbf16>
    %265 = vector.shape_cast %262 : vector<9x32xbf16> to vector<1x9x32xbf16>
    tpu.vector_store %arg10[%c2_112, %c0_113, %c0_114], %265 {strides = array<i32>} : memref<4x17x32xbf16, #tpu.memory_space<vmem>>, vector<1x9x32xbf16>,
    %c0_115 = arith.constant 0 : index
    %c0_116 = arith.constant 0 : index
    %c0_117 = arith.constant 0 : index
    %266 = vector.load %arg10[%c0_115, %c0_116, %c0_117] : memref<4x17x32xbf16, #tpu.memory_space<vmem>>, vector<1x17x8xbf16>
    %267 = vector.shape_cast %266 : vector<1x17x8xbf16> to vector<17x8xbf16>
    %c1_118 = arith.constant 1 : index
    %c0_119 = arith.constant 0 : index
    %c0_120 = arith.constant 0 : index
    %268 = vector.load %arg10[%c1_118, %c0_119, %c0_120] : memref<4x17x32xbf16, #tpu.memory_space<vmem>>, vector<1x9x8xbf16>
    %269 = vector.shape_cast %268 : vector<1x9x8xbf16> to vector<9x8xbf16>
    %c2_121 = arith.constant 2 : index
    %c0_122 = arith.constant 0 : index
    %c0_123 = arith.constant 0 : index
    %270 = vector.load %arg10[%c2_121, %c0_122, %c0_123] : memref<4x17x32xbf16, #tpu.memory_space<vmem>>, vector<1x9x8xbf16>
    %271 = vector.shape_cast %270 : vector<1x9x8xbf16> to vector<9x8xbf16>
    %cst_124 = arith.constant dense<0.000000e+00> : vector<17x9xf32>
    %272 = tpu.matmul %267, %269, %cst_124 {dimension_numbers = #tpu.dot_dimension_numbers<[1], [1], [0], [0], [0, 0, 1, 0], [], []>} : vector<17x8xbf16>, vector<9x8xbf16>, vector<17x9xf32> -> vector<17x9xf32>
    %cst_125 = arith.constant dense<0xFF800000> : vector<17xf32>
    %273 = vector.multi_reduction <maximumf>, %272, %cst_125 [1] : vector<17x9xf32> to vector<17xf32>
    %274 = vector.shape_cast %273 : vector<17xf32> to vector<17x1xf32>
    %275 = vector.broadcast %274 : vector<17x1xf32> to vector<17x9xf32>
    %276 = arith.subf %272, %275 : vector<17x9xf32>
    %277 = math.exp %276 : vector<17x9xf32>
    %cst_126 = arith.constant dense<0.000000e+00> : vector<17xf32>
    %278 = vector.multi_reduction <add>, %277, %cst_126 [1] : vector<17x9xf32> to vector<17xf32>
    %279 = vector.shape_cast %278 : vector<17xf32> to vector<17x1xf32>
    %280 = tpu.reciprocal %279 {approx = true} : vector<17x1xf32> -> vector<17x1xf32>
    %281 = arith.truncf %277 : vector<17x9xf32> to vector<17x9xbf16>
    %cst_127 = arith.constant dense<0.000000e+00> : vector<17x8xf32>
    %282 = tpu.matmul %281, %271, %cst_127 {dimension_numbers = #tpu.dot_dimension_numbers<[1], [0], [0], [1], [0, 0, 1, 1], [], []>} : vector<17x9xbf16>, vector<9x8xbf16>, vector<17x8xf32> -> vector<17x8xf32>
    %283 = vector.broadcast %280 : vector<17x1xf32> to vector<17x8xf32>
    %284 = arith.mulf %282, %283 : vector<17x8xf32>
    %285 = arith.truncf %284 : vector<17x8xf32> to vector<17x8xbf16>
    %c3_128 = arith.constant 3 : index
    %c0_129 = arith.constant 0 : index
    %c0_130 = arith.constant 0 : index
    %286 = vector.load %arg10[%c3_128, %c0_129, %c0_130] : memref<4x17x32xbf16, #tpu.memory_space<vmem>>, vector<1x17x8xbf16>
    %287 = vector.shape_cast %286 : vector<1x17x8xbf16> to vector<17x8xbf16>
    %288 = vector.shape_cast %285 : vector<17x8xbf16> to vector<1x17x8xbf16>
    tpu.vector_store %arg10[%c3_128, %c0_129, %c0_130], %288 {strides = array<i32>} : memref<4x17x32xbf16, #tpu.memory_space<vmem>>, vector<1x17x8xbf16>,
    %c0_131 = arith.constant 0 : index
    %c0_132 = arith.constant 0 : index
    %c8_133 = arith.constant 8 : index
    %289 = vector.load %arg10[%c0_131, %c0_132, %c8_133] : memref<4x17x32xbf16, #tpu.memory_space<vmem>>, vector<1x17x8xbf16>
    %290 = vector.shape_cast %289 : vector<1x17x8xbf16> to vector<17x8xbf16>
    %c1_134 = arith.constant 1 : index
    %c0_135 = arith.constant 0 : index
    %c8_136 = arith.constant 8 : index
    %291 = vector.load %arg10[%c1_134, %c0_135, %c8_136] : memref<4x17x32xbf16, #tpu.memory_space<vmem>>, vector<1x9x8xbf16>
    %292 = vector.shape_cast %291 : vector<1x9x8xbf16> to vector<9x8xbf16>
    %c2_137 = arith.constant 2 : index
    %c0_138 = arith.constant 0 : index
    %c8_139 = arith.constant 8 : index
    %293 = vector.load %arg10[%c2_137, %c0_138, %c8_139] : memref<4x17x32xbf16, #tpu.memory_space<vmem>>, vector<1x9x8xbf16>
    %294 = vector.shape_cast %293 : vector<1x9x8xbf16> to vector<9x8xbf16>
    %cst_140 = arith.constant dense<0.000000e+00> : vector<17x9xf32>
    %295 = tpu.matmul %290, %292, %cst_140 {dimension_numbers = #tpu.dot_dimension_numbers<[1], [1], [0], [0], [0, 0, 1, 0], [], []>} : vector<17x8xbf16>, vector<9x8xbf16>, vector<17x9xf32> -> vector<17x9xf32>
    %cst_141 = arith.constant dense<0xFF800000> : vector<17xf32>
    %296 = vector.multi_reduction <maximumf>, %295, %cst_141 [1] : vector<17x9xf32> to vector<17xf32>
    %297 = vector.shape_cast %296 : vector<17xf32> to vector<17x1xf32>
    %298 = vector.broadcast %297 : vector<17x1xf32> to vector<17x9xf32>
    %299 = arith.subf %295, %298 : vector<17x9xf32>
    %300 = math.exp %299 : vector<17x9xf32>
    %cst_142 = arith.constant dense<0.000000e+00> : vector<17xf32>
    %301 = vector.multi_reduction <add>, %300, %cst_142 [1] : vector<17x9xf32> to vector<17xf32>
    %302 = vector.shape_cast %301 : vector<17xf32> to vector<17x1xf32>
    %303 = tpu.reciprocal %302 {approx = true} : vector<17x1xf32> -> vector<17x1xf32>
    %304 = arith.truncf %300 : vector<17x9xf32> to vector<17x9xbf16>
    %cst_143 = arith.constant dense<0.000000e+00> : vector<17x8xf32>
    %305 = tpu.matmul %304, %294, %cst_143 {dimension_numbers = #tpu.dot_dimension_numbers<[1], [0], [0], [1], [0, 0, 1, 1], [], []>} : vector<17x9xbf16>, vector<9x8xbf16>, vector<17x8xf32> -> vector<17x8xf32>
    %306 = vector.broadcast %303 : vector<17x1xf32> to vector<17x8xf32>
    %307 = arith.mulf %305, %306 : vector<17x8xf32>
    %308 = arith.truncf %307 : vector<17x8xf32> to vector<17x8xbf16>
    %c3_144 = arith.constant 3 : index
    %c0_145 = arith.constant 0 : index
    %c8_146 = arith.constant 8 : index
    %309 = vector.load %arg10[%c3_144, %c0_145, %c8_146] : memref<4x17x32xbf16, #tpu.memory_space<vmem>>, vector<1x17x8xbf16>
    %310 = vector.shape_cast %309 : vector<1x17x8xbf16> to vector<17x8xbf16>
    %311 = vector.shape_cast %308 : vector<17x8xbf16> to vector<1x17x8xbf16>
    tpu.vector_store %arg10[%c3_144, %c0_145, %c8_146], %311 {strides = array<i32>} : memref<4x17x32xbf16, #tpu.memory_space<vmem>>, vector<1x17x8xbf16>,
    %c0_147 = arith.constant 0 : index
    %c0_148 = arith.constant 0 : index
    %c16 = arith.constant 16 : index
    %312 = vector.load %arg10[%c0_147, %c0_148, %c16] : memref<4x17x32xbf16, #tpu.memory_space<vmem>>, vector<1x17x8xbf16>
    %313 = vector.shape_cast %312 : vector<1x17x8xbf16> to vector<17x8xbf16>
    %c1_149 = arith.constant 1 : index
    %c0_150 = arith.constant 0 : index
    %c16_151 = arith.constant 16 : index
    %314 = vector.load %arg10[%c1_149, %c0_150, %c16_151] : memref<4x17x32xbf16, #tpu.memory_space<vmem>>, vector<1x9x8xbf16>
    %315 = vector.shape_cast %314 : vector<1x9x8xbf16> to vector<9x8xbf16>
    %c2_152 = arith.constant 2 : index
    %c0_153 = arith.constant 0 : index
    %c16_154 = arith.constant 16 : index
    %316 = vector.load %arg10[%c2_152, %c0_153, %c16_154] : memref<4x17x32xbf16, #tpu.memory_space<vmem>>, vector<1x9x8xbf16>
    %317 = vector.shape_cast %316 : vector<1x9x8xbf16> to vector<9x8xbf16>
    %cst_155 = arith.constant dense<0.000000e+00> : vector<17x9xf32>
    %318 = tpu.matmul %313, %315, %cst_155 {dimension_numbers = #tpu.dot_dimension_numbers<[1], [1], [0], [0], [0, 0, 1, 0], [], []>} : vector<17x8xbf16>, vector<9x8xbf16>, vector<17x9xf32> -> vector<17x9xf32>
    %cst_156 = arith.constant dense<0xFF800000> : vector<17xf32>
    %319 = vector.multi_reduction <maximumf>, %318, %cst_156 [1] : vector<17x9xf32> to vector<17xf32>
    %320 = vector.shape_cast %319 : vector<17xf32> to vector<17x1xf32>
    %321 = vector.broadcast %320 : vector<17x1xf32> to vector<17x9xf32>
    %322 = arith.subf %318, %321 : vector<17x9xf32>
    %323 = math.exp %322 : vector<17x9xf32>
    %cst_157 = arith.constant dense<0.000000e+00> : vector<17xf32>
    %324 = vector.multi_reduction <add>, %323, %cst_157 [1] : vector<17x9xf32> to vector<17xf32>
    %325 = vector.shape_cast %324 : vector<17xf32> to vector<17x1xf32>
    %326 = tpu.reciprocal %325 {approx = true} : vector<17x1xf32> -> vector<17x1xf32>
    %327 = arith.truncf %323 : vector<17x9xf32> to vector<17x9xbf16>
    %cst_158 = arith.constant dense<0.000000e+00> : vector<17x8xf32>
    %328 = tpu.matmul %327, %317, %cst_158 {dimension_numbers = #tpu.dot_dimension_numbers<[1], [0], [0], [1], [0, 0, 1, 1], [], []>} : vector<17x9xbf16>, vector<9x8xbf16>, vector<17x8xf32> -> vector<17x8xf32>
    %329 = vector.broadcast %326 : vector<17x1xf32> to vector<17x8xf32>
    %330 = arith.mulf %328, %329 : vector<17x8xf32>
    %331 = arith.truncf %330 : vector<17x8xf32> to vector<17x8xbf16>
    %c3_159 = arith.constant 3 : index
    %c0_160 = arith.constant 0 : index
    %c16_161 = arith.constant 16 : index
    %332 = vector.load %arg10[%c3_159, %c0_160, %c16_161] : memref<4x17x32xbf16, #tpu.memory_space<vmem>>, vector<1x17x8xbf16>
    %333 = vector.shape_cast %332 : vector<1x17x8xbf16> to vector<17x8xbf16>
    %334 = vector.shape_cast %331 : vector<17x8xbf16> to vector<1x17x8xbf16>
    tpu.vector_store %arg10[%c3_159, %c0_160, %c16_161], %334 {strides = array<i32>} : memref<4x17x32xbf16, #tpu.memory_space<vmem>>, vector<1x17x8xbf16>,
    %c0_162 = arith.constant 0 : index
    %c0_163 = arith.constant 0 : index
    %c24 = arith.constant 24 : index
    %335 = vector.load %arg10[%c0_162, %c0_163, %c24] : memref<4x17x32xbf16, #tpu.memory_space<vmem>>, vector<1x17x8xbf16>
    %336 = vector.shape_cast %335 : vector<1x17x8xbf16> to vector<17x8xbf16>
    %c1_164 = arith.constant 1 : index
    %c0_165 = arith.constant 0 : index
    %c24_166 = arith.constant 24 : index
    %337 = vector.load %arg10[%c1_164, %c0_165, %c24_166] : memref<4x17x32xbf16, #tpu.memory_space<vmem>>, vector<1x9x8xbf16>
    %338 = vector.shape_cast %337 : vector<1x9x8xbf16> to vector<9x8xbf16>
    %c2_167 = arith.constant 2 : index
    %c0_168 = arith.constant 0 : index
    %c24_169 = arith.constant 24 : index
    %339 = vector.load %arg10[%c2_167, %c0_168, %c24_169] : memref<4x17x32xbf16, #tpu.memory_space<vmem>>, vector<1x9x8xbf16>
    %340 = vector.shape_cast %339 : vector<1x9x8xbf16> to vector<9x8xbf16>
    %cst_170 = arith.constant dense<0.000000e+00> : vector<17x9xf32>
    %341 = tpu.matmul %336, %338, %cst_170 {dimension_numbers = #tpu.dot_dimension_numbers<[1], [1], [0], [0], [0, 0, 1, 0], [], []>} : vector<17x8xbf16>, vector<9x8xbf16>, vector<17x9xf32> -> vector<17x9xf32>
    %cst_171 = arith.constant dense<0xFF800000> : vector<17xf32>
    %342 = vector.multi_reduction <maximumf>, %341, %cst_171 [1] : vector<17x9xf32> to vector<17xf32>
    %343 = vector.shape_cast %342 : vector<17xf32> to vector<17x1xf32>
    %344 = vector.broadcast %343 : vector<17x1xf32> to vector<17x9xf32>
    %345 = arith.subf %341, %344 : vector<17x9xf32>
    %346 = math.exp %345 : vector<17x9xf32>
    %cst_172 = arith.constant dense<0.000000e+00> : vector<17xf32>
    %347 = vector.multi_reduction <add>, %346, %cst_172 [1] : vector<17x9xf32> to vector<17xf32>
    %348 = vector.shape_cast %347 : vector<17xf32> to vector<17x1xf32>
    %349 = tpu.reciprocal %348 {approx = true} : vector<17x1xf32> -> vector<17x1xf32>
    %350 = arith.truncf %346 : vector<17x9xf32> to vector<17x9xbf16>
    %cst_173 = arith.constant dense<0.000000e+00> : vector<17x8xf32>
    %351 = tpu.matmul %350, %340, %cst_173 {dimension_numbers = #tpu.dot_dimension_numbers<[1], [0], [0], [1], [0, 0, 1, 1], [], []>} : vector<17x9xbf16>, vector<9x8xbf16>, vector<17x8xf32> -> vector<17x8xf32>
    %352 = vector.broadcast %349 : vector<17x1xf32> to vector<17x8xf32>
    %353 = arith.mulf %351, %352 : vector<17x8xf32>
    %354 = arith.truncf %353 : vector<17x8xf32> to vector<17x8xbf16>
    %c3_174 = arith.constant 3 : index
    %c0_175 = arith.constant 0 : index
    %c24_176 = arith.constant 24 : index
    %355 = vector.load %arg10[%c3_174, %c0_175, %c24_176] : memref<4x17x32xbf16, #tpu.memory_space<vmem>>, vector<1x17x8xbf16>
    %356 = vector.shape_cast %355 : vector<1x17x8xbf16> to vector<17x8xbf16>
    %357 = vector.shape_cast %354 : vector<17x8xbf16> to vector<1x17x8xbf16>
    tpu.vector_store %arg10[%c3_174, %c0_175, %c24_176], %357 {strides = array<i32>} : memref<4x17x32xbf16, #tpu.memory_space<vmem>>, vector<1x17x8xbf16>,
    %c3_177 = arith.constant 3 : index
    %c0_178 = arith.constant 0 : index
    %c0_179 = arith.constant 0 : index
    %358 = vector.load %arg10[%c3_177, %c0_178, %c0_179] : memref<4x17x32xbf16, #tpu.memory_space<vmem>>, vector<1x17x32xbf16>
    %359 = vector.shape_cast %358 : vector<1x17x32xbf16> to vector<17x32xbf16>
    %c3_180 = arith.constant 3 : index
    %c0_181 = arith.constant 0 : index
    %c0_182 = arith.constant 0 : index
    %360 = vector.load %arg4[%c3_180, %c0_181, %c0_182] : memref<5x32x32xbf16, #tpu.memory_space<vmem>>, vector<1x32x32xbf16>
    %361 = vector.shape_cast %360 : vector<1x32x32xbf16> to vector<32x32xbf16>
    %cst_183 = arith.constant dense<0.000000e+00> : vector<17x32xf32>
    %362 = tpu.matmul %359, %361, %cst_183 {dimension_numbers = #tpu.dot_dimension_numbers<[1], [0], [0], [1], [0, 0, 1, 1], [], []>} : vector<17x32xbf16>, vector<32x32xbf16>, vector<17x32xf32> -> vector<17x32xf32>
    %363 = arith.addf %1, %362 : vector<17x32xf32>
    %c14 = arith.constant 14 : index
    %c0_184 = arith.constant 0 : index
    %364 = vector.load %arg2[%c14, %c0_184] : memref<18x32xf32, #tpu.memory_space<vmem>>, vector<1x32xf32>
    %365 = vector.shape_cast %364 : vector<1x32xf32> to vector<32xf32>
    %c15 = arith.constant 15 : index
    %c0_185 = arith.constant 0 : index
    %366 = vector.load %arg2[%c15, %c0_185] : memref<18x32xf32, #tpu.memory_space<vmem>>, vector<1x32xf32>
    %367 = vector.shape_cast %366 : vector<1x32xf32> to vector<32xf32>
    %cst_186 = arith.constant dense<0.000000e+00> : vector<17xf32>
    %368 = vector.multi_reduction <add>, %363, %cst_186 [1] : vector<17x32xf32> to vector<17xf32>
    %369 = vector.shape_cast %368 : vector<17xf32> to vector<17x1xf32>
    %cst_187 = arith.constant 3.200000e+01 : f32
    %370 = vector.broadcast %cst_187 : f32 to vector<17x1xf32>
    %371 = arith.divf %369, %370 : vector<17x1xf32>
    %372 = vector.broadcast %371 : vector<17x1xf32> to vector<17x32xf32>
    %373 = arith.subf %363, %372 : vector<17x32xf32>
    %374 = arith.mulf %373, %373 : vector<17x32xf32>
    %cst_188 = arith.constant dense<0.000000e+00> : vector<17xf32>
    %375 = vector.multi_reduction <add>, %374, %cst_188 [1] : vector<17x32xf32> to vector<17xf32>
    %376 = vector.shape_cast %375 : vector<17xf32> to vector<17x1xf32>
    %cst_189 = arith.constant 3.200000e+01 : f32
    %377 = vector.broadcast %cst_189 : f32 to vector<17x1xf32>
    %378 = arith.divf %376, %377 : vector<17x1xf32>
    %379 = vector.broadcast %371 : vector<17x1xf32> to vector<17x32xf32>
    %380 = arith.subf %363, %379 : vector<17x32xf32>
    %cst_190 = arith.constant 9.99999974E-6 : f32
    %381 = vector.broadcast %cst_190 : f32 to vector<17x1xf32>
    %382 = arith.addf %378, %381 : vector<17x1xf32>
    %383 = math.rsqrt %382 : vector<17x1xf32>
    %384 = vector.broadcast %383 : vector<17x1xf32> to vector<17x32xf32>
    %385 = arith.mulf %380, %384 : vector<17x32xf32>
    %386 = vector.shape_cast %365 : vector<32xf32> to vector<1x32xf32>
    %387 = vector.broadcast %386 : vector<1x32xf32> to vector<17x32xf32>
    %388 = arith.mulf %385, %387 : vector<17x32xf32>
    %389 = vector.shape_cast %367 : vector<32xf32> to vector<1x32xf32>
    %390 = vector.broadcast %389 : vector<1x32xf32> to vector<17x32xf32>
    %391 = arith.addf %388, %390 : vector<17x32xf32>
    %c4_191 = arith.constant 4 : index
    %c0_192 = arith.constant 0 : index
    %c0_193 = arith.constant 0 : index
    %392 = vector.load %arg4[%c4_191, %c0_192, %c0_193] : memref<5x32x32xbf16, #tpu.memory_space<vmem>>, vector<1x32x32xbf16>
    %393 = vector.shape_cast %392 : vector<1x32x32xbf16> to vector<32x32xbf16>
    %394 = arith.truncf %391 : vector<17x32xf32> to vector<17x32xbf16>
    %cst_194 = arith.constant dense<0.000000e+00> : vector<17x32xf32>
    %395 = tpu.matmul %394, %393, %cst_194 {dimension_numbers = #tpu.dot_dimension_numbers<[1], [0], [0], [1], [0, 0, 1, 1], [], []>} : vector<17x32xbf16>, vector<32x32xbf16>, vector<17x32xf32> -> vector<17x32xf32>
    %c16_195 = arith.constant 16 : index
    %c0_196 = arith.constant 0 : index
    %396 = vector.load %arg2[%c16_195, %c0_196] : memref<18x32xf32, #tpu.memory_space<vmem>>, vector<1x32xf32>
    %397 = vector.shape_cast %396 : vector<1x32xf32> to vector<32xf32>
    %398 = vector.shape_cast %397 : vector<32xf32> to vector<1x32xf32>
    %399 = vector.broadcast %398 : vector<1x32xf32> to vector<17x32xf32>
    %400 = arith.addf %395, %399 : vector<17x32xf32>
    %c1_197 = arith.constant 1 : index
    %c0_198 = arith.constant 0 : index
    %401 = vector.load %arg9[%c1_197, %c0_198] : memref<19x128xf32, #tpu.memory_space<vmem>>, vector<17x32xf32>
    tpu.vector_store %arg9[%c1_197, %c0_198], %400 {strides = array<i32>} : memref<19x128xf32, #tpu.memory_space<vmem>>, vector<17x32xf32>,
    %c1_199 = arith.constant 1 : index
    %c32 = arith.constant 32 : index
    %402 = vector.load %arg9[%c1_199, %c32] : memref<19x128xf32, #tpu.memory_space<vmem>>, vector<17x32xf32>
    tpu.vector_store %arg9[%c1_199, %c32], %400 {strides = array<i32>} : memref<19x128xf32, #tpu.memory_space<vmem>>, vector<17x32xf32>,
    %c1_200 = arith.constant 1 : index
    %c64 = arith.constant 64 : index
    %403 = vector.load %arg9[%c1_200, %c64] : memref<19x128xf32, #tpu.memory_space<vmem>>, vector<17x32xf32>
    tpu.vector_store %arg9[%c1_200, %c64], %400 {strides = array<i32>} : memref<19x128xf32, #tpu.memory_space<vmem>>, vector<17x32xf32>,
    %c1_201 = arith.constant 1 : index
    %c96 = arith.constant 96 : index
    %404 = vector.load %arg9[%c1_201, %c96] : memref<19x128xf32, #tpu.memory_space<vmem>>, vector<17x32xf32>
    tpu.vector_store %arg9[%c1_201, %c96], %400 {strides = array<i32>} : memref<19x128xf32, #tpu.memory_space<vmem>>, vector<17x32xf32>,
    %cst_202 = arith.constant 0.000000e+00 : f32
    %405 = vector.broadcast %cst_202 : f32 to vector<2x128xf32>
    %c0_203 = arith.constant 0 : index
    %c0_204 = arith.constant 0 : index
    %406 = vector.load %arg9[%c0_203, %c0_204] : memref<19x128xf32, #tpu.memory_space<vmem>>, vector<2x128xf32>
    tpu.vector_store %arg9[%c0_203, %c0_204], %405 {strides = array<i32>} : memref<19x128xf32, #tpu.memory_space<vmem>>, vector<2x128xf32>,
    %cst_205 = arith.constant 0.000000e+00 : f32
    %407 = vector.broadcast %cst_205 : f32 to vector<1x128xf32>
    %c18 = arith.constant 18 : index
    %c0_206 = arith.constant 0 : index
    %408 = vector.load %arg9[%c18, %c0_206] : memref<19x128xf32, #tpu.memory_space<vmem>>, vector<1x128xf32>
    tpu.vector_store %arg9[%c18, %c0_206], %407 {strides = array<i32>} : memref<19x128xf32, #tpu.memory_space<vmem>>, vector<1x128xf32>,
    %cst_207 = arith.constant 0.000000e+00 : f32
    %409 = vector.broadcast %cst_207 : f32 to vector<17x128xf32>
    %c0_208 = arith.constant 0 : index
    %c0_209 = arith.constant 0 : index
    %410 = vector.load %arg9[%c0_208, %c0_209] : memref<19x128xf32, #tpu.memory_space<vmem>>, vector<17x128xf32>
    %c0_210 = arith.constant 0 : index
    %c0_211 = arith.constant 0 : index
    %411 = vector.load %arg5[%c0_210, %c0_211] : memref<4x128xf32, #tpu.memory_space<vmem>>, vector<1x128xf32>
    %412 = vector.shape_cast %411 : vector<1x128xf32> to vector<128xf32>
    %413 = vector.shape_cast %412 : vector<128xf32> to vector<1x128xf32>
    %414 = vector.broadcast %413 : vector<1x128xf32> to vector<17x128xf32>
    %415 = arith.mulf %410, %414 : vector<17x128xf32>
    %416 = arith.addf %409, %415 : vector<17x128xf32>
    %c1_212 = arith.constant 1 : index
    %c0_213 = arith.constant 0 : index
    %417 = vector.load %arg9[%c1_212, %c0_213] : memref<19x128xf32, #tpu.memory_space<vmem>>, vector<17x128xf32>
    %c1_214 = arith.constant 1 : index
    %c0_215 = arith.constant 0 : index
    %418 = vector.load %arg5[%c1_214, %c0_215] : memref<4x128xf32, #tpu.memory_space<vmem>>, vector<1x128xf32>
    %419 = vector.shape_cast %418 : vector<1x128xf32> to vector<128xf32>
    %420 = vector.shape_cast %419 : vector<128xf32> to vector<1x128xf32>
    %421 = vector.broadcast %420 : vector<1x128xf32> to vector<17x128xf32>
    %422 = arith.mulf %417, %421 : vector<17x128xf32>
    %423 = arith.addf %416, %422 : vector<17x128xf32>
    %c2_216 = arith.constant 2 : index
    %c0_217 = arith.constant 0 : index
    %424 = vector.load %arg9[%c2_216, %c0_217] : memref<19x128xf32, #tpu.memory_space<vmem>>, vector<17x128xf32>
    %c2_218 = arith.constant 2 : index
    %c0_219 = arith.constant 0 : index
    %425 = vector.load %arg5[%c2_218, %c0_219] : memref<4x128xf32, #tpu.memory_space<vmem>>, vector<1x128xf32>
    %426 = vector.shape_cast %425 : vector<1x128xf32> to vector<128xf32>
    %427 = vector.shape_cast %426 : vector<128xf32> to vector<1x128xf32>
    %428 = vector.broadcast %427 : vector<1x128xf32> to vector<17x128xf32>
    %429 = arith.mulf %424, %428 : vector<17x128xf32>
    %430 = arith.addf %423, %429 : vector<17x128xf32>
    %c3_220 = arith.constant 3 : index
    %c0_221 = arith.constant 0 : index
    %431 = vector.load %arg5[%c3_220, %c0_221] : memref<4x128xf32, #tpu.memory_space<vmem>>, vector<1x128xf32>
    %432 = vector.shape_cast %431 : vector<1x128xf32> to vector<128xf32>
    %433 = vector.shape_cast %432 : vector<128xf32> to vector<1x128xf32>
    %434 = vector.broadcast %433 : vector<1x128xf32> to vector<17x128xf32>
    %435 = arith.addf %430, %434 : vector<17x128xf32>
    %cst_222 = arith.constant 5.000000e-01 : f32
    %436 = vector.broadcast %cst_222 : f32 to vector<17x128xf32>
    %437 = arith.mulf %436, %435 : vector<17x128xf32>
    %cst_223 = arith.constant 4.471500e-02 : f32
    %438 = vector.broadcast %cst_223 : f32 to vector<17x128xf32>
    %439 = arith.mulf %438, %435 : vector<17x128xf32>
    %440 = arith.mulf %439, %435 : vector<17x128xf32>
    %441 = arith.mulf %440, %435 : vector<17x128xf32>
    %442 = arith.addf %435, %441 : vector<17x128xf32>
    %cst_224 = arith.constant 0.797884583 : f32
    %443 = vector.broadcast %cst_224 : f32 to vector<17x128xf32>
    %444 = arith.mulf %443, %442 : vector<17x128xf32>
    %445 = math.tanh %444 : vector<17x128xf32>
    %cst_225 = arith.constant 1.000000e+00 : f32
    %446 = vector.broadcast %cst_225 : f32 to vector<17x128xf32>
    %447 = arith.addf %446, %445 : vector<17x128xf32>
    %448 = arith.mulf %437, %447 : vector<17x128xf32>
    %c0_226 = arith.constant 0 : index
    %c0_227 = arith.constant 0 : index
    %449 = vector.load %arg6[%c0_226, %c0_227] : memref<128x32xbf16, #tpu.memory_space<vmem>>, vector<128x32xbf16>
    %450 = arith.truncf %448 : vector<17x128xf32> to vector<17x128xbf16>
    %cst_228 = arith.constant dense<0.000000e+00> : vector<17x32xf32>
    %451 = tpu.matmul %450, %449, %cst_228 {dimension_numbers = #tpu.dot_dimension_numbers<[1], [0], [0], [1], [0, 0, 1, 1], [], []>} : vector<17x128xbf16>, vector<128x32xbf16>, vector<17x32xf32> -> vector<17x32xf32>
    %c17 = arith.constant 17 : index
    %c0_229 = arith.constant 0 : index
    %452 = vector.load %arg2[%c17, %c0_229] : memref<18x32xf32, #tpu.memory_space<vmem>>, vector<1x32xf32>
    %453 = vector.shape_cast %452 : vector<1x32xf32> to vector<32xf32>
    %454 = vector.shape_cast %453 : vector<32xf32> to vector<1x32xf32>
    %455 = vector.broadcast %454 : vector<1x32xf32> to vector<17x32xf32>
    %456 = arith.addf %451, %455 : vector<17x32xf32>
    %457 = tpu.iota {dimensions = array<i32: 0>} : vector<17x1xi32>
    %c0_i32_230 = arith.constant 0 : i32
    %458 = vector.broadcast %c0_i32_230 : i32 to vector<17x1xi32>
    %459 = arith.cmpi eq, %457, %458 : vector<17x1xi32>
    %460 = vector.shape_cast %459 : vector<17x1xi1> to vector<17x1xi1>
    %461 = vector.broadcast %460 : vector<17x1xi1> to vector<17x32xi1>
    %462 = arith.select %461, %391, %456 : vector<17x32xi1>, vector<17x32xf32>
    %463 = arith.addf %363, %462 : vector<17x32xf32>
    %c0_231 = arith.constant 0 : index
    %c0_232 = arith.constant 0 : index
    %c0_233 = arith.constant 0 : index
    %464 = vector.load %arg7[%c0_231, %c0_232, %c0_233] : memref<1x17x32xf32, #tpu.memory_space<vmem>>, vector<1x17x32xf32>
    %465 = vector.shape_cast %464 : vector<1x17x32xf32> to vector<17x32xf32>
    %466 = vector.shape_cast %463 : vector<17x32xf32> to vector<1x17x32xf32>
    tpu.vector_store %arg7[%c0_231, %c0_232, %c0_233], %466 {strides = array<i32>} : memref<1x17x32xf32, #tpu.memory_space<vmem>>, vector<1x17x32xf32>,
    return
  }
  func.func @transform_0(%arg0: i32) -> (i32, i32, i32) {
    %c0_i32 = arith.constant 0 : i32
    %c0_i32_0 = arith.constant 0 : i32
    %c0_i32_1 = arith.constant 0 : i32
    return %arg0, %c0_i32, %c0_i32_0 : i32, i32, i32
  }
  func.func @transform_1(%arg0: i32) -> (i32, i32) {
    %c0_i32 = arith.constant 0 : i32
    %c0_i32_0 = arith.constant 0 : i32
    %c0_i32_1 = arith.constant 0 : i32
    return %c0_i32, %c0_i32_0 : i32, i32
  }
  func.func @transform_2(%arg0: i32) -> (i32, i32, i32) {
    %c0_i32 = arith.constant 0 : i32
    %c0_i32_0 = arith.constant 0 : i32
    %c0_i32_1 = arith.constant 0 : i32
    %c0_i32_2 = arith.constant 0 : i32
    return %c0_i32, %c0_i32_0, %c0_i32_1 : i32, i32, i32
  }
  func.func @transform_3(%arg0: i32) -> (i32, i32, i32) {
    %c0_i32 = arith.constant 0 : i32
    %c0_i32_0 = arith.constant 0 : i32
    %c0_i32_1 = arith.constant 0 : i32
    %c0_i32_2 = arith.constant 0 : i32
    return %c0_i32, %c0_i32_0, %c0_i32_1 : i32, i32, i32
  }
  func.func @transform_4(%arg0: i32) -> (i32, i32) {
    %c0_i32 = arith.constant 0 : i32
    %c0_i32_0 = arith.constant 0 : i32
    %c0_i32_1 = arith.constant 0 : i32
    return %c0_i32, %c0_i32_0 : i32, i32
  }
  func.func @transform_5(%arg0: i32) -> (i32, i32) {
    %c0_i32 = arith.constant 0 : i32
    %c0_i32_0 = arith.constant 0 : i32
    %c0_i32_1 = arith.constant 0 : i32
    return %c0_i32, %c0_i32_0 : i32, i32
  }
  func.func @transform_6(%arg0: i32) -> (i32, i32, i32) {
    %c0_i32 = arith.constant 0 : i32
    %c0_i32_0 = arith.constant 0 : i32
    %c0_i32_1 = arith.constant 0 : i32
    return %arg0, %c0_i32, %c0_i32_0 : i32, i32, i32
  }
}

module attributes {stable_mosaic.version = 11 : i64} {
  func.func @_mhsa_ffn_kernel(%arg0: i32, %arg1: memref<1x17x32xf32, #tpu.memory_space<vmem>>, %arg2: memref<18x32xf32, #tpu.memory_space<vmem>>, %arg3: memref<3x3x32xf32, #tpu.memory_space<vmem>>, %arg4: memref<5x32x32xbf16, #tpu.memory_space<vmem>>, %arg5: memref<4x128xf32, #tpu.memory_space<vmem>>, %arg6: memref<128x32xbf16, #tpu.memory_space<vmem>>, %arg7: memref<1x17x32xf32, #tpu.memory_space<vmem>>, %arg8: memref<20x32xf32, #tpu.memory_space<vmem>>, %arg9: memref<19x128xf32, #tpu.memory_space<vmem>>, %arg10: memref<4x17x32xbf16, #tpu.memory_space<vmem>>) attributes {dimension_semantics = [#tpu.dimension_semantics<parallel>], iteration_bounds = array<i64: 2>, scalar_prefetch = 0 : i64, scratch_operands = 3 : i64, tpu.core_type = #tpu.core_type<tc>, window_params = [{transform_indices = @transform_0, window_bounds = array<i64: 1, 17, 32>}, {pipeline_mode = #tpu.pipeline_mode<synchronous>, transform_indices = @transform_1, window_bounds = array<i64: 18, 32>}, {pipeline_mode = #tpu.pipeline_mode<synchronous>, transform_indices = @transform_2, window_bounds = array<i64: 3, 3, 32>}, {pipeline_mode = #tpu.pipeline_mode<synchronous>, transform_indices = @transform_3, window_bounds = array<i64: 5, 32, 32>}, {pipeline_mode = #tpu.pipeline_mode<synchronous>, transform_indices = @transform_4, window_bounds = array<i64: 4, 128>}, {pipeline_mode = #tpu.pipeline_mode<synchronous>, transform_indices = @transform_5, window_bounds = array<i64: 128, 32>}, {transform_indices = @transform_6, window_bounds = array<i64: 1, 17, 32>}]} {
    %c0 = arith.constant 0 : index
    %c0_0 = arith.constant 0 : index
    %c0_1 = arith.constant 0 : index
    %0 = vector.load %arg1[%c0, %c0_0, %c0_1] : memref<1x17x32xf32, #tpu.memory_space<vmem>>, vector<1x17x32xf32>
    %1 = vector.shape_cast %0 : vector<1x17x32xf32> to vector<17x32xf32>
    %c0_2 = arith.constant 0 : index
    %c0_3 = arith.constant 0 : index
    %2 = vector.load %arg2[%c0_2, %c0_3] : memref<18x32xf32, #tpu.memory_space<vmem>>, vector<1x32xf32>
    %3 = vector.shape_cast %2 : vector<1x32xf32> to vector<32xf32>
    %c1 = arith.constant 1 : index
    %c0_4 = arith.constant 0 : index
    %4 = vector.load %arg2[%c1, %c0_4] : memref<18x32xf32, #tpu.memory_space<vmem>>, vector<1x32xf32>
    %5 = vector.shape_cast %4 : vector<1x32xf32> to vector<32xf32>
    %cst = arith.constant dense<0.000000e+00> : vector<17xf32>
    %6 = vector.multi_reduction <add>, %1, %cst [1] : vector<17x32xf32> to vector<17xf32>
    %7 = vector.shape_cast %6 : vector<17xf32> to vector<17x1xf32>
    %cst_5 = arith.constant 3.200000e+01 : f32
    %8 = vector.broadcast %cst_5 : f32 to vector<17x1xf32>
    %9 = arith.divf %7, %8 : vector<17x1xf32>
    %10 = vector.broadcast %9 : vector<17x1xf32> to vector<17x32xf32>
    %11 = arith.subf %1, %10 : vector<17x32xf32>
    %12 = arith.mulf %11, %11 : vector<17x32xf32>
    %cst_6 = arith.constant dense<0.000000e+00> : vector<17xf32>
    %13 = vector.multi_reduction <add>, %12, %cst_6 [1] : vector<17x32xf32> to vector<17xf32>
    %14 = vector.shape_cast %13 : vector<17xf32> to vector<17x1xf32>
    %cst_7 = arith.constant 3.200000e+01 : f32
    %15 = vector.broadcast %cst_7 : f32 to vector<17x1xf32>
    %16 = arith.divf %14, %15 : vector<17x1xf32>
    %17 = vector.broadcast %9 : vector<17x1xf32> to vector<17x32xf32>
    %18 = arith.subf %1, %17 : vector<17x32xf32>
    %cst_8 = arith.constant 9.99999974E-6 : f32
    %19 = vector.broadcast %cst_8 : f32 to vector<17x1xf32>
    %20 = arith.addf %16, %19 : vector<17x1xf32>
    %21 = math.rsqrt %20 : vector<17x1xf32>
    %22 = vector.broadcast %21 : vector<17x1xf32> to vector<17x32xf32>
    %23 = arith.mulf %18, %22 : vector<17x32xf32>
    %24 = vector.shape_cast %3 : vector<32xf32> to vector<1x32xf32>
    %25 = vector.broadcast %24 : vector<1x32xf32> to vector<17x32xf32>
    %26 = arith.mulf %23, %25 : vector<17x32xf32>
    %27 = vector.shape_cast %5 : vector<32xf32> to vector<1x32xf32>
    %28 = vector.broadcast %27 : vector<1x32xf32> to vector<17x32xf32>
    %29 = arith.addf %26, %28 : vector<17x32xf32>
    %30 = vector.extract_strided_slice %29 {offsets = [0, 0], sizes = [1, 32], strides = [1, 1]} : vector<17x32xf32> to vector<1x32xf32>
    %c2 = arith.constant 2 : index
    %c0_9 = arith.constant 0 : index
    %31 = vector.load %arg8[%c2, %c0_9] : memref<20x32xf32, #tpu.memory_space<vmem>>, vector<17x32xf32>
    tpu.vector_store %arg8[%c2, %c0_9], %29 {strides = array<i32>} : memref<20x32xf32, #tpu.memory_space<vmem>>, vector<17x32xf32>,
    %cst_10 = arith.constant 0.000000e+00 : f32
    %32 = vector.broadcast %cst_10 : f32 to vector<3x32xf32>
    %c0_11 = arith.constant 0 : index
    %c0_12 = arith.constant 0 : index
    %33 = vector.load %arg8[%c0_11, %c0_12] : memref<20x32xf32, #tpu.memory_space<vmem>>, vector<3x32xf32>
    tpu.vector_store %arg8[%c0_11, %c0_12], %32 {strides = array<i32>} : memref<20x32xf32, #tpu.memory_space<vmem>>, vector<3x32xf32>,
    %cst_13 = arith.constant 0.000000e+00 : f32
    %34 = vector.broadcast %cst_13 : f32 to vector<1x32xf32>
    %c19 = arith.constant 19 : index
    %c0_14 = arith.constant 0 : index
    %35 = vector.load %arg8[%c19, %c0_14] : memref<20x32xf32, #tpu.memory_space<vmem>>, vector<1x32xf32>
    tpu.vector_store %arg8[%c19, %c0_14], %34 {strides = array<i32>} : memref<20x32xf32, #tpu.memory_space<vmem>>, vector<1x32xf32>,
    %cst_15 = arith.constant 0.000000e+00 : f32
    %36 = vector.broadcast %cst_15 : f32 to vector<17x32xf32>
    %c1_16 = arith.constant 1 : index
    %c0_17 = arith.constant 0 : index
    %37 = vector.load %arg8[%c1_16, %c0_17] : memref<20x32xf32, #tpu.memory_space<vmem>>, vector<17x32xf32>
    %c0_18 = arith.constant 0 : index
    %c0_19 = arith.constant 0 : index
    %c0_20 = arith.constant 0 : index
    %38 = vector.load %arg3[%c0_18, %c0_19, %c0_20] : memref<3x3x32xf32, #tpu.memory_space<vmem>>, vector<1x1x32xf32>
    %39 = vector.shape_cast %38 : vector<1x1x32xf32> to vector<32xf32>
    %40 = vector.shape_cast %39 : vector<32xf32> to vector<1x32xf32>
    %41 = vector.broadcast %40 : vector<1x32xf32> to vector<17x32xf32>
    %42 = arith.mulf %37, %41 : vector<17x32xf32>
    %43 = arith.addf %36, %42 : vector<17x32xf32>
    %c2_21 = arith.constant 2 : index
    %c0_22 = arith.constant 0 : index
    %44 = vector.load %arg8[%c2_21, %c0_22] : memref<20x32xf32, #tpu.memory_space<vmem>>, vector<17x32xf32>
    %c0_23 = arith.constant 0 : index
    %c1_24 = arith.constant 1 : index
    %c0_25 = arith.constant 0 : index
    %45 = vector.load %arg3[%c0_23, %c1_24, %c0_25] : memref<3x3x32xf32, #tpu.memory_space<vmem>>, vector<1x1x32xf32>
    %46 = vector.shape_cast %45 : vector<1x1x32xf32> to vector<32xf32>
    %47 = vector.shape_cast %46 : vector<32xf32> to vector<1x32xf32>
    %48 = vector.broadcast %47 : vector<1x32xf32> to vector<17x32xf32>
    %49 = arith.mulf %44, %48 : vector<17x32xf32>
    %50 = arith.addf %43, %49 : vector<17x32xf32>
    %c3 = arith.constant 3 : index
    %c0_26 = arith.constant 0 : index
    %51 = vector.load %arg8[%c3, %c0_26] : memref<20x32xf32, #tpu.memory_space<vmem>>, vector<17x32xf32>
    %c0_27 = arith.constant 0 : index
    %c2_28 = arith.constant 2 : index
    %c0_29 = arith.constant 0 : index
    %52 = vector.load %arg3[%c0_27, %c2_28, %c0_29] : memref<3x3x32xf32, #tpu.memory_space<vmem>>, vector<1x1x32xf32>
    %53 = vector.shape_cast %52 : vector<1x1x32xf32> to vector<32xf32>
    %54 = vector.shape_cast %53 : vector<32xf32> to vector<1x32xf32>
    %55 = vector.broadcast %54 : vector<1x32xf32> to vector<17x32xf32>
    %56 = arith.mulf %51, %55 : vector<17x32xf32>
    %57 = arith.addf %50, %56 : vector<17x32xf32>
    %c2_30 = arith.constant 2 : index
    %c0_31 = arith.constant 0 : index
    %58 = vector.load %arg2[%c2_30, %c0_31] : memref<18x32xf32, #tpu.memory_space<vmem>>, vector<1x32xf32>
    %59 = vector.shape_cast %58 : vector<1x32xf32> to vector<32xf32>
    %60 = vector.shape_cast %59 : vector<32xf32> to vector<1x32xf32>
    %61 = vector.broadcast %60 : vector<1x32xf32> to vector<17x32xf32>
    %62 = arith.addf %57, %61 : vector<17x32xf32>
    %c0_32 = arith.constant 0 : index
    %c0_33 = arith.constant 0 : index
    %c0_34 = arith.constant 0 : index
    %63 = vector.load %arg4[%c0_32, %c0_33, %c0_34] : memref<5x32x32xbf16, #tpu.memory_space<vmem>>, vector<1x32x32xbf16>
    %64 = vector.shape_cast %63 : vector<1x32x32xbf16> to vector<32x32xbf16>
    %65 = arith.truncf %62 : vector<17x32xf32> to vector<17x32xbf16>
    %cst_35 = arith.constant dense<0.000000e+00> : vector<17x32xf32>
    %66 = tpu.matmul %65, %64, %cst_35 {dimension_numbers = #tpu.dot_dimension_numbers<[1], [0], [0], [1], [0, 0, 1, 1], [], []>} : vector<17x32xbf16>, vector<32x32xbf16>, vector<17x32xf32> -> vector<17x32xf32>
    %c3_36 = arith.constant 3 : index
    %c0_37 = arith.constant 0 : index
    %67 = vector.load %arg2[%c3_36, %c0_37] : memref<18x32xf32, #tpu.memory_space<vmem>>, vector<1x32xf32>
    %68 = vector.shape_cast %67 : vector<1x32xf32> to vector<32xf32>
    %69 = vector.shape_cast %68 : vector<32xf32> to vector<1x32xf32>
    %70 = vector.broadcast %69 : vector<1x32xf32> to vector<17x32xf32>
    %71 = arith.addf %66, %70 : vector<17x32xf32>
    %c8 = arith.constant 8 : index
    %c0_38 = arith.constant 0 : index
    %72 = vector.load %arg2[%c8, %c0_38] : memref<18x32xf32, #tpu.memory_space<vmem>>, vector<1x32xf32>
    %73 = vector.shape_cast %72 : vector<1x32xf32> to vector<32xf32>
    %c9 = arith.constant 9 : index
    %c0_39 = arith.constant 0 : index
    %74 = vector.load %arg2[%c9, %c0_39] : memref<18x32xf32, #tpu.memory_space<vmem>>, vector<1x32xf32>
    %75 = vector.shape_cast %74 : vector<1x32xf32> to vector<32xf32>
    %cst_40 = arith.constant dense<0.000000e+00> : vector<17xf32>
    %76 = vector.multi_reduction <add>, %71, %cst_40 [1] : vector<17x32xf32> to vector<17xf32>
    %77 = vector.shape_cast %76 : vector<17xf32> to vector<17x1xf32>
    %cst_41 = arith.constant 3.200000e+01 : f32
    %78 = vector.broadcast %cst_41 : f32 to vector<17x1xf32>
    %79 = arith.divf %77, %78 : vector<17x1xf32>
    %80 = vector.broadcast %79 : vector<17x1xf32> to vector<17x32xf32>
    %81 = arith.subf %71, %80 : vector<17x32xf32>
    %82 = arith.mulf %81, %81 : vector<17x32xf32>
    %cst_42 = arith.constant dense<0.000000e+00> : vector<17xf32>
    %83 = vector.multi_reduction <add>, %82, %cst_42 [1] : vector<17x32xf32> to vector<17xf32>
    %84 = vector.shape_cast %83 : vector<17xf32> to vector<17x1xf32>
    %cst_43 = arith.constant 3.200000e+01 : f32
    %85 = vector.broadcast %cst_43 : f32 to vector<17x1xf32>
    %86 = arith.divf %84, %85 : vector<17x1xf32>
    %87 = vector.broadcast %79 : vector<17x1xf32> to vector<17x32xf32>
    %88 = arith.subf %71, %87 : vector<17x32xf32>
    %cst_44 = arith.constant 9.99999974E-6 : f32
    %89 = vector.broadcast %cst_44 : f32 to vector<17x1xf32>
    %90 = arith.addf %86, %89 : vector<17x1xf32>
    %91 = math.rsqrt %90 : vector<17x1xf32>
    %92 = vector.broadcast %91 : vector<17x1xf32> to vector<17x32xf32>
    %93 = arith.mulf %88, %92 : vector<17x32xf32>
    %94 = vector.shape_cast %73 : vector<32xf32> to vector<1x32xf32>
    %95 = vector.broadcast %94 : vector<1x32xf32> to vector<17x32xf32>
    %96 = arith.mulf %93, %95 : vector<17x32xf32>
    %97 = vector.shape_cast %75 : vector<32xf32> to vector<1x32xf32>
    %98 = vector.broadcast %97 : vector<1x32xf32> to vector<17x32xf32>
    %99 = arith.addf %96, %98 : vector<17x32xf32>
    %cst_45 = arith.constant 0.000000e+00 : f32
    %100 = vector.broadcast %cst_45 : f32 to vector<9x32xf32>
    %c0_46 = arith.constant 0 : index
    %c0_47 = arith.constant 0 : index
    %101 = tpu.strided_load %arg8[%c0_46, %c0_47] {strides = array<i32: 2, 1>} : memref<20x32xf32, #tpu.memory_space<vmem>>, vector<9x32xf32>
    %c1_48 = arith.constant 1 : index
    %c0_49 = arith.constant 0 : index
    %c0_50 = arith.constant 0 : index
    %102 = vector.load %arg3[%c1_48, %c0_49, %c0_50] : memref<3x3x32xf32, #tpu.memory_space<vmem>>, vector<1x1x32xf32>
    %103 = vector.shape_cast %102 : vector<1x1x32xf32> to vector<32xf32>
    %104 = vector.shape_cast %103 : vector<32xf32> to vector<1x32xf32>
    %105 = vector.broadcast %104 : vector<1x32xf32> to vector<9x32xf32>
    %106 = arith.mulf %101, %105 : vector<9x32xf32>
    %107 = arith.addf %100, %106 : vector<9x32xf32>
    %c1_51 = arith.constant 1 : index
    %c0_52 = arith.constant 0 : index
    %108 = tpu.strided_load %arg8[%c1_51, %c0_52] {strides = array<i32: 2, 1>} : memref<20x32xf32, #tpu.memory_space<vmem>>, vector<9x32xf32>
    %c1_53 = arith.constant 1 : index
    %c1_54 = arith.constant 1 : index
    %c0_55 = arith.constant 0 : index
    %109 = vector.load %arg3[%c1_53, %c1_54, %c0_55] : memref<3x3x32xf32, #tpu.memory_space<vmem>>, vector<1x1x32xf32>
    %110 = vector.shape_cast %109 : vector<1x1x32xf32> to vector<32xf32>
    %111 = vector.shape_cast %110 : vector<32xf32> to vector<1x32xf32>
    %112 = vector.broadcast %111 : vector<1x32xf32> to vector<9x32xf32>
    %113 = arith.mulf %108, %112 : vector<9x32xf32>
    %114 = arith.addf %107, %113 : vector<9x32xf32>
    %c2_56 = arith.constant 2 : index
    %c0_57 = arith.constant 0 : index
    %115 = tpu.strided_load %arg8[%c2_56, %c0_57] {strides = array<i32: 2, 1>} : memref<20x32xf32, #tpu.memory_space<vmem>>, vector<9x32xf32>
    %c1_58 = arith.constant 1 : index
    %c2_59 = arith.constant 2 : index
    %c0_60 = arith.constant 0 : index
    %116 = vector.load %arg3[%c1_58, %c2_59, %c0_60] : memref<3x3x32xf32, #tpu.memory_space<vmem>>, vector<1x1x32xf32>
    %117 = vector.shape_cast %116 : vector<1x1x32xf32> to vector<32xf32>
    %118 = vector.shape_cast %117 : vector<32xf32> to vector<1x32xf32>
    %119 = vector.broadcast %118 : vector<1x32xf32> to vector<9x32xf32>
    %120 = arith.mulf %115, %119 : vector<9x32xf32>
    %121 = arith.addf %114, %120 : vector<9x32xf32>
    %c4 = arith.constant 4 : index
    %c0_61 = arith.constant 0 : index
    %122 = vector.load %arg2[%c4, %c0_61] : memref<18x32xf32, #tpu.memory_space<vmem>>, vector<1x32xf32>
    %123 = vector.shape_cast %122 : vector<1x32xf32> to vector<32xf32>
    %124 = vector.shape_cast %123 : vector<32xf32> to vector<1x32xf32>
    %125 = vector.broadcast %124 : vector<1x32xf32> to vector<9x32xf32>
    %126 = arith.addf %121, %125 : vector<9x32xf32>
    %c1_62 = arith.constant 1 : index
    %c0_63 = arith.constant 0 : index
    %c0_64 = arith.constant 0 : index
    %127 = vector.load %arg4[%c1_62, %c0_63, %c0_64] : memref<5x32x32xbf16, #tpu.memory_space<vmem>>, vector<1x32x32xbf16>
    %128 = vector.shape_cast %127 : vector<1x32x32xbf16> to vector<32x32xbf16>
    %129 = arith.truncf %126 : vector<9x32xf32> to vector<9x32xbf16>
    %cst_65 = arith.constant dense<0.000000e+00> : vector<9x32xf32>
    %130 = tpu.matmul %129, %128, %cst_65 {dimension_numbers = #tpu.dot_dimension_numbers<[1], [0], [0], [1], [0, 0, 1, 1], [], []>} : vector<9x32xbf16>, vector<32x32xbf16>, vector<9x32xf32> -> vector<9x32xf32>
    %c5 = arith.constant 5 : index
    %c0_66 = arith.constant 0 : index
    %131 = vector.load %arg2[%c5, %c0_66] : memref<18x32xf32, #tpu.memory_space<vmem>>, vector<1x32xf32>
    %132 = vector.shape_cast %131 : vector<1x32xf32> to vector<32xf32>
    %133 = vector.shape_cast %132 : vector<32xf32> to vector<1x32xf32>
    %134 = vector.broadcast %133 : vector<1x32xf32> to vector<9x32xf32>
    %135 = arith.addf %130, %134 : vector<9x32xf32>
    %c10 = arith.constant 10 : index
    %c0_67 = arith.constant 0 : index
    %136 = vector.load %arg2[%c10, %c0_67] : memref<18x32xf32, #tpu.memory_space<vmem>>, vector<1x32xf32>
    %137 = vector.shape_cast %136 : vector<1x32xf32> to vector<32xf32>
    %c11 = arith.constant 11 : index
    %c0_68 = arith.constant 0 : index
    %138 = vector.load %arg2[%c11, %c0_68] : memref<18x32xf32, #tpu.memory_space<vmem>>, vector<1x32xf32>
    %139 = vector.shape_cast %138 : vector<1x32xf32> to vector<32xf32>
    %cst_69 = arith.constant dense<0.000000e+00> : vector<9xf32>
    %140 = vector.multi_reduction <add>, %135, %cst_69 [1] : vector<9x32xf32> to vector<9xf32>
    %141 = vector.shape_cast %140 : vector<9xf32> to vector<9x1xf32>
    %cst_70 = arith.constant 3.200000e+01 : f32
    %142 = vector.broadcast %cst_70 : f32 to vector<9x1xf32>
    %143 = arith.divf %141, %142 : vector<9x1xf32>
    %144 = vector.broadcast %143 : vector<9x1xf32> to vector<9x32xf32>
    %145 = arith.subf %135, %144 : vector<9x32xf32>
    %146 = arith.mulf %145, %145 : vector<9x32xf32>
    %cst_71 = arith.constant dense<0.000000e+00> : vector<9xf32>
    %147 = vector.multi_reduction <add>, %146, %cst_71 [1] : vector<9x32xf32> to vector<9xf32>
    %148 = vector.shape_cast %147 : vector<9xf32> to vector<9x1xf32>
    %cst_72 = arith.constant 3.200000e+01 : f32
    %149 = vector.broadcast %cst_72 : f32 to vector<9x1xf32>
    %150 = arith.divf %148, %149 : vector<9x1xf32>
    %151 = vector.broadcast %143 : vector<9x1xf32> to vector<9x32xf32>
    %152 = arith.subf %135, %151 : vector<9x32xf32>
    %cst_73 = arith.constant 9.99999974E-6 : f32
    %153 = vector.broadcast %cst_73 : f32 to vector<9x1xf32>
    %154 = arith.addf %150, %153 : vector<9x1xf32>
    %155 = math.rsqrt %154 : vector<9x1xf32>
    %156 = vector.broadcast %155 : vector<9x1xf32> to vector<9x32xf32>
    %157 = arith.mulf %152, %156 : vector<9x32xf32>
    %158 = vector.shape_cast %137 : vector<32xf32> to vector<1x32xf32>
    %159 = vector.broadcast %158 : vector<1x32xf32> to vector<9x32xf32>
    %160 = arith.mulf %157, %159 : vector<9x32xf32>
    %161 = vector.shape_cast %139 : vector<32xf32> to vector<1x32xf32>
    %162 = vector.broadcast %161 : vector<1x32xf32> to vector<9x32xf32>
    %163 = arith.addf %160, %162 : vector<9x32xf32>
    %cst_74 = arith.constant 0.000000e+00 : f32
    %164 = vector.broadcast %cst_74 : f32 to vector<9x32xf32>
    %c0_75 = arith.constant 0 : index
    %c0_76 = arith.constant 0 : index
    %165 = tpu.strided_load %arg8[%c0_75, %c0_76] {strides = array<i32: 2, 1>} : memref<20x32xf32, #tpu.memory_space<vmem>>, vector<9x32xf32>
    %c2_77 = arith.constant 2 : index
    %c0_78 = arith.constant 0 : index
    %c0_79 = arith.constant 0 : index
    %166 = vector.load %arg3[%c2_77, %c0_78, %c0_79] : memref<3x3x32xf32, #tpu.memory_space<vmem>>, vector<1x1x32xf32>
    %167 = vector.shape_cast %166 : vector<1x1x32xf32> to vector<32xf32>
    %168 = vector.shape_cast %167 : vector<32xf32> to vector<1x32xf32>
    %169 = vector.broadcast %168 : vector<1x32xf32> to vector<9x32xf32>
    %170 = arith.mulf %165, %169 : vector<9x32xf32>
    %171 = arith.addf %164, %170 : vector<9x32xf32>
    %c1_80 = arith.constant 1 : index
    %c0_81 = arith.constant 0 : index
    %172 = tpu.strided_load %arg8[%c1_80, %c0_81] {strides = array<i32: 2, 1>} : memref<20x32xf32, #tpu.memory_space<vmem>>, vector<9x32xf32>
    %c2_82 = arith.constant 2 : index
    %c1_83 = arith.constant 1 : index
    %c0_84 = arith.constant 0 : index
    %173 = vector.load %arg3[%c2_82, %c1_83, %c0_84] : memref<3x3x32xf32, #tpu.memory_space<vmem>>, vector<1x1x32xf32>
    %174 = vector.shape_cast %173 : vector<1x1x32xf32> to vector<32xf32>
    %175 = vector.shape_cast %174 : vector<32xf32> to vector<1x32xf32>
    %176 = vector.broadcast %175 : vector<1x32xf32> to vector<9x32xf32>
    %177 = arith.mulf %172, %176 : vector<9x32xf32>
    %178 = arith.addf %171, %177 : vector<9x32xf32>
    %c2_85 = arith.constant 2 : index
    %c0_86 = arith.constant 0 : index
    %179 = tpu.strided_load %arg8[%c2_85, %c0_86] {strides = array<i32: 2, 1>} : memref<20x32xf32, #tpu.memory_space<vmem>>, vector<9x32xf32>
    %c2_87 = arith.constant 2 : index
    %c2_88 = arith.constant 2 : index
    %c0_89 = arith.constant 0 : index
    %180 = vector.load %arg3[%c2_87, %c2_88, %c0_89] : memref<3x3x32xf32, #tpu.memory_space<vmem>>, vector<1x1x32xf32>
    %181 = vector.shape_cast %180 : vector<1x1x32xf32> to vector<32xf32>
    %182 = vector.shape_cast %181 : vector<32xf32> to vector<1x32xf32>
    %183 = vector.broadcast %182 : vector<1x32xf32> to vector<9x32xf32>
    %184 = arith.mulf %179, %183 : vector<9x32xf32>
    %185 = arith.addf %178, %184 : vector<9x32xf32>
    %c6 = arith.constant 6 : index
    %c0_90 = arith.constant 0 : index
    %186 = vector.load %arg2[%c6, %c0_90] : memref<18x32xf32, #tpu.memory_space<vmem>>, vector<1x32xf32>
    %187 = vector.shape_cast %186 : vector<1x32xf32> to vector<32xf32>
    %188 = vector.shape_cast %187 : vector<32xf32> to vector<1x32xf32>
    %189 = vector.broadcast %188 : vector<1x32xf32> to vector<9x32xf32>
    %190 = arith.addf %185, %189 : vector<9x32xf32>
    %c2_91 = arith.constant 2 : index
    %c0_92 = arith.constant 0 : index
    %c0_93 = arith.constant 0 : index
    %191 = vector.load %arg4[%c2_91, %c0_92, %c0_93] : memref<5x32x32xbf16, #tpu.memory_space<vmem>>, vector<1x32x32xbf16>
    %192 = vector.shape_cast %191 : vector<1x32x32xbf16> to vector<32x32xbf16>
    %193 = arith.truncf %190 : vector<9x32xf32> to vector<9x32xbf16>
    %cst_94 = arith.constant dense<0.000000e+00> : vector<9x32xf32>
    %194 = tpu.matmul %193, %192, %cst_94 {dimension_numbers = #tpu.dot_dimension_numbers<[1], [0], [0], [1], [0, 0, 1, 1], [], []>} : vector<9x32xbf16>, vector<32x32xbf16>, vector<9x32xf32> -> vector<9x32xf32>
    %c7 = arith.constant 7 : index
    %c0_95 = arith.constant 0 : index
    %195 = vector.load %arg2[%c7, %c0_95] : memref<18x32xf32, #tpu.memory_space<vmem>>, vector<1x32xf32>
    %196 = vector.shape_cast %195 : vector<1x32xf32> to vector<32xf32>
    %197 = vector.shape_cast %196 : vector<32xf32> to vector<1x32xf32>
    %198 = vector.broadcast %197 : vector<1x32xf32> to vector<9x32xf32>
    %199 = arith.addf %194, %198 : vector<9x32xf32>
    %c12 = arith.constant 12 : index
    %c0_96 = arith.constant 0 : index
    %200 = vector.load %arg2[%c12, %c0_96] : memref<18x32xf32, #tpu.memory_space<vmem>>, vector<1x32xf32>
    %201 = vector.shape_cast %200 : vector<1x32xf32> to vector<32xf32>
    %c13 = arith.constant 13 : index
    %c0_97 = arith.constant 0 : index
    %202 = vector.load %arg2[%c13, %c0_97] : memref<18x32xf32, #tpu.memory_space<vmem>>, vector<1x32xf32>
    %203 = vector.shape_cast %202 : vector<1x32xf32> to vector<32xf32>
    %cst_98 = arith.constant dense<0.000000e+00> : vector<9xf32>
    %204 = vector.multi_reduction <add>, %199, %cst_98 [1] : vector<9x32xf32> to vector<9xf32>
    %205 = vector.shape_cast %204 : vector<9xf32> to vector<9x1xf32>
    %cst_99 = arith.constant 3.200000e+01 : f32
    %206 = vector.broadcast %cst_99 : f32 to vector<9x1xf32>
    %207 = arith.divf %205, %206 : vector<9x1xf32>
    %208 = vector.broadcast %207 : vector<9x1xf32> to vector<9x32xf32>
    %209 = arith.subf %199, %208 : vector<9x32xf32>
    %210 = arith.mulf %209, %209 : vector<9x32xf32>
    %cst_100 = arith.constant dense<0.000000e+00> : vector<9xf32>
    %211 = vector.multi_reduction <add>, %210, %cst_100 [1] : vector<9x32xf32> to vector<9xf32>
    %212 = vector.shape_cast %211 : vector<9xf32> to vector<9x1xf32>
    %cst_101 = arith.constant 3.200000e+01 : f32
    %213 = vector.broadcast %cst_101 : f32 to vector<9x1xf32>
    %214 = arith.divf %212, %213 : vector<9x1xf32>
    %215 = vector.broadcast %207 : vector<9x1xf32> to vector<9x32xf32>
    %216 = arith.subf %199, %215 : vector<9x32xf32>
    %cst_102 = arith.constant 9.99999974E-6 : f32
    %217 = vector.broadcast %cst_102 : f32 to vector<9x1xf32>
    %218 = arith.addf %214, %217 : vector<9x1xf32>
    %219 = math.rsqrt %218 : vector<9x1xf32>
    %220 = vector.broadcast %219 : vector<9x1xf32> to vector<9x32xf32>
    %221 = arith.mulf %216, %220 : vector<9x32xf32>
    %222 = vector.shape_cast %201 : vector<32xf32> to vector<1x32xf32>
    %223 = vector.broadcast %222 : vector<1x32xf32> to vector<9x32xf32>
    %224 = arith.mulf %221, %223 : vector<9x32xf32>
    %225 = vector.shape_cast %203 : vector<32xf32> to vector<1x32xf32>
    %226 = vector.broadcast %225 : vector<1x32xf32> to vector<9x32xf32>
    %227 = arith.addf %224, %226 : vector<9x32xf32>
    %228 = tpu.iota {dimensions = array<i32: 0>} : vector<17x1xi32>
    %c0_i32 = arith.constant 0 : i32
    %229 = vector.broadcast %c0_i32 : i32 to vector<17x1xi32>
    %230 = arith.cmpi eq, %228, %229 : vector<17x1xi32>
    %231 = vector.shape_cast %230 : vector<17x1xi1> to vector<17x1xi1>
    %232 = vector.broadcast %231 : vector<17x1xi1> to vector<17x32xi1>
    %233 = vector.shape_cast %30 : vector<1x32xf32> to vector<1x32xf32>
    %234 = vector.broadcast %233 : vector<1x32xf32> to vector<17x32xf32>
    %235 = arith.select %232, %234, %99 : vector<17x32xi1>, vector<17x32xf32>
    %cst_103 = arith.constant 0.353553385 : f32
    %236 = vector.broadcast %cst_103 : f32 to vector<17x32xf32>
    %237 = arith.mulf %235, %236 : vector<17x32xf32>
    %238 = arith.truncf %237 : vector<17x32xf32> to vector<17x32xbf16>
    %c0_104 = arith.constant 0 : index
    %c0_105 = arith.constant 0 : index
    %c0_106 = arith.constant 0 : index
    %239 = vector.load %arg10[%c0_104, %c0_105, %c0_106] : memref<4x17x32xbf16, #tpu.memory_space<vmem>>, vector<1x17x32xbf16>
    %240 = vector.shape_cast %239 : vector<1x17x32xbf16> to vector<17x32xbf16>
    %241 = vector.shape_cast %238 : vector<17x32xbf16> to vector<1x17x32xbf16>
    tpu.vector_store %arg10[%c0_104, %c0_105, %c0_106], %241 {strides = array<i32>} : memref<4x17x32xbf16, #tpu.memory_space<vmem>>, vector<1x17x32xbf16>,
    %242 = tpu.iota {dimensions = array<i32: 0>} : vector<9x1xi32>
    %c0_i32_107 = arith.constant 0 : i32
    %243 = vector.broadcast %c0_i32_107 : i32 to vector<9x1xi32>
    %244 = arith.cmpi eq, %242, %243 : vector<9x1xi32>
    %245 = vector.shape_cast %244 : vector<9x1xi1> to vector<9x1xi1>
    %246 = vector.broadcast %245 : vector<9x1xi1> to vector<9x32xi1>
    %247 = vector.shape_cast %30 : vector<1x32xf32> to vector<1x32xf32>
    %248 = vector.broadcast %247 : vector<1x32xf32> to vector<9x32xf32>
    %249 = arith.select %246, %248, %163 : vector<9x32xi1>, vector<9x32xf32>
    %250 = arith.truncf %249 : vector<9x32xf32> to vector<9x32xbf16>
    %c1_108 = arith.constant 1 : index
    %c0_109 = arith.constant 0 : index
    %c0_110 = arith.constant 0 : index
    %251 = vector.load %arg10[%c1_108, %c0_109, %c0_110] : memref<4x17x32xbf16, #tpu.memory_space<vmem>>, vector<1x9x32xbf16>
    %252 = vector.shape_cast %251 : vector<1x9x32xbf16> to vector<9x32xbf16>
    %253 = vector.shape_cast %250 : vector<9x32xbf16> to vector<1x9x32xbf16>
    tpu.vector_store %arg10[%c1_108, %c0_109, %c0_110], %253 {strides = array<i32>} : memref<4x17x32xbf16, #tpu.memory_space<vmem>>, vector<1x9x32xbf16>,
    %254 = tpu.iota {dimensions = array<i32: 0>} : vector<9x1xi32>
    %c0_i32_111 = arith.constant 0 : i32
    %255 = vector.broadcast %c0_i32_111 : i32 to vector<9x1xi32>
    %256 = arith.cmpi eq, %254, %255 : vector<9x1xi32>
    %257 = vector.shape_cast %256 : vector<9x1xi1> to vector<9x1xi1>
    %258 = vector.broadcast %257 : vector<9x1xi1> to vector<9x32xi1>
    %259 = vector.shape_cast %30 : vector<1x32xf32> to vector<1x32xf32>
    %260 = vector.broadcast %259 : vector<1x32xf32> to vector<9x32xf32>
    %261 = arith.select %258, %260, %227 : vector<9x32xi1>, vector<9x32xf32>
    %262 = arith.truncf %261 : vector<9x32xf32> to vector<9x32xbf16>
    %c2_112 = arith.constant 2 : index
    %c0_113 = arith.constant 0 : index
    %c0_114 = arith.constant 0 : index
    %263 = vector.load %arg10[%c2_112, %c0_113, %c0_114] : memref<4x17x32xbf16, #tpu.memory_space<vmem>>, vector<1x9x32xbf16>
    %264 = vector.shape_cast %263 : vector<1x9x32xbf16> to vector<9x32xbf16>
    %265 = vector.shape_cast %262 : vector<9x32xbf16> to vector<1x9x32xbf16>
    tpu.vector_store %arg10[%c2_112, %c0_113, %c0_114], %265 {strides = array<i32>} : memref<4x17x32xbf16, #tpu.memory_space<vmem>>, vector<1x9x32xbf16>,
    %c0_115 = arith.constant 0 : index
    %c0_116 = arith.constant 0 : index
    %c0_117 = arith.constant 0 : index
    %266 = vector.load %arg10[%c0_115, %c0_116, %c0_117] : memref<4x17x32xbf16, #tpu.memory_space<vmem>>, vector<1x17x8xbf16>
    %267 = vector.shape_cast %266 : vector<1x17x8xbf16> to vector<17x8xbf16>
    %c1_118 = arith.constant 1 : index
    %c0_119 = arith.constant 0 : index
    %c0_120 = arith.constant 0 : index
    %268 = vector.load %arg10[%c1_118, %c0_119, %c0_120] : memref<4x17x32xbf16, #tpu.memory_space<vmem>>, vector<1x9x8xbf16>
    %269 = vector.shape_cast %268 : vector<1x9x8xbf16> to vector<9x8xbf16>
    %c2_121 = arith.constant 2 : index
    %c0_122 = arith.constant 0 : index
    %c0_123 = arith.constant 0 : index
    %270 = vector.load %arg10[%c2_121, %c0_122, %c0_123] : memref<4x17x32xbf16, #tpu.memory_space<vmem>>, vector<1x9x8xbf16>
    %271 = vector.shape_cast %270 : vector<1x9x8xbf16> to vector<9x8xbf16>
    %cst_124 = arith.constant dense<0.000000e+00> : vector<17x9xf32>
    %272 = tpu.matmul %267, %269, %cst_124 {dimension_numbers = #tpu.dot_dimension_numbers<[1], [1], [0], [0], [0, 0, 1, 0], [], []>} : vector<17x8xbf16>, vector<9x8xbf16>, vector<17x9xf32> -> vector<17x9xf32>
    %cst_125 = arith.constant dense<0xFF800000> : vector<17xf32>
    %273 = vector.multi_reduction <maximumf>, %272, %cst_125 [1] : vector<17x9xf32> to vector<17xf32>
    %274 = vector.shape_cast %273 : vector<17xf32> to vector<17x1xf32>
    %275 = vector.broadcast %274 : vector<17x1xf32> to vector<17x9xf32>
    %276 = arith.subf %272, %275 : vector<17x9xf32>
    %277 = math.exp %276 : vector<17x9xf32>
    %cst_126 = arith.constant dense<0.000000e+00> : vector<17xf32>
    %278 = vector.multi_reduction <add>, %277, %cst_126 [1] : vector<17x9xf32> to vector<17xf32>
    %279 = vector.shape_cast %278 : vector<17xf32> to vector<17x1xf32>
    %280 = tpu.reciprocal %279 {approx = true} : vector<17x1xf32> -> vector<17x1xf32>
    %281 = arith.truncf %277 : vector<17x9xf32> to vector<17x9xbf16>
    %cst_127 = arith.constant dense<0.000000e+00> : vector<17x8xf32>
    %282 = tpu.matmul %281, %271, %cst_127 {dimension_numbers = #tpu.dot_dimension_numbers<[1], [0], [0], [1], [0, 0, 1, 1], [], []>} : vector<17x9xbf16>, vector<9x8xbf16>, vector<17x8xf32> -> vector<17x8xf32>
    %283 = vector.broadcast %280 : vector<17x1xf32> to vector<17x8xf32>
    %284 = arith.mulf %282, %283 : vector<17x8xf32>
    %285 = arith.truncf %284 : vector<17x8xf32> to vector<17x8xbf16>
    %c3_128 = arith.constant 3 : index
    %c0_129 = arith.constant 0 : index
    %c0_130 = arith.constant 0 : index
    %286 = vector.load %arg10[%c3_128, %c0_129, %c0_130] : memref<4x17x32xbf16, #tpu.memory_space<vmem>>, vector<1x17x8xbf16>
    %287 = vector.shape_cast %286 : vector<1x17x8xbf16> to vector<17x8xbf16>
    %288 = vector.shape_cast %285 : vector<17x8xbf16> to vector<1x17x8xbf16>
    tpu.vector_store %arg10[%c3_128, %c0_129, %c0_130], %288 {strides = array<i32>} : memref<4x17x32xbf16, #tpu.memory_space<vmem>>, vector<1x17x8xbf16>,
    %c0_131 = arith.constant 0 : index
    %c0_132 = arith.constant 0 : index
    %c8_133 = arith.constant 8 : index
    %289 = vector.load %arg10[%c0_131, %c0_132, %c8_133] : memref<4x17x32xbf16, #tpu.memory_space<vmem>>, vector<1x17x8xbf16>
    %290 = vector.shape_cast %289 : vector<1x17x8xbf16> to vector<17x8xbf16>
    %c1_134 = arith.constant 1 : index
    %c0_135 = arith.constant 0 : index
    %c8_136 = arith.constant 8 : index
    %291 = vector.load %arg10[%c1_134, %c0_135, %c8_136] : memref<4x17x32xbf16, #tpu.memory_space<vmem>>, vector<1x9x8xbf16>
    %292 = vector.shape_cast %291 : vector<1x9x8xbf16> to vector<9x8xbf16>
    %c2_137 = arith.constant 2 : index
    %c0_138 = arith.constant 0 : index
    %c8_139 = arith.constant 8 : index
    %293 = vector.load %arg10[%c2_137, %c0_138, %c8_139] : memref<4x17x32xbf16, #tpu.memory_space<vmem>>, vector<1x9x8xbf16>
    %294 = vector.shape_cast %293 : vector<1x9x8xbf16> to vector<9x8xbf16>
    %cst_140 = arith.constant dense<0.000000e+00> : vector<17x9xf32>
    %295 = tpu.matmul %290, %292, %cst_140 {dimension_numbers = #tpu.dot_dimension_numbers<[1], [1], [0], [0], [0, 0, 1, 0], [], []>} : vector<17x8xbf16>, vector<9x8xbf16>, vector<17x9xf32> -> vector<17x9xf32>
    %cst_141 = arith.constant dense<0xFF800000> : vector<17xf32>
    %296 = vector.multi_reduction <maximumf>, %295, %cst_141 [1] : vector<17x9xf32> to vector<17xf32>
    %297 = vector.shape_cast %296 : vector<17xf32> to vector<17x1xf32>
    %298 = vector.broadcast %297 : vector<17x1xf32> to vector<17x9xf32>
    %299 = arith.subf %295, %298 : vector<17x9xf32>
    %300 = math.exp %299 : vector<17x9xf32>
    %cst_142 = arith.constant dense<0.000000e+00> : vector<17xf32>
    %301 = vector.multi_reduction <add>, %300, %cst_142 [1] : vector<17x9xf32> to vector<17xf32>
    %302 = vector.shape_cast %301 : vector<17xf32> to vector<17x1xf32>
    %303 = tpu.reciprocal %302 {approx = true} : vector<17x1xf32> -> vector<17x1xf32>
    %304 = arith.truncf %300 : vector<17x9xf32> to vector<17x9xbf16>
    %cst_143 = arith.constant dense<0.000000e+00> : vector<17x8xf32>
    %305 = tpu.matmul %304, %294, %cst_143 {dimension_numbers = #tpu.dot_dimension_numbers<[1], [0], [0], [1], [0, 0, 1, 1], [], []>} : vector<17x9xbf16>, vector<9x8xbf16>, vector<17x8xf32> -> vector<17x8xf32>
    %306 = vector.broadcast %303 : vector<17x1xf32> to vector<17x8xf32>
    %307 = arith.mulf %305, %306 : vector<17x8xf32>
    %308 = arith.truncf %307 : vector<17x8xf32> to vector<17x8xbf16>
    %c3_144 = arith.constant 3 : index
    %c0_145 = arith.constant 0 : index
    %c8_146 = arith.constant 8 : index
    %309 = vector.load %arg10[%c3_144, %c0_145, %c8_146] : memref<4x17x32xbf16, #tpu.memory_space<vmem>>, vector<1x17x8xbf16>
    %310 = vector.shape_cast %309 : vector<1x17x8xbf16> to vector<17x8xbf16>
    %311 = vector.shape_cast %308 : vector<17x8xbf16> to vector<1x17x8xbf16>
    tpu.vector_store %arg10[%c3_144, %c0_145, %c8_146], %311 {strides = array<i32>} : memref<4x17x32xbf16, #tpu.memory_space<vmem>>, vector<1x17x8xbf16>,
    %c0_147 = arith.constant 0 : index
    %c0_148 = arith.constant 0 : index
    %c16 = arith.constant 16 : index
    %312 = vector.load %arg10[%c0_147, %c0_148, %c16] : memref<4x17x32xbf16, #tpu.memory_space<vmem>>, vector<1x17x8xbf16>
    %313 = vector.shape_cast %312 : vector<1x17x8xbf16> to vector<17x8xbf16>
    %c1_149 = arith.constant 1 : index
    %c0_150 = arith.constant 0 : index
    %c16_151 = arith.constant 16 : index
    %314 = vector.load %arg10[%c1_149, %c0_150, %c16_151] : memref<4x17x32xbf16, #tpu.memory_space<vmem>>, vector<1x9x8xbf16>
    %315 = vector.shape_cast %314 : vector<1x9x8xbf16> to vector<9x8xbf16>
    %c2_152 = arith.constant 2 : index
    %c0_153 = arith.constant 0 : index
    %c16_154 = arith.constant 16 : index
    %316 = vector.load %arg10[%c2_152, %c0_153, %c16_154] : memref<4x17x32xbf16, #tpu.memory_space<vmem>>, vector<1x9x8xbf16>
    %317 = vector.shape_cast %316 : vector<1x9x8xbf16> to vector<9x8xbf16>
    %cst_155 = arith.constant dense<0.000000e+00> : vector<17x9xf32>
    %318 = tpu.matmul %313, %315, %cst_155 {dimension_numbers = #tpu.dot_dimension_numbers<[1], [1], [0], [0], [0, 0, 1, 0], [], []>} : vector<17x8xbf16>, vector<9x8xbf16>, vector<17x9xf32> -> vector<17x9xf32>
    %cst_156 = arith.constant dense<0xFF800000> : vector<17xf32>
    %319 = vector.multi_reduction <maximumf>, %318, %cst_156 [1] : vector<17x9xf32> to vector<17xf32>
    %320 = vector.shape_cast %319 : vector<17xf32> to vector<17x1xf32>
    %321 = vector.broadcast %320 : vector<17x1xf32> to vector<17x9xf32>
    %322 = arith.subf %318, %321 : vector<17x9xf32>
    %323 = math.exp %322 : vector<17x9xf32>
    %cst_157 = arith.constant dense<0.000000e+00> : vector<17xf32>
    %324 = vector.multi_reduction <add>, %323, %cst_157 [1] : vector<17x9xf32> to vector<17xf32>
    %325 = vector.shape_cast %324 : vector<17xf32> to vector<17x1xf32>
    %326 = tpu.reciprocal %325 {approx = true} : vector<17x1xf32> -> vector<17x1xf32>
    %327 = arith.truncf %323 : vector<17x9xf32> to vector<17x9xbf16>
    %cst_158 = arith.constant dense<0.000000e+00> : vector<17x8xf32>
    %328 = tpu.matmul %327, %317, %cst_158 {dimension_numbers = #tpu.dot_dimension_numbers<[1], [0], [0], [1], [0, 0, 1, 1], [], []>} : vector<17x9xbf16>, vector<9x8xbf16>, vector<17x8xf32> -> vector<17x8xf32>
    %329 = vector.broadcast %326 : vector<17x1xf32> to vector<17x8xf32>
    %330 = arith.mulf %328, %329 : vector<17x8xf32>
    %331 = arith.truncf %330 : vector<17x8xf32> to vector<17x8xbf16>
    %c3_159 = arith.constant 3 : index
    %c0_160 = arith.constant 0 : index
    %c16_161 = arith.constant 16 : index
    %332 = vector.load %arg10[%c3_159, %c0_160, %c16_161] : memref<4x17x32xbf16, #tpu.memory_space<vmem>>, vector<1x17x8xbf16>
    %333 = vector.shape_cast %332 : vector<1x17x8xbf16> to vector<17x8xbf16>
    %334 = vector.shape_cast %331 : vector<17x8xbf16> to vector<1x17x8xbf16>
    tpu.vector_store %arg10[%c3_159, %c0_160, %c16_161], %334 {strides = array<i32>} : memref<4x17x32xbf16, #tpu.memory_space<vmem>>, vector<1x17x8xbf16>,
    %c0_162 = arith.constant 0 : index
    %c0_163 = arith.constant 0 : index
    %c24 = arith.constant 24 : index
    %335 = vector.load %arg10[%c0_162, %c0_163, %c24] : memref<4x17x32xbf16, #tpu.memory_space<vmem>>, vector<1x17x8xbf16>
    %336 = vector.shape_cast %335 : vector<1x17x8xbf16> to vector<17x8xbf16>
    %c1_164 = arith.constant 1 : index
    %c0_165 = arith.constant 0 : index
    %c24_166 = arith.constant 24 : index
    %337 = vector.load %arg10[%c1_164, %c0_165, %c24_166] : memref<4x17x32xbf16, #tpu.memory_space<vmem>>, vector<1x9x8xbf16>
    %338 = vector.shape_cast %337 : vector<1x9x8xbf16> to vector<9x8xbf16>
    %c2_167 = arith.constant 2 : index
    %c0_168 = arith.constant 0 : index
    %c24_169 = arith.constant 24 : index
    %339 = vector.load %arg10[%c2_167, %c0_168, %c24_169] : memref<4x17x32xbf16, #tpu.memory_space<vmem>>, vector<1x9x8xbf16>
    %340 = vector.shape_cast %339 : vector<1x9x8xbf16> to vector<9x8xbf16>
    %cst_170 = arith.constant dense<0.000000e+00> : vector<17x9xf32>
    %341 = tpu.matmul %336, %338, %cst_170 {dimension_numbers = #tpu.dot_dimension_numbers<[1], [1], [0], [0], [0, 0, 1, 0], [], []>} : vector<17x8xbf16>, vector<9x8xbf16>, vector<17x9xf32> -> vector<17x9xf32>
    %cst_171 = arith.constant dense<0xFF800000> : vector<17xf32>
    %342 = vector.multi_reduction <maximumf>, %341, %cst_171 [1] : vector<17x9xf32> to vector<17xf32>
    %343 = vector.shape_cast %342 : vector<17xf32> to vector<17x1xf32>
    %344 = vector.broadcast %343 : vector<17x1xf32> to vector<17x9xf32>
    %345 = arith.subf %341, %344 : vector<17x9xf32>
    %346 = math.exp %345 : vector<17x9xf32>
    %cst_172 = arith.constant dense<0.000000e+00> : vector<17xf32>
    %347 = vector.multi_reduction <add>, %346, %cst_172 [1] : vector<17x9xf32> to vector<17xf32>
    %348 = vector.shape_cast %347 : vector<17xf32> to vector<17x1xf32>
    %349 = tpu.reciprocal %348 {approx = true} : vector<17x1xf32> -> vector<17x1xf32>
    %350 = arith.truncf %346 : vector<17x9xf32> to vector<17x9xbf16>
    %cst_173 = arith.constant dense<0.000000e+00> : vector<17x8xf32>
    %351 = tpu.matmul %350, %340, %cst_173 {dimension_numbers = #tpu.dot_dimension_numbers<[1], [0], [0], [1], [0, 0, 1, 1], [], []>} : vector<17x9xbf16>, vector<9x8xbf16>, vector<17x8xf32> -> vector<17x8xf32>
    %352 = vector.broadcast %349 : vector<17x1xf32> to vector<17x8xf32>
    %353 = arith.mulf %351, %352 : vector<17x8xf32>
    %354 = arith.truncf %353 : vector<17x8xf32> to vector<17x8xbf16>
    %c3_174 = arith.constant 3 : index
    %c0_175 = arith.constant 0 : index
    %c24_176 = arith.constant 24 : index
    %355 = vector.load %arg10[%c3_174, %c0_175, %c24_176] : memref<4x17x32xbf16, #tpu.memory_space<vmem>>, vector<1x17x8xbf16>
    %356 = vector.shape_cast %355 : vector<1x17x8xbf16> to vector<17x8xbf16>
    %357 = vector.shape_cast %354 : vector<17x8xbf16> to vector<1x17x8xbf16>
    tpu.vector_store %arg10[%c3_174, %c0_175, %c24_176], %357 {strides = array<i32>} : memref<4x17x32xbf16, #tpu.memory_space<vmem>>, vector<1x17x8xbf16>,
    %c3_177 = arith.constant 3 : index
    %c0_178 = arith.constant 0 : index
    %c0_179 = arith.constant 0 : index
    %358 = vector.load %arg10[%c3_177, %c0_178, %c0_179] : memref<4x17x32xbf16, #tpu.memory_space<vmem>>, vector<1x17x32xbf16>
    %359 = vector.shape_cast %358 : vector<1x17x32xbf16> to vector<17x32xbf16>
    %c3_180 = arith.constant 3 : index
    %c0_181 = arith.constant 0 : index
    %c0_182 = arith.constant 0 : index
    %360 = vector.load %arg4[%c3_180, %c0_181, %c0_182] : memref<5x32x32xbf16, #tpu.memory_space<vmem>>, vector<1x32x32xbf16>
    %361 = vector.shape_cast %360 : vector<1x32x32xbf16> to vector<32x32xbf16>
    %cst_183 = arith.constant dense<0.000000e+00> : vector<17x32xf32>
    %362 = tpu.matmul %359, %361, %cst_183 {dimension_numbers = #tpu.dot_dimension_numbers<[1], [0], [0], [1], [0, 0, 1, 1], [], []>} : vector<17x32xbf16>, vector<32x32xbf16>, vector<17x32xf32> -> vector<17x32xf32>
    %363 = arith.addf %1, %362 : vector<17x32xf32>
    %c14 = arith.constant 14 : index
    %c0_184 = arith.constant 0 : index
    %364 = vector.load %arg2[%c14, %c0_184] : memref<18x32xf32, #tpu.memory_space<vmem>>, vector<1x32xf32>
    %365 = vector.shape_cast %364 : vector<1x32xf32> to vector<32xf32>
    %c15 = arith.constant 15 : index
    %c0_185 = arith.constant 0 : index
    %366 = vector.load %arg2[%c15, %c0_185] : memref<18x32xf32, #tpu.memory_space<vmem>>, vector<1x32xf32>
    %367 = vector.shape_cast %366 : vector<1x32xf32> to vector<32xf32>
    %cst_186 = arith.constant dense<0.000000e+00> : vector<17xf32>
    %368 = vector.multi_reduction <add>, %363, %cst_186 [1] : vector<17x32xf32> to vector<17xf32>
    %369 = vector.shape_cast %368 : vector<17xf32> to vector<17x1xf32>
    %cst_187 = arith.constant 3.200000e+01 : f32
    %370 = vector.broadcast %cst_187 : f32 to vector<17x1xf32>
    %371 = arith.divf %369, %370 : vector<17x1xf32>
    %372 = vector.broadcast %371 : vector<17x1xf32> to vector<17x32xf32>
    %373 = arith.subf %363, %372 : vector<17x32xf32>
    %374 = arith.mulf %373, %373 : vector<17x32xf32>
    %cst_188 = arith.constant dense<0.000000e+00> : vector<17xf32>
    %375 = vector.multi_reduction <add>, %374, %cst_188 [1] : vector<17x32xf32> to vector<17xf32>
    %376 = vector.shape_cast %375 : vector<17xf32> to vector<17x1xf32>
    %cst_189 = arith.constant 3.200000e+01 : f32
    %377 = vector.broadcast %cst_189 : f32 to vector<17x1xf32>
    %378 = arith.divf %376, %377 : vector<17x1xf32>
    %379 = vector.broadcast %371 : vector<17x1xf32> to vector<17x32xf32>
    %380 = arith.subf %363, %379 : vector<17x32xf32>
    %cst_190 = arith.constant 9.99999974E-6 : f32
    %381 = vector.broadcast %cst_190 : f32 to vector<17x1xf32>
    %382 = arith.addf %378, %381 : vector<17x1xf32>
    %383 = math.rsqrt %382 : vector<17x1xf32>
    %384 = vector.broadcast %383 : vector<17x1xf32> to vector<17x32xf32>
    %385 = arith.mulf %380, %384 : vector<17x32xf32>
    %386 = vector.shape_cast %365 : vector<32xf32> to vector<1x32xf32>
    %387 = vector.broadcast %386 : vector<1x32xf32> to vector<17x32xf32>
    %388 = arith.mulf %385, %387 : vector<17x32xf32>
    %389 = vector.shape_cast %367 : vector<32xf32> to vector<1x32xf32>
    %390 = vector.broadcast %389 : vector<1x32xf32> to vector<17x32xf32>
    %391 = arith.addf %388, %390 : vector<17x32xf32>
    %c4_191 = arith.constant 4 : index
    %c0_192 = arith.constant 0 : index
    %c0_193 = arith.constant 0 : index
    %392 = vector.load %arg4[%c4_191, %c0_192, %c0_193] : memref<5x32x32xbf16, #tpu.memory_space<vmem>>, vector<1x32x32xbf16>
    %393 = vector.shape_cast %392 : vector<1x32x32xbf16> to vector<32x32xbf16>
    %394 = arith.truncf %391 : vector<17x32xf32> to vector<17x32xbf16>
    %cst_194 = arith.constant dense<0.000000e+00> : vector<17x32xf32>
    %395 = tpu.matmul %394, %393, %cst_194 {dimension_numbers = #tpu.dot_dimension_numbers<[1], [0], [0], [1], [0, 0, 1, 1], [], []>} : vector<17x32xbf16>, vector<32x32xbf16>, vector<17x32xf32> -> vector<17x32xf32>
    %c16_195 = arith.constant 16 : index
    %c0_196 = arith.constant 0 : index
    %396 = vector.load %arg2[%c16_195, %c0_196] : memref<18x32xf32, #tpu.memory_space<vmem>>, vector<1x32xf32>
    %397 = vector.shape_cast %396 : vector<1x32xf32> to vector<32xf32>
    %398 = vector.shape_cast %397 : vector<32xf32> to vector<1x32xf32>
    %399 = vector.broadcast %398 : vector<1x32xf32> to vector<17x32xf32>
    %400 = arith.addf %395, %399 : vector<17x32xf32>
    %c1_197 = arith.constant 1 : index
    %c0_198 = arith.constant 0 : index
    %401 = vector.load %arg9[%c1_197, %c0_198] : memref<19x128xf32, #tpu.memory_space<vmem>>, vector<17x32xf32>
    tpu.vector_store %arg9[%c1_197, %c0_198], %400 {strides = array<i32>} : memref<19x128xf32, #tpu.memory_space<vmem>>, vector<17x32xf32>,
    %c1_199 = arith.constant 1 : index
    %c32 = arith.constant 32 : index
    %402 = vector.load %arg9[%c1_199, %c32] : memref<19x128xf32, #tpu.memory_space<vmem>>, vector<17x32xf32>
    tpu.vector_store %arg9[%c1_199, %c32], %400 {strides = array<i32>} : memref<19x128xf32, #tpu.memory_space<vmem>>, vector<17x32xf32>,
    %c1_200 = arith.constant 1 : index
    %c64 = arith.constant 64 : index
    %403 = vector.load %arg9[%c1_200, %c64] : memref<19x128xf32, #tpu.memory_space<vmem>>, vector<17x32xf32>
    tpu.vector_store %arg9[%c1_200, %c64], %400 {strides = array<i32>} : memref<19x128xf32, #tpu.memory_space<vmem>>, vector<17x32xf32>,
    %c1_201 = arith.constant 1 : index
    %c96 = arith.constant 96 : index
    %404 = vector.load %arg9[%c1_201, %c96] : memref<19x128xf32, #tpu.memory_space<vmem>>, vector<17x32xf32>
    tpu.vector_store %arg9[%c1_201, %c96], %400 {strides = array<i32>} : memref<19x128xf32, #tpu.memory_space<vmem>>, vector<17x32xf32>,
    %cst_202 = arith.constant 0.000000e+00 : f32
    %405 = vector.broadcast %cst_202 : f32 to vector<2x128xf32>
    %c0_203 = arith.constant 0 : index
    %c0_204 = arith.constant 0 : index
    %406 = vector.load %arg9[%c0_203, %c0_204] : memref<19x128xf32, #tpu.memory_space<vmem>>, vector<2x128xf32>
    tpu.vector_store %arg9[%c0_203, %c0_204], %405 {strides = array<i32>} : memref<19x128xf32, #tpu.memory_space<vmem>>, vector<2x128xf32>,
    %cst_205 = arith.constant 0.000000e+00 : f32
    %407 = vector.broadcast %cst_205 : f32 to vector<1x128xf32>
    %c18 = arith.constant 18 : index
    %c0_206 = arith.constant 0 : index
    %408 = vector.load %arg9[%c18, %c0_206] : memref<19x128xf32, #tpu.memory_space<vmem>>, vector<1x128xf32>
    tpu.vector_store %arg9[%c18, %c0_206], %407 {strides = array<i32>} : memref<19x128xf32, #tpu.memory_space<vmem>>, vector<1x128xf32>,
    %cst_207 = arith.constant 0.000000e+00 : f32
    %409 = vector.broadcast %cst_207 : f32 to vector<17x128xf32>
    %c0_208 = arith.constant 0 : index
    %c0_209 = arith.constant 0 : index
    %410 = vector.load %arg9[%c0_208, %c0_209] : memref<19x128xf32, #tpu.memory_space<vmem>>, vector<17x128xf32>
    %c0_210 = arith.constant 0 : index
    %c0_211 = arith.constant 0 : index
    %411 = vector.load %arg5[%c0_210, %c0_211] : memref<4x128xf32, #tpu.memory_space<vmem>>, vector<1x128xf32>
    %412 = vector.shape_cast %411 : vector<1x128xf32> to vector<128xf32>
    %413 = vector.shape_cast %412 : vector<128xf32> to vector<1x128xf32>
    %414 = vector.broadcast %413 : vector<1x128xf32> to vector<17x128xf32>
    %415 = arith.mulf %410, %414 : vector<17x128xf32>
    %416 = arith.addf %409, %415 : vector<17x128xf32>
    %c1_212 = arith.constant 1 : index
    %c0_213 = arith.constant 0 : index
    %417 = vector.load %arg9[%c1_212, %c0_213] : memref<19x128xf32, #tpu.memory_space<vmem>>, vector<17x128xf32>
    %c1_214 = arith.constant 1 : index
    %c0_215 = arith.constant 0 : index
    %418 = vector.load %arg5[%c1_214, %c0_215] : memref<4x128xf32, #tpu.memory_space<vmem>>, vector<1x128xf32>
    %419 = vector.shape_cast %418 : vector<1x128xf32> to vector<128xf32>
    %420 = vector.shape_cast %419 : vector<128xf32> to vector<1x128xf32>
    %421 = vector.broadcast %420 : vector<1x128xf32> to vector<17x128xf32>
    %422 = arith.mulf %417, %421 : vector<17x128xf32>
    %423 = arith.addf %416, %422 : vector<17x128xf32>
    %c2_216 = arith.constant 2 : index
    %c0_217 = arith.constant 0 : index
    %424 = vector.load %arg9[%c2_216, %c0_217] : memref<19x128xf32, #tpu.memory_space<vmem>>, vector<17x128xf32>
    %c2_218 = arith.constant 2 : index
    %c0_219 = arith.constant 0 : index
    %425 = vector.load %arg5[%c2_218, %c0_219] : memref<4x128xf32, #tpu.memory_space<vmem>>, vector<1x128xf32>
    %426 = vector.shape_cast %425 : vector<1x128xf32> to vector<128xf32>
    %427 = vector.shape_cast %426 : vector<128xf32> to vector<1x128xf32>
    %428 = vector.broadcast %427 : vector<1x128xf32> to vector<17x128xf32>
    %429 = arith.mulf %424, %428 : vector<17x128xf32>
    %430 = arith.addf %423, %429 : vector<17x128xf32>
    %c3_220 = arith.constant 3 : index
    %c0_221 = arith.constant 0 : index
    %431 = vector.load %arg5[%c3_220, %c0_221] : memref<4x128xf32, #tpu.memory_space<vmem>>, vector<1x128xf32>
    %432 = vector.shape_cast %431 : vector<1x128xf32> to vector<128xf32>
    %433 = vector.shape_cast %432 : vector<128xf32> to vector<1x128xf32>
    %434 = vector.broadcast %433 : vector<1x128xf32> to vector<17x128xf32>
    %435 = arith.addf %430, %434 : vector<17x128xf32>
    %cst_222 = arith.constant 5.000000e-01 : f32
    %436 = vector.broadcast %cst_222 : f32 to vector<17x128xf32>
    %437 = arith.mulf %436, %435 : vector<17x128xf32>
    %cst_223 = arith.constant 4.471500e-02 : f32
    %438 = vector.broadcast %cst_223 : f32 to vector<17x128xf32>
    %439 = arith.mulf %438, %435 : vector<17x128xf32>
    %440 = arith.mulf %439, %435 : vector<17x128xf32>
    %441 = arith.mulf %440, %435 : vector<17x128xf32>
    %442 = arith.addf %435, %441 : vector<17x128xf32>
    %cst_224 = arith.constant 0.797884583 : f32
    %443 = vector.broadcast %cst_224 : f32 to vector<17x128xf32>
    %444 = arith.mulf %443, %442 : vector<17x128xf32>
    %445 = math.tanh %444 : vector<17x128xf32>
    %cst_225 = arith.constant 1.000000e+00 : f32
    %446 = vector.broadcast %cst_225 : f32 to vector<17x128xf32>
    %447 = arith.addf %446, %445 : vector<17x128xf32>
    %448 = arith.mulf %437, %447 : vector<17x128xf32>
    %c0_226 = arith.constant 0 : index
    %c0_227 = arith.constant 0 : index
    %449 = vector.load %arg6[%c0_226, %c0_227] : memref<128x32xbf16, #tpu.memory_space<vmem>>, vector<128x32xbf16>
    %450 = arith.truncf %448 : vector<17x128xf32> to vector<17x128xbf16>
    %cst_228 = arith.constant dense<0.000000e+00> : vector<17x32xf32>
    %451 = tpu.matmul %450, %449, %cst_228 {dimension_numbers = #tpu.dot_dimension_numbers<[1], [0], [0], [1], [0, 0, 1, 1], [], []>} : vector<17x128xbf16>, vector<128x32xbf16>, vector<17x32xf32> -> vector<17x32xf32>
    %c17 = arith.constant 17 : index
    %c0_229 = arith.constant 0 : index
    %452 = vector.load %arg2[%c17, %c0_229] : memref<18x32xf32, #tpu.memory_space<vmem>>, vector<1x32xf32>
    %453 = vector.shape_cast %452 : vector<1x32xf32> to vector<32xf32>
    %454 = vector.shape_cast %453 : vector<32xf32> to vector<1x32xf32>
    %455 = vector.broadcast %454 : vector<1x32xf32> to vector<17x32xf32>
    %456 = arith.addf %451, %455 : vector<17x32xf32>
    %457 = tpu.iota {dimensions = array<i32: 0>} : vector<17x1xi32>
    %c0_i32_230 = arith.constant 0 : i32
    %458 = vector.broadcast %c0_i32_230 : i32 to vector<17x1xi32>
    %459 = arith.cmpi eq, %457, %458 : vector<17x1xi32>
    %460 = vector.shape_cast %459 : vector<17x1xi1> to vector<17x1xi1>
    %461 = vector.broadcast %460 : vector<17x1xi1> to vector<17x32xi1>
    %462 = arith.select %461, %391, %456 : vector<17x32xi1>, vector<17x32xf32>
    %463 = arith.addf %363, %462 : vector<17x32xf32>
    %c0_231 = arith.constant 0 : index
    %c0_232 = arith.constant 0 : index
    %c0_233 = arith.constant 0 : index
    %464 = vector.load %arg7[%c0_231, %c0_232, %c0_233] : memref<1x17x32xf32, #tpu.memory_space<vmem>>, vector<1x17x32xf32>
    %465 = vector.shape_cast %464 : vector<1x17x32xf32> to vector<17x32xf32>
    %466 = vector.shape_cast %463 : vector<17x32xf32> to vector<1x17x32xf32>
    tpu.vector_store %arg7[%c0_231, %c0_232, %c0_233], %466 {strides = array<i32>} : memref<1x17x32xf32, #tpu.memory_space<vmem>>, vector<1x17x32xf32>,
    return
  }
  func.func @transform_0(%arg0: i32) -> (i32, i32, i32) {
    %c0_i32 = arith.constant 0 : i32
    %c0_i32_0 = arith.constant 0 : i32
    %c0_i32_1 = arith.constant 0 : i32
    return %arg0, %c0_i32, %c0_i32_0 : i32, i32, i32
  }
  func.func @transform_1(%arg0: i32) -> (i32, i32) {
    %c0_i32 = arith.constant 0 : i32
    %c0_i32_0 = arith.constant 0 : i32
    %c0_i32_1 = arith.constant 0 : i32
    return %c0_i32, %c0_i32_0 : i32, i32
  }
  func.func @transform_2(%arg0: i32) -> (i32, i32, i32) {
    %c0_i32 = arith.constant 0 : i32
    %c0_i32_0 = arith.constant 0 : i32
    %c0_i32_1 = arith.constant 0 : i32
    %c0_i32_2 = arith.constant 0 : i32
    return %c0_i32, %c0_i32_0, %c0_i32_1 : i32, i32, i32
  }
  func.func @transform_3(%arg0: i32) -> (i32, i32, i32) {
    %c0_i32 = arith.constant 0 : i32
    %c0_i32_0 = arith.constant 0 : i32
    %c0_i32_1 = arith.constant 0 : i32
    %c0_i32_2 = arith.constant 0 : i32
    return %c0_i32, %c0_i32_0, %c0_i32_1 : i32, i32, i32
  }
  func.func @transform_4(%arg0: i32) -> (i32, i32) {
    %c0_i32 = arith.constant 0 : i32
    %c0_i32_0 = arith.constant 0 : i32
    %c0_i32_1 = arith.constant 0 : i32
    return %c0_i32, %c0_i32_0 : i32, i32
  }
  func.func @transform_5(%arg0: i32) -> (i32, i32) {
    %c0_i32 = arith.constant 0 : i32
    %c0_i32_0 = arith.constant 0 : i32
    %c0_i32_1 = arith.constant 0 : i32
    return %c0_i32, %c0_i32_0 : i32, i32
  }
  func.func @transform_6(%arg0: i32) -> (i32, i32, i32) {
    %c0_i32 = arith.constant 0 : i32
    %c0_i32_0 = arith.constant 0 : i32
    %c0_i32_1 = arith.constant 0 : i32
    return %arg0, %c0_i32, %c0_i32_0 : i32, i32, i32
  }
}

</mosaic_0001>

<bundles_post_ra>
// kernel: run_kernel.3
= control target key start
LH: loop header
LB: loop body
LE: loop exit
PB: predicated region body
PF: predicated region fallthrough
CT: control target
= control target key end

     0   :  { %s2749_s21 = smov 0   ;;  %s3175_s0 = inlined_call_operand.vmem [shape: f32[2,17,32], index: 0, kind: input, shape index: {}]   ;;  %s3176_s1 = inlined_call_operand.vmem [shape: f32[18,32], index: 1, kind: input, shape index: {}]   ;;  %s3177_s2 = inlined_call_operand.vmem [shape: f32[3,3,32], index: 2, kind: input, shape index: {}]   ;;  %s3178_s3 = inlined_call_operand.vmem [shape: bf16[5,32,32], index: 3, kind: input, shape index: {}]   ;;  %s3179_s4 = inlined_call_operand.vmem [shape: f32[4,128], index: 4, kind: input, shape index: {}]   ;;  %s3180_s5 = inlined_call_operand.vmem [shape: bf16[128,32], index: 5, kind: input, shape index: {}]   ;;  %s3181_s6 = inlined_call_operand.vmem [shape: f32[2,17,32], index: 6, kind: output, shape index: {}]  }
   0x1 LB: > { %s2230_s22 = sadd.s32 4294967295, %s2700_s21   ;;  %p2234_p0 = scmp.ge.s32.totalorder %s2700_s21, 1  ;;  %s2700_s21 = sphi %s2749_s21, %s16_s21  }
   0x2   : > { %p212_p1 = scmp.lt.s32.totalorder %s2700_s21, 3 }
   0x4   : > { %p213_p2 = pnand %p2234_p0, %p212_p1 }
   0x5   : > { %p242_p3 = scmp.lt.s32.totalorder (!%p213_p2), %s2230_s22, 1  ;;  %s2704_s15 = smov (!%p213_p2), 120  }
   0x6   : > { %216 = sbr.rel (%p213_p2) target bundleno = 2903 (0xb57), region = 44  ;;  %s2705_s16 = smov (!%p213_p2), 112  }
   0x7   : > { %s2706_s17 = smov (!%p213_p2), 104   ;;  %s2708_s28 = smov (!%p213_p2), 8  }
   0x8   : > { %s2709_s29 = smov (!%p213_p2), 16   ;;  %s2710_s10 = smov (!%p213_p2), 24  }
   0x9   : > { %s2711_s20 = smov (!%p213_p2), 32   ;;  %s2712_s24 = smov (!%p213_p2), 96  }
   0xa   : > { %s2713_s25 = smov (!%p213_p2), 64  }
   0xb   : > { %s3185_s22 = smov (!%p242_p3, %s2230_s22), 1  ;;  %vm258_vm0 = vcmask 261120   ;;  %vm265_vm1 = vcmask 253952   ;;  %v2702_v6 = vmov 0.0   ;;  %v2575_v22 = vld [vmem:[%s3178_s3 + $0x8] sm:$0xff]   ;;  %v2576_v23 = vld [vmem:[%s3178_s3] sm:$0xff]  }
   0xc   : > { %s2554_s23 = smul.u32 24, %s3185_s22  ;;  %319 = vst.msk [vmem:[#allocation2 + $0x13] sm:$0x1] %vm265_vm1, %v2702_v6  ;;  %1969 = vst [vmem:[#allocation3 + $0x12] sm:$0x1] %v2702_v6  ;;  %2442 = vmatprep.subr.bf16.mxu0 %v2575_v22  ;;  %vm317_vm2 = vcmask 256000  }
   0xd   : > { %2443 = vmatpush3.bf16.msra.mxu0 %v2575_v22  ;;  %v2237_v34 = vld [vmem:[%s3176_s1] ss:$0 sm:$0xff]  ;;  %v2238_v36 = vld [vmem:[%s3176_s1 + $0x1] ss:$0 sm:$0xff]  ;;  %v2241_v53 = vld [vmem:[%s3177_s2 + $0x2] ss:$0 sm:$0xff] }
   0xe   : > { %s2765_s26 = scalar_lea.vmem %s3175_s0, %s2554_s23  ;;  %2444 = vmatprep.subr.bf16.mxu0 %v2576_v23  ;;  %v2239_v47 = vld [vmem:[%s3177_s2] ss:$0 sm:$0xff]  ;;  %v2240_v48 = vld [vmem:[%s3177_s2 + $0x1] ss:$0 sm:$0xff]  ;;  %v2251_v54 = vld [vmem:[%s3177_s2 + $0x4] ss:$0 sm:$0xff] }
   0xf   : > { %v253_v0 = vld [vmem:[%s2765_s26] sm:$0xff]  ;;  %v255_v1 = vld [vmem:[%s2765_s26 + $0x10] sm:$0x1]  ;;  %v254_v2 = vld [vmem:[%s2765_s26 + $0x8] sm:$0xff]  ;;  %vm2703_vm3 = vmmov 0   ;;  %vm833_vm5 = vcmask 257024  }
  0x10   : > { %v259_v3 = vsel %vm258_vm0, %v253_v0, 0.0  ;;  %v266_v4 = vsel %vm265_vm1, %v255_v1, 0.0  ;;  %v262_v5 = vsel %vm258_vm0, %v254_v2, 0.0  ;;  %v2253_v58 = vld [vmem:[%s3177_s2 + $0x5] ss:$0 sm:$0xff]  ;;  %vm892_vm8 = vcmask 64512  }
  0x11   : > { %260 = vadd.xlane.f32.xlu0 %v259_v3  ;;  %267 = vadd.xlane.f32.xlu1 %v266_v4  ;;  %vm837_vm6 = vsmask.f32 256  ;;  %vm950_vm9 = vcmask 72704   ;;  %vm957_vm10 = vcmask 65536   ;;  %vm995_vm11 = vcmask 1043456  }
  0x12   : > { %2445 = vmatpush3.bf16.msra.mxu0 %v2576_v23  ;;  %vm2906_vm7 = vmand %vm265_vm1, %vm837_vm6  ;;  %vm996_vm12 = vcmask 1044480   ;;  %vm1070_vm13 = vcmask 57344   ;;  %vm1067_vm15 = vcmask 60416  }
  0x13   : > { %2450 = vmatprep.subr.bf16.mxu0 %v2702_v6  ;;  %v350_v57 = vld [vmem:[#allocation2 + $0x13] sm:$0x1]  ;;  %vm1071_vm14 = vmand %vm1070_vm13, %vm837_vm6  ;;  %vm1952_vm13 = vcmask 778752  }
  0x15   : > { %263 = vadd.xlane.f32.xlu0 %v262_v5 }
  0x9a   : > { %v261_v7 = vpop.xlane.xlu0 %260  ;;  %v268_v8 = vpop.xlane.xlu1 %267 }
  0x9b   : > { %v270_v9 = vmul.f32 0.03125, %v261_v7  ;;  %v272_v10 = vmul.f32 0.03125, %v268_v8  ;;  %v358_v8 = vmul.f32 %v2241_v53, %v350_v57  ;;  %v2273_v57 = vld [vmem:[%s3176_s1 + $0x6] ss:$0 sm:$0xff] }
  0x9d   : > { %v273_v11 = vsub.f32 %v253_v0, %v270_v9  ;;  %v275_v12 = vsub.f32 %v255_v1, %v272_v10 }
  0x9e   : > { %v264_v13 = vpop.xlane.xlu0 %263 }
  0x9f   : > { %v271_v14 = vmul.f32 0.03125, %v264_v13  ;;  %v276_v15 = vmul.f32 %v273_v11, %v273_v11  ;;  %v278_v16 = vmul.f32 %v275_v12, %v275_v12 }
  0xa1   : > { %v274_v17 = vsub.f32 %v254_v2, %v271_v14  ;;  %v279_v18 = vsel %vm258_vm0, %v276_v15, 0.0  ;;  %v285_v19 = vsel %vm265_vm1, %v278_v16, 0.0 }
  0xa2   : > { %280 = vadd.xlane.f32.xlu1 %v279_v18 }
  0xa3   : > { %v277_v20 = vmul.f32 %v274_v17, %v274_v17 }
  0xa5   : > { %v282_v21 = vsel %vm258_vm0, %v277_v20, 0.0  ;;  %v2255_v20 = vld [vmem:[%s3177_s2 + $0x6] ss:$0 sm:$0xff] }
  0xa6   : > { %286 = vadd.xlane.f32.xlu1 %v285_v19  ;;  %283 = vadd.xlane.f32.xlu0 %v282_v21 }
 0x12b   : > { %v281_v24 = vpop.xlane.xlu1 %280 }
 0x12c   : > { %v288_v25 = vmul.f32 0.03125, %v281_v24 }
 0x12e   : > { %v291_v26 = vadd.f32 1e-05, %v288_v25 }
 0x12f   : > { %v287_v27 = vpop.xlane.xlu1 %286  ;;  %v284_v28 = vpop.xlane.xlu0 %283 }
 0x130   : > { %2611 = vrsqrt.f32 %v291_v26  ;;  %v290_v29 = vmul.f32 0.03125, %v287_v27  ;;  %v289_v30 = vmul.f32 0.03125, %v284_v28  ;;  %v2268_v27 = vld [vmem:[%s3177_s2 + $0x8] ss:$0 sm:$0xff]  ;;  %v2270_v28 = vld [vmem:[%s3177_s2 + $0x9] ss:$0 sm:$0xff] }
 0x132   : > { %v293_v31 = vadd.f32 1e-05, %v290_v29  ;;  %v292_v32 = vadd.f32 1e-05, %v289_v30 }
 0x134   : > { %2613 = vrsqrt.f32 %v293_v31 }
 0x135   : > { %2615 = vrsqrt.f32 %v292_v32 }
 0x13d   : > { %v2612_v33 = vpop.eup %2611 }
 0x13e   : > { %v297_v35 = vmul.f32 %v2612_v33, %v273_v11 }
 0x140   : > { %v304_v37 = vmul.f32 %v2237_v34, %v297_v35  ;;  %v2577_v35 = vld [vmem:[%s3178_s3 + $0x18] sm:$0xff]  }
 0x141   : > { %v2614_v38 = vpop.eup %2613 }
 0x142   : > { %v2616_v39 = vpop.eup %2615  ;;  %v2792_v40 = vadd.f32 %v2238_v36, %v304_v37  ;;  %v299_v41 = vmul.f32 %v2614_v38, %v275_v12 }
 0x143   : > { %v298_v42 = vmul.f32 %v2616_v39, %v274_v17  ;;  %v2242_v17 = vld [vmem:[%s3176_s1 + $0x2] ss:$0 sm:$0xff] }
 0x144   : > { %314 = vst.msk [vmem:[#allocation2 + $0x2] sm:$0xff] %vm258_vm0, %v2792_v40  ;;  %v306_v43 = vmul.f32 %v2237_v34, %v299_v41 }
 0x145   : > { %318 = vst.msk [vmem:[#allocation2] sm:$0x7] %vm317_vm2, %v2702_v6  ;;  %v305_v44 = vmul.f32 %v2237_v34, %v298_v42  ;;  %vm1279_vm2 = vcmask 122944  }
 0x146   : > { %v313_v45 = vadd.f32 %v2238_v36, %v306_v43 }
 0x147   : > { %v312_v46 = vadd.f32 %v2238_v36, %v305_v44  ;;  %v2256_v44 = vld [vmem:[%s3176_s1 + $0x4] ss:$0 sm:$0xff] }
 0x148   : > { %316 = vst.msk [vmem:[#allocation2 + $0x12] sm:$0x1] %vm265_vm1, %v313_v45  ;;  %v2578_v45 = vld [vmem:[%s3178_s3 + $0x10] sm:$0xff]  }
 0x149   : > { %315 = vst.msk [vmem:[#allocation2 + $0xa] sm:$0xff] %vm258_vm0, %v312_v46  ;;  %v2272_v46 = vld [vmem:[%s3177_s2 + $0xa] ss:$0 sm:$0xff] }
 0x14c   : > { %v320_v49 = vld [vmem:[#allocation2 + $0x1] sm:$0xff] }
 0x14d   : > { %v334_v50 = vld [vmem:[#allocation2 + $0x2] sm:$0xff]  ;;  %v328_v51 = vmul.f32 %v2239_v47, %v320_v49 }
 0x14e   : > { %v342_v52 = vmul.f32 %v2240_v48, %v334_v50 }
 0x14f   : > { %v336_v56 = vld [vmem:[#allocation2 + $0x12] sm:$0x1] }
 0x150   : > { %v345_v55 = vadd.f32 %v342_v52, %v328_v51  ;;  %v321_v59 = vld [vmem:[#allocation2 + $0x9] sm:$0xff]  ;;  %v344_v62 = vmul.f32 %v2240_v48, %v336_v56  ;;  %v322_v3 = vld [vmem:[#allocation2 + $0x11] sm:$0x1]  ;;  %v531_v23 = vld [vmem:[#allocation2 + $0x12] ss:$2 sm:$0x1] }
 0x151   : > { %v335_v60 = vld [vmem:[#allocation2 + $0xa] sm:$0xff]  ;;  %v329_v63 = vmul.f32 %v2239_v47, %v321_v59  ;;  %v330_v7 = vmul.f32 %v2239_v47, %v322_v3  ;;  %v538_v33 = vmul.f32 %v2255_v20, %v531_v23  ;;  %v680_v52 = vmul.f32 %v2272_v46, %v531_v23 }
 0x152   : > { %v348_v61 = vld [vmem:[#allocation2 + $0x3] sm:$0xff]  ;;  %v343_v0 = vmul.f32 %v2240_v48, %v335_v60  ;;  %v349_v1 = vld [vmem:[#allocation2 + $0xb] sm:$0xff] }
 0x153   : > { %v356_v2 = vmul.f32 %v2241_v53, %v348_v61  ;;  %v502_v4 = vld [vmem:[#allocation2] ss:$2 sm:$0xff]  ;;  %v357_v5 = vmul.f32 %v2241_v53, %v349_v1  ;;  %v504_v9 = vld [vmem:[#allocation2 + $0x10] ss:$2 sm:$0x1]  ;;  %v347_v18 = vadd.f32 %v344_v62, %v330_v7  ;;  %v2579_v53 = vld [vmem:[%s3178_s3 + $0x28] sm:$0xff]  }
 0x154   : > { %v511_v10 = vmul.f32 %v2251_v54, %v502_v4  ;;  %v516_v11 = vld [vmem:[#allocation2 + $0x1] ss:$2 sm:$0xff]  ;;  %v346_v12 = vadd.f32 %v343_v0, %v329_v63  ;;  %v512_v14 = vmul.f32 %v2251_v54, %v504_v9  ;;  %v518_v15 = vld [vmem:[#allocation2 + $0x11] ss:$2 sm:$0x1]  ;;  %v661_v36 = vmul.f32 %v2268_v27, %v502_v4 }
 0x155   : > { %v359_v13 = vadd.f32 %v356_v2, %v345_v55  ;;  %v524_v16 = vmul.f32 %v2253_v58, %v516_v11  ;;  %v525_v19 = vmul.f32 %v2253_v58, %v518_v15  ;;  %v529_v22 = vld [vmem:[#allocation2 + $0x2] ss:$2 sm:$0xff]  ;;  %v361_v24 = vadd.f32 %v358_v8, %v347_v18  ;;  %v2261_v2 = vld [vmem:[%s3176_s1 + $0x5] ss:$0 sm:$0xff] }
 0x156   : > { %v360_v21 = vadd.f32 %v357_v5, %v346_v12  ;;  %v537_v32 = vmul.f32 %v2255_v20, %v529_v22  ;;  %v662_v37 = vmul.f32 %v2268_v27, %v504_v9  ;;  %v670_v38 = vmul.f32 %v2270_v28, %v516_v11  ;;  %v2580_v58 = vld [vmem:[%s3178_s3 + $0x20] sm:$0xff]  }
 0x157   : > { %v526_v25 = vadd.f32 %v524_v16, %v511_v10  ;;  %v527_v26 = vadd.f32 %v525_v19, %v512_v14  ;;  %v367_v29 = vadd.f32 %v2242_v17, %v359_v13  ;;  %v369_v31 = vadd.f32 %v2242_v17, %v361_v24  ;;  %v2243_v5 = vld [vmem:[%s3176_s1 + $0x3] ss:$0 sm:$0xff] }
 0x158   : > { %v368_v30 = vadd.f32 %v2242_v17, %v360_v21  ;;  %v671_v43 = vmul.f32 %v2270_v28, %v518_v15  ;;  %v672_v49 = vadd.f32 %v670_v38, %v661_v36  ;;  %v679_v51 = vmul.f32 %v2272_v46, %v529_v22 }
 0x159   : > { %v375_v39 = vpack.c.bf16 %v369_v31, %v369_v31  ;;  %v539_v41 = vadd.f32 %v537_v32, %v526_v25  ;;  %v540_v42 = vadd.f32 %v538_v33, %v527_v26 }
 0x15a   : > { %v374_v34 = vpack.c.bf16 %v368_v30, %v367_v29  ;;  %v673_v50 = vadd.f32 %v671_v43, %v662_v37  ;;  %v681_v55 = vadd.f32 %v679_v51, %v672_v49 }
 0x15b   : > { %v546_v47 = vadd.f32 %v2256_v44, %v539_v41  ;;  %v547_v48 = vadd.f32 %v2256_v44, %v540_v42 }
 0x15c   : > { %2446 = vmatprep.mubr.msk.bf16.mxu0 %vm258_vm0, %v374_v34  ;;  %v682_v56 = vadd.f32 %v680_v52, %v673_v50  ;;  %v688_v59 = vadd.f32 %v2273_v57, %v681_v55 }
 0x15d   : > { %2447 = vmatmul.mubr.msk.bf16.vlgmr.msra.gmra.mxu0 %vm258_vm0, %v375_v39  ;;  %v553_v54 = vpack.c.bf16 %v547_v48, %v546_v47 }
 0x15e   : > { %2451 = vmatpush3.bf16.msra.mxu0 %v2577_v35  ;;  %2454 = vmatprep.mubr.msk.bf16.mxu0 %vm2703_vm3, %v2702_v6  ;;  %v689_v60 = vadd.f32 %v2273_v57, %v682_v56 }
 0x15f   : > { %2452 = vmatprep.subr.bf16.mxu0 %v2702_v6 }
 0x160   : > { %v695_v61 = vpack.c.bf16 %v689_v60, %v688_v59 }
 0x162   : > { %2453 = vmatpush3.bf16.msra.mxu0 %v2578_v45 }
 0x163   : > { %2458 = vmatprep.subr.bf16.mxu0 %v2702_v6 }
 0x165   : > { %2455 = vmatmul.mubr.msk.bf16.vlgmr.msra.gmra.mxu0 %vm258_vm0, %v553_v54 }
 0x166   : > { %2459 = vmatpush3.bf16.msra.mxu0 %v2579_v53  ;;  %2462 = vmatprep.mubr.msk.bf16.mxu0 %vm2703_vm3, %v2702_v6  ;;  %vm1280_vm3 = vmand %vm1279_vm2, %vm837_vm6  ;;  %vm1963_vm2 = vcmask 1048320  }
 0x167   : > { %2460 = vmatprep.subr.bf16.mxu0 %v2702_v6 }
 0x16a   : > { %2461 = vmatpush3.bf16.msra.mxu0 %v2580_v58 }
 0x16d   : > { %2463 = vmatmul.mubr.msk.bf16.vlgmr.msra.gmra.mxu0 %vm258_vm0, %v695_v61 }
 0x21d   : > { %v2448_v62 = vpop.f32.mrf.mxu0 }
 0x21e   : > { %v442_v13 = vadd.f32 %v2448_v62, %v2243_v5  ;;  %v797_v62 = vlaneseq }
 0x21f   : > { %v433_v63 = vpop.f32.mrf.mxu0 }
 0x220   : > { %v434_v8 = vadd.f32 %v2243_v5, %v433_v63  ;;  %v455_v20 = vsel %vm265_vm1, %v442_v13, 0.0 }
 0x221   : > { %v2449_v0 = vpop.f32.mrf.mxu0 }
 0x222   : > { %v449_v16 = vsel %vm258_vm0, %v434_v8, 0.0 }
 0x223   : > { %v436_v1 = vpop.f32.mrf.mxu0 }
 0x224   : > { %v437_v14 = vadd.f32 %v2243_v5, %v436_v1  ;;  %v2878_v1 = vshrl.u32 %v797_v62, 7 }
 0x225   : > { %v608_v3 = vpop.f32.mrf.mxu0 }
 0x226   : > { %v609_v4 = vadd.f32 %v2261_v2, %v608_v3  ;;  %v452_v19 = vsel %vm258_vm0, %v437_v14, 0.0  ;;  %v2265_v3 = vld [vmem:[%s3176_s1 + $0xa] ss:$0 sm:$0xff]  ;;  %vm801_vm4 = vcmp.eq.s32.totalorder %v2878_v1, 0 }
 0x227   : > { %v2456_v7 = vpop.f32.mrf.mxu0 }
 0x228   : > { %v617_v9 = vsel %vm258_vm0, %v609_v4, 0.0  ;;  %v2266_v7 = vld [vmem:[%s3176_s1 + $0xb] ss:$0 sm:$0xff] }
 0x229   : > { %618 = vadd.xlane.f32.xlu0 %v617_v9  ;;  %v611_v10 = vpop.f32.mrf.mxu0 }
 0x22a   : > { %v612_v11 = vadd.f32 %v2261_v2, %v611_v10  ;;  %v2248_v10 = vld [vmem:[%s3176_s1 + $0x8] ss:$0 sm:$0xff] }
 0x22b   : > { %v2457_v12 = vpop.f32.mrf.mxu0 }
 0x22c   : > { %v620_v15 = vsel %vm265_vm1, %v612_v11, 0.0 }
 0x22d   : > { %621 = vadd.xlane.f32.xlu1 %v620_v15  ;;  %v2867_v17 = vpop.f32.mrf.mxu0  ;;  %450 = vadd.xlane.f32.xlu0 %v449_v16  ;;  %v2249_v15 = vld [vmem:[%s3176_s1 + $0x9] ss:$0 sm:$0xff] }
 0x22f   : > { %v2464_v18 = vpop.f32.mrf.mxu0 }
 0x231   : > { %v2871_v21 = vpop.f32.mrf.mxu0  ;;  %453 = vadd.xlane.f32.xlu1 %v452_v19  ;;  %456 = vadd.xlane.f32.xlu0 %v455_v20 }
 0x233   : > { %v2465_v22 = vpop.f32.mrf.mxu0 }
 0x2b2   : > { %v619_v23 = vpop.xlane.xlu0 %618 }
 0x2b3   : > { %v623_v24 = vmul.f32 0.03125, %v619_v23 }
 0x2b5   : > { %v625_v25 = vsub.f32 %v609_v4, %v623_v24  ;;  %v812_v4 = vsub.s32 0, %v2878_v1 }
 0x2b6   : > { %v622_v26 = vpop.xlane.xlu1 %621  ;;  %v451_v27 = vpop.xlane.xlu0 %450 }
 0x2b7   : > { %v624_v28 = vmul.f32 0.03125, %v622_v26  ;;  %v458_v29 = vmul.f32 0.03125, %v451_v27  ;;  %v627_v30 = vmul.f32 %v625_v25, %v625_v25  ;;  %v2892_v12 = vrot.slane %v2792_v40, %v812_v4 }
 0x2b9   : > { %v626_v31 = vsub.f32 %v612_v11, %v624_v28  ;;  %v461_v32 = vsub.f32 %v434_v8, %v458_v29  ;;  %v629_v33 = vsel %vm258_vm0, %v627_v30, 0.0  ;;  %v854_v30 = vld [vmem:[#allocation4 + $0x10] sm:$0x1] }
 0x2ba   : > { %630 = vadd.xlane.f32.xlu1 %v629_v33  ;;  %v454_v34 = vpop.xlane.xlu1 %453  ;;  %v457_v35 = vpop.xlane.xlu0 %456 }
 0x2bb   : > { %v459_v36 = vmul.f32 0.03125, %v454_v34  ;;  %v460_v37 = vmul.f32 0.03125, %v457_v35  ;;  %v628_v38 = vmul.f32 %v626_v31, %v626_v31  ;;  %v464_v39 = vmul.f32 %v461_v32, %v461_v32 }
 0x2bd   : > { %v462_v41 = vsub.f32 %v437_v14, %v459_v36  ;;  %v463_v42 = vsub.f32 %v442_v13, %v460_v37  ;;  %v632_v43 = vsel %vm265_vm1, %v628_v38, 0.0  ;;  %v467_v44 = vsel %vm258_vm0, %v464_v39, 0.0 }
 0x2be   : > { %633 = vadd.xlane.f32.xlu0 %v632_v43  ;;  %468 = vadd.xlane.f32.xlu1 %v467_v44 }
 0x2bf   : > { %v465_v45 = vmul.f32 %v462_v41, %v462_v41  ;;  %v466_v46 = vmul.f32 %v463_v42, %v463_v42 }
 0x2c1   : > { %v470_v47 = vsel %vm258_vm0, %v465_v45, 0.0  ;;  %v473_v48 = vsel %vm265_vm1, %v466_v46, 0.0 }
 0x2c2   : > { %471 = vadd.xlane.f32.xlu0 %v470_v47  ;;  %474 = vadd.xlane.f32.xlu1 %v473_v48 }
 0x343   : > { %v631_v49 = vpop.xlane.xlu1 %630 }
 0x344   : > { %v635_v50 = vmul.f32 0.03125, %v631_v49 }
 0x346   : > { %v637_v51 = vadd.f32 1e-05, %v635_v50 }
 0x347   : > { %v469_v52 = vpop.xlane.xlu1 %468  ;;  %v634_v53 = vpop.xlane.xlu0 %633 }
 0x348   : > { %2617 = vrsqrt.f32 %v637_v51  ;;  %v476_v54 = vmul.f32 0.03125, %v469_v52  ;;  %v636_v55 = vmul.f32 0.03125, %v634_v53 }
 0x34a   : > { %v479_v56 = vadd.f32 1e-05, %v476_v54  ;;  %v638_v57 = vadd.f32 1e-05, %v636_v55 }
 0x34b   : > { %v475_v58 = vpop.xlane.xlu1 %474  ;;  %v472_v59 = vpop.xlane.xlu0 %471 }
 0x34c   : > { %2619 = vrsqrt.f32 %v479_v56  ;;  %v478_v60 = vmul.f32 0.03125, %v475_v58  ;;  %v477_v61 = vmul.f32 0.03125, %v472_v59  ;;  %v2278_v59 = vld [vmem:[%s3176_s1 + $0x7] ss:$0 sm:$0xff] }
 0x34d   : > { %2621 = vrsqrt.f32 %v638_v57  ;;  %v751_v62 = vadd.f32 %v2278_v59, %v2867_v17 }
 0x34e   : > { %v481_v63 = vadd.f32 1e-05, %v478_v60  ;;  %v480_v0 = vadd.f32 1e-05, %v477_v61  ;;  %v754_v60 = vadd.f32 %v2278_v59, %v2871_v21 }
 0x350   : > { %2623 = vrsqrt.f32 %v481_v63  ;;  %v762_v61 = vsel %vm265_vm1, %v754_v60, 0.0  ;;  %v759_v63 = vsel %vm258_vm0, %v751_v62, 0.0 }
 0x351   : > { %2625 = vrsqrt.f32 %v480_v0 }
 0x355   : > { %v2618_v2 = vpop.eup %2617 }
 0x356   : > { %v641_v5 = vmul.f32 %v2618_v2, %v625_v25 }
 0x358   : > { %v647_v8 = vmul.f32 %v2265_v3, %v641_v5 }
 0x359   : > { %v2620_v9 = vpop.eup %2619 }
 0x35a   : > { %v2622_v11 = vpop.eup %2621  ;;  %v653_v13 = vadd.f32 %v2266_v7, %v647_v8  ;;  %v485_v14 = vmul.f32 %v2620_v9, %v461_v32 }
 0x35b   : > { %v642_v16 = vmul.f32 %v2622_v11, %v626_v31 }
 0x35c   : > { %v842_v18 = vsel %vm801_vm4, %v2892_v12, %v653_v13  ;;  %v492_v19 = vmul.f32 %v2248_v10, %v485_v14 }
 0x35d   : > { %v2624_v20 = vpop.eup %2623  ;;  %v2374_v22 = vpack.c.bf16 %v842_v18, %v842_v18  ;;  %v648_v23 = vmul.f32 %v2265_v3, %v642_v16 }
 0x35e   : > { %v2626_v24 = vpop.eup %2625  ;;  %v499_v40 = vadd.f32 %v2249_v15, %v492_v19  ;;  %v487_v25 = vmul.f32 %v2624_v20, %v463_v42 }
 0x35f   : > { %853 = vst.msk [vmem:[#allocation4 + $0xc] sm:$0xf] %vm833_vm5, %v2374_v22  ;;  %v654_v26 = vadd.f32 %v2266_v7, %v648_v23  ;;  %v486_v27 = vmul.f32 %v2626_v24, %v462_v41  ;;  %v839_v41 = vld [vmem:[#allocation4 + $0x8] sm:$0x1] }
 0x360   : > { %v814_v28 = vsel %vm801_vm4, %v2892_v12, %v499_v40  ;;  %v494_v31 = vmul.f32 %v2248_v10, %v487_v25 }
 0x361   : > { %v817_v32 = vmul.f32 0.35355338, %v814_v28  ;;  %v2375_v33 = vpack.c.bf16 %v654_v26, %v654_v26  ;;  %v493_v34 = vmul.f32 %v2248_v10, %v486_v27 }
 0x362   : > { %v501_v35 = vadd.f32 %v2249_v15, %v494_v31 }
 0x363   : > { %v2371_v36 = vpack.c.bf16 %v817_v32, %v817_v32  ;;  %v855_v37 = vsel %vm2906_vm7, %v2375_v33, %v854_v30  ;;  %v500_v38 = vadd.f32 %v2249_v15, %v493_v34 }
 0x364   : > { %856 = vst [vmem:[#allocation4 + $0x10] sm:$0x1] %v855_v37  ;;  %v819_v39 = vmul.f32 0.35355338, %v501_v35 }
 0x365   : > { %834 = vst.msk [vmem:[#allocation4] sm:$0xf] %vm833_vm5, %v2371_v36  ;;  %v818_v42 = vmul.f32 0.35355338, %v500_v38 }
 0x366   : > { %v2373_v43 = vpack.c.bf16 %v819_v39, %v819_v39 }
 0x367   : > { %v2372_v44 = vpack.c.bf16 %v818_v42, %v818_v42 }
 0x368   : > { %v840_v45 = vsel %vm2906_vm7, %v2373_v43, %v839_v41 }
 0x369   : > { %841 = vst [vmem:[#allocation4 + $0x8] sm:$0x1] %v840_v45  ;;  %835 = vst.msk [vmem:[#allocation4 + $0x4] sm:$0xf] %vm833_vm5, %v2372_v44 }
 0x36b   : > { %v2581_v46 = vld [vmem:[#allocation4 + $0xc] sm:$0x1f]  }
 0x36c   : > { %v2582_v47 = vld [vmem:[#allocation4 + $0xc] sm:$0x1f]   ;;  %1099 = vrot.lane.b32.xlu0 %v2581_v46, %s2704_s15 }
 0x36d   : > { %2550 = vmatprep.subr.msk.bf16.mxu1 %vm892_vm8, %v2582_v47  ;;  %v900_v48 = vsel %vm892_vm8, %v2582_v47, 0  ;;  %v2587_v52 = vld [vmem:[#allocation4 + $0xc] sm:$0x1f]  }
 0x36e   : > { %2467 = vmatpush3.bf16.xpose.msra.mxu1 %v900_v48  ;;  %v2590_v56 = vld [vmem:[#allocation4 + $0xc] sm:$0x1f]  }
 0x370   : > { %v2583_v49 = vld [vmem:[#allocation4] sm:$0xff]   ;;  %v2586_v53 = vld [vmem:[#allocation4 + $0x8] ss:$0 sps:$4 sm:$0x11]  }
 0x371   : > { %v2584_v50 = vld [vmem:[#allocation4] sm:$0xff]   ;;  %1299 = vrot.lane.b32.xlu0 %v2583_v49, %s2705_s16  ;;  %v2588_v54 = vld [vmem:[#allocation4 + $0x8] ss:$0 sps:$4 sm:$0x11]  }
 0x372   : > { %v2585_v51 = vld [vmem:[#allocation4] sm:$0xff]   ;;  %1090 = vrot.lane.b32.xlu1 %v2584_v50, %s2704_s15  ;;  %v2589_v55 = vld [vmem:[#allocation4 + $0x8] ss:$0 sps:$4 sm:$0x11]  }
 0x373   : > { %2468 = vmatprep.mubr.msk.bf16.mxu1 %vm892_vm8, %v2585_v51  ;;  %v2591_v57 = vld [vmem:[#allocation4 + $0x8] ss:$0 sps:$4 sm:$0x11]   ;;  %v2592_v58 = vld [vmem:[#allocation4] sm:$0xff]  }
 0x375   : > { %2469 = vmatmul.mubr.msk.bf16.vlgmr.msra.gmra.mxu1 %vm892_vm8, %v2586_v53  ;;  %1517 = vrot.lane.b32.xlu0 %v2587_v52, %s2706_s17 }
 0x376   : > { %1092 = vrot.lane.b32.xlu1 %v2588_v54, %s2704_s15  ;;  %v2282_v54 = vld [vmem:[%s3176_s1 + $0xc] ss:$0 sm:$0xff] }
 0x379   : > { %1510 = vrot.lane.b32.xlu0 %v2589_v55, %s2706_s17 }
 0x37a   : > { %1308 = vrot.lane.b32.xlu1 %v2590_v56, %s2705_s16  ;;  %v2283_v56 = vld [vmem:[%s3176_s1 + $0xd] ss:$0 sm:$0xff] }
 0x37e   : > { %1301 = vrot.lane.b32.xlu1 %v2591_v57, %s2705_s16 }
 0x382   : > { %1508 = vrot.lane.b32.xlu1 %v2592_v58, %s2706_s17 }
 0x398   : > { %763 = vadd.xlane.f32.xlu0 %v762_v61 }
 0x3a6   : > { %760 = vadd.xlane.f32.xlu1 %v759_v63 }
 0x3de   : > { %v1100_v0 = vpop.permute.xlu0 %1099 }
 0x3df   : > { %v1108_v2 = vsel %vm892_vm8, %v1100_v0, 0  ;;  %2551 = vmatprep.subr.msk.bf16.mxu1 %vm892_vm8, %v1100_v0 }
 0x3e0   : > { %2479 = vmatpush3.bf16.xpose.msra.mxu1 %v1108_v2  ;;  %v869_v2 = vld [vmem:[#allocation4 + $0x1c] sm:$0x1] }
 0x3e3   : > { %v1300_v4 = vpop.permute.xlu0 %1299 }
 0x3e4   : > { %v1091_v3 = vpop.permute.xlu1 %1090 }
 0x3e5   : > { %2480 = vmatprep.mubr.msk.bf16.mxu1 %vm892_vm8, %v1091_v3 }
 0x3e7   : > { %v1518_v7 = vpop.permute.xlu0 %1517 }
 0x3e8   : > { %v1093_v5 = vpop.permute.xlu1 %1092  ;;  %v1526_v10 = vsel %vm892_vm8, %v1518_v7, 0 }
 0x3e9   : > { %2481 = vmatmul.mubr.msk.bf16.vlgmr.msra.gmra.mxu1 %vm892_vm8, %v1093_v5  ;;  %v2707_v5 = vmov 65535  }
 0x3ea   : > { %2492 = vmatprep.mubr.msk.bf16.mxu1 %vm892_vm8, %v1300_v4 }
 0x3eb   : > { %v1511_v11 = vpop.permute.xlu0 %1510 }
 0x3ec   : > { %v1309_v21 = vpop.permute.xlu1 %1308 }
 0x3ed   : > { %v1317_v17 = vsel %vm892_vm8, %v1309_v21, 0  ;;  %2552 = vmatprep.subr.msk.bf16.mxu1 %vm892_vm8, %v1309_v21  ;;  %v997_v21 = vsel %vm995_vm11, 4294967295, %v2707_v5  ;;  %vm1697_vm11 = vcmask 254144  }
 0x3ee   : > { %2491 = vmatpush3.bf16.xpose.msra.mxu1 %v1317_v17  ;;  %v2996_v17 = vsel %vm996_vm12, %v997_v21, 0  ;;  %vm1698_vm12 = vmand %vm1697_vm11, %vm837_vm6 }
 0x3ef   : > { %2553 = vmatprep.subr.msk.bf16.mxu1 %vm892_vm8, %v1518_v7 }
 0x3f0   : > { %v1302_v8 = vpop.permute.xlu1 %1301 }
 0x3f4   : > { %v1509_v9 = vpop.permute.xlu1 %1508 }
 0x3f5   : > { %2493 = vmatmul.mubr.msk.bf16.vlgmr.msra.gmra.mxu1 %vm892_vm8, %v1302_v8 }
 0x3f6   : > { %2503 = vmatpush3.bf16.xpose.msra.mxu1 %v1526_v10  ;;  %2504 = vmatprep.mubr.msk.bf16.mxu1 %vm892_vm8, %v1509_v9 }
 0x3fd   : > { %2505 = vmatmul.mubr.msk.bf16.vlgmr.msra.gmra.mxu1 %vm892_vm8, %v1511_v11 }
 0x421   : > { %v764_v13 = vpop.xlane.xlu0 %763 }
 0x422   : > { %v766_v14 = vmul.f32 0.03125, %v764_v13 }
 0x424   : > { %v768_v18 = vsub.f32 %v754_v60, %v766_v14 }
 0x426   : > { %v770_v24 = vmul.f32 %v768_v18, %v768_v18 }
 0x428   : > { %v774_v26 = vsel %vm265_vm1, %v770_v24, 0.0 }
 0x42f   : > { %v761_v15 = vpop.xlane.xlu1 %760 }
 0x430   : > { %v765_v16 = vmul.f32 0.03125, %v761_v15 }
 0x432   : > { %v767_v19 = vsub.f32 %v751_v62, %v765_v16 }
 0x434   : > { %v769_v20 = vmul.f32 %v767_v19, %v767_v19 }
 0x435   : > { %v2948_v22 = vpop.f32.mrf.mxu1 }
 0x436   : > { %v771_v23 = vsel %vm258_vm0, %v769_v20, 0.0  ;;  %v958_v29 = vsel %vm957_vm10, %v2948_v22, -inf }
 0x437   : > { %772 = vadd.xlane.f32.xlu0 %v771_v23  ;;  %v2951_v40 = vpop.f32.mrf.mxu1 }
 0x438   : > { %v951_v10 = vsel %vm950_vm9, %v2951_v40, -inf }
 0x439   : > { %v2471_v25 = vpop.f32.mrf.mxu1 }
 0x43b   : > { %v2954_v27 = vpop.f32.mrf.mxu1  ;;  %775 = vadd.xlane.f32.xlu0 %v774_v26 }
 0x43c   : > { %v954_v28 = vsel %vm950_vm9, %v2954_v27, -inf }
 0x43f   : > { %955 = vmax.xlane.f32.xlu0 %v954_v28 }
 0x4a9   : > { %v2958_v30 = vpop.f32.mrf.mxu1 }
 0x4aa   : > { %v1164_v31 = vsel %vm957_vm10, %v2958_v30, -inf }
 0x4ab   : > { %v2962_v32 = vpop.f32.mrf.mxu1  ;;  %1165 = vmax.xlane.f32.xlu0 %v1164_v31 }
 0x4ac   : > { %v1158_v34 = vsel %vm950_vm9, %v2962_v32, -inf }
 0x4ad   : > { %v2483_v33 = vpop.f32.mrf.mxu1 }
 0x4af   : > { %1159 = vmax.xlane.f32.xlu0 %v1158_v34  ;;  %v2966_v35 = vpop.f32.mrf.mxu1 }
 0x4b0   : > { %v1161_v11 = vsel %vm950_vm9, %v2966_v35, -inf }
 0x4b5   : > { %v2968_v36 = vpop.f32.mrf.mxu1 }
 0x4b6   : > { %v1373_v13 = vsel %vm957_vm10, %v2968_v36, -inf }
 0x4b7   : > { %v2970_v37 = vpop.f32.mrf.mxu1 }
 0x4b8   : > { %v1367_v14 = vsel %vm950_vm9, %v2970_v37, -inf }
 0x4b9   : > { %v2495_v38 = vpop.f32.mrf.mxu1 }
 0x4bb   : > { %v2972_v39 = vpop.f32.mrf.mxu1 }
 0x4bc   : > { %v1370_v41 = vsel %vm950_vm9, %v2972_v39, -inf }
 0x4bd   : > { %v2976_v42 = vpop.f32.mrf.mxu1  ;;  %1371 = vmax.xlane.f32.xlu0 %v1370_v41 }
 0x4be   : > { %v1582_v45 = vsel %vm957_vm10, %v2976_v42, -inf }
 0x4bf   : > { %v2978_v43 = vpop.f32.mrf.mxu1 }
 0x4c0   : > { %v773_v44 = vpop.xlane.xlu0 %772  ;;  %v1576_v50 = vsel %vm950_vm9, %v2978_v43, -inf }
 0x4c1   : > { %v777_v46 = vmul.f32 0.03125, %v773_v44  ;;  %v2507_v47 = vpop.f32.mrf.mxu1  ;;  %1583 = vmax.xlane.f32.xlu0 %v1582_v45 }
 0x4c3   : > { %v779_v48 = vadd.f32 1e-05, %v777_v46  ;;  %v3011_v15 = vpop.f32.mrf.mxu1 }
 0x4c4   : > { %v776_v49 = vpop.xlane.xlu0 %775  ;;  %v1579_v16 = vsel %vm950_vm9, %v3011_v15, -inf }
 0x4c5   : > { %2627 = vrsqrt.f32 %v779_v48  ;;  %v778_v51 = vmul.f32 0.03125, %v776_v49  ;;  %1577 = vmax.xlane.f32.xlu0 %v1576_v50 }
 0x4c7   : > { %v780_v52 = vadd.f32 1e-05, %v778_v51 }
 0x4c9   : > { %2629 = vrsqrt.f32 %v780_v52 }
 0x4d2   : > { %v2628_v53 = vpop.eup %2627 }
 0x4d3   : > { %v783_v55 = vmul.f32 %v2628_v53, %v767_v19 }
 0x4d5   : > { %v789_v57 = vmul.f32 %v2282_v54, %v783_v55 }
 0x4d6   : > { %v2630_v58 = vpop.eup %2629 }
 0x4d7   : > { %v795_v59 = vadd.f32 %v2283_v56, %v789_v57  ;;  %v784_v60 = vmul.f32 %v2630_v58, %v768_v18  ;;  %v956_v18 = vpop.xlane.xlu0 %955 }
 0x4d9   : > { %v857_v61 = vsel %vm801_vm4, %v2892_v12, %v795_v59  ;;  %v790_v62 = vmul.f32 %v2282_v54, %v784_v60 }
 0x4da   : > { %v2376_v63 = vpack.c.bf16 %v857_v61, %v857_v61 }
 0x4db   : > { %v796_v0 = vadd.f32 %v2283_v56, %v790_v62 }
 0x4dc   : > { %868 = vst.msk [vmem:[#allocation4 + $0x18] sm:$0xf] %vm833_vm5, %v2376_v63  ;;  %vm1276_vm5 = vcmask 126016  }
 0x4dd   : > { %v2377_v3 = vpack.c.bf16 %v796_v0, %v796_v0 }
 0x4df   : > { %v870_v4 = vsel %vm2906_vm7, %v2377_v3, %v869_v2  ;;  %vm1488_vm7 = vcmask 188544  }
 0x4e0   : > { %871 = vst [vmem:[#allocation4 + $0x1c] sm:$0x1] %v870_v4  ;;  %vm1489_vm8 = vmand %vm1488_vm7, %vm837_vm6  ;;  %vm1938_vm6 = vcmask 516352  }
 0x4e7   : > { %v2593_v7 = vld [vmem:[#allocation4 + $0x18] sm:$0x1f]  }
 0x4e8   : > { %v2594_v8 = vld [vmem:[#allocation4 + $0x18] sm:$0x1f]   ;;  %1404 = vrot.lane.b32.xlu0 %v2593_v7, %s2705_s16 }
 0x4e9   : > { %v2595_v12 = vld [vmem:[#allocation4 + $0x18] sm:$0x1f]   ;;  %1195 = vrot.lane.b32.xlu1 %v2594_v8, %s2704_s15 }
 0x4ea   : > { %v1000_v9 = vand.u32 %v2595_v12, %v2996_v17  ;;  %v2596_v19 = vld [vmem:[#allocation4 + $0x18] sm:$0x1f]  }
 0x4ec   : > { %2472 = vmatprep.subr.bf16.mxu0 %v1000_v9 }
 0x4ed   : > { %2473 = vmatpush3.bf16.msra.mxu0 %v1000_v9 }
 0x50d   : > { %959 = vmax.xlane.f32.xlu1 %v958_v29 }
 0x511   : > { %952 = vmax.xlane.f32.xlu1 %v951_v10 }
 0x515   : > { %1162 = vmax.xlane.f32.xlu1 %v1161_v11 }
 0x519   : > { %1374 = vmax.xlane.f32.xlu1 %v1373_v13 }
 0x51d   : > { %1368 = vmax.xlane.f32.xlu1 %v1367_v14 }
 0x521   : > { %1580 = vmax.xlane.f32.xlu1 %v1579_v16 }
 0x532   : > { %1613 = vrot.lane.b32.xlu1 %v2596_v19, %s2706_s17 }
 0x534   : > { %v1166_v20 = vpop.xlane.xlu0 %1165 }
 0x535   : > { %v1169_v26 = vsub.f32 %v2958_v30, %v1166_v20  ;;  %v962_v30 = vsub.f32 %v2954_v27, %v956_v18 }
 0x537   : > { %v1174_v28 = vmul.f32 1.442695, %v1169_v26  ;;  %v966_v47 = vmul.f32 1.442695, %v962_v30 }
 0x538   : > { %v1160_v23 = vpop.xlane.xlu0 %1159 }
 0x539   : > { %v1167_v24 = vsub.f32 %v2962_v32, %v1160_v23 }
 0x53b   : > { %v1170_v25 = vmul.f32 1.442695, %v1167_v24 }
 0x53d   : > { %2631 = vpow2.f32 %v1170_v25 }
 0x53e   : > { %2633 = vpow2.f32 %v1174_v28 }
 0x53f   : > { %2635 = vpow2.f32 %v966_v47 }
 0x546   : > { %v1372_v44 = vpop.xlane.xlu0 %1371 }
 0x547   : > { %v1377_v52 = vsub.f32 %v2972_v39, %v1372_v44 }
 0x549   : > { %v1381_v27 = vmul.f32 1.442695, %v1377_v52 }
 0x54a   : > { %v3018_v31 = vpop.eup %2631  ;;  %v1584_v51 = vpop.xlane.xlu0 %1583 }
 0x54b   : > { %v1176_v33 = vsel %vm950_vm9, %v3018_v31, 0.0  ;;  %v3022_v34 = vpop.eup %2633  ;;  %v1587_v61 = vsub.f32 %v2976_v42, %v1584_v51 }
 0x54c   : > { %1177 = vadd.xlane.f32.xlu0 %v1176_v33  ;;  %v1182_v38 = vsel %vm957_vm10, %v3022_v34, 0.0  ;;  %v1189_v14 = vpack.c.bf16 %v3022_v34, %v3022_v34 }
 0x54e   : > { %v1578_v57 = vpop.xlane.xlu0 %1577 }
 0x556   : > { %1183 = vadd.xlane.f32.xlu1 %v1182_v38 }
 0x55a   : > { %v1405_v5 = vpop.permute.xlu0 %1404 }
 0x55b   : > { %v1196_v41 = vpop.permute.xlu1 %1195  ;;  %v1413_v42 = vand.u32 %v1405_v5, %v2996_v17 }
 0x55c   : > { %v1204_v32 = vand.u32 %v1196_v41, %v2996_v17 }
 0x55e   : > { %2484 = vmatprep.subr.bf16.mxu0 %v1204_v32 }
 0x596   : > { %v960_v45 = vpop.xlane.xlu1 %959 }
 0x597   : > { %v963_v46 = vsub.f32 %v2948_v22, %v960_v45 }
 0x599   : > { %v968_v48 = vmul.f32 1.442695, %v963_v46 }
 0x59a   : > { %v953_v49 = vpop.xlane.xlu1 %952 }
 0x59b   : > { %v961_v50 = vsub.f32 %v2951_v40, %v953_v49  ;;  %2637 = vpow2.f32 %v968_v48  ;;  %v1585_v40 = vsub.f32 %v2978_v43, %v1578_v57  ;;  %v1072_v57 = vld [vmem:[#allocation4 + $0x2c] sm:$0x1] }
 0x59d   : > { %v964_v53 = vmul.f32 1.442695, %v961_v50  ;;  %v1588_v62 = vmul.f32 1.442695, %v1585_v40 }
 0x59e   : > { %v1163_v54 = vpop.xlane.xlu1 %1162 }
 0x59f   : > { %2639 = vpow2.f32 %v964_v53  ;;  %v1168_v55 = vsub.f32 %v2966_v35, %v1163_v54  ;;  %v2636_v35 = vpop.eup %2635 }
 0x5a0   : > { %v973_v34 = vsel %vm950_vm9, %v2636_v35, 0.0 }
 0x5a1   : > { %v1172_v56 = vmul.f32 1.442695, %v1168_v55 }
 0x5a2   : > { %v1375_v58 = vpop.xlane.xlu1 %1374 }
 0x5a3   : > { %2641 = vpow2.f32 %v1172_v56  ;;  %v1378_v22 = vsub.f32 %v2968_v36, %v1375_v58  ;;  %v1592_v36 = vmul.f32 1.442695, %v1587_v61 }
 0x5a4   : > { %2643 = vpow2.f32 %v1381_v27 }
 0x5a5   : > { %v1383_v59 = vmul.f32 1.442695, %v1378_v22 }
 0x5a6   : > { %v1369_v60 = vpop.xlane.xlu1 %1368 }
 0x5a7   : > { %2645 = vpow2.f32 %v1383_v59  ;;  %v1376_v39 = vsub.f32 %v2970_v37, %v1369_v60 }
 0x5a8   : > { %v2638_v2 = vpop.eup %2637 }
 0x5a9   : > { %v1379_v63 = vmul.f32 1.442695, %v1376_v39  ;;  %v983_v7 = vpack.c.bf16 %v2638_v2, %v2638_v2 }
 0x5aa   : > { %v1581_v0 = vpop.xlane.xlu1 %1580 }
 0x5ab   : > { %2647 = vpow2.f32 %v1379_v63  ;;  %v1586_v3 = vsub.f32 %v3011_v15, %v1581_v0 }
 0x5ac   : > { %v2640_v4 = vpop.eup %2639  ;;  %2649 = vpow2.f32 %v1588_v62 }
 0x5ad   : > { %v1590_v43 = vmul.f32 1.442695, %v1586_v3  ;;  %v982_v21 = vpack.c.bf16 %v2636_v35, %v2640_v4  ;;  %v970_v38 = vsel %vm950_vm9, %v2640_v4, 0.0 }
 0x5ae   : > { %v1614_v10 = vpop.permute.xlu1 %1613 }
 0x5af   : > { %2651 = vpow2.f32 %v1590_v43  ;;  %2474 = vmatprep.mubr.msk.bf16.mxu0 %vm950_vm9, %v982_v21  ;;  %v1622_v16 = vand.u32 %v1614_v10, %v2996_v17 }
 0x5b0   : > { %v2642_v37 = vpop.eup %2641  ;;  %2475 = vmatmul.mubr.msk.bf16.vlgmr.msra.gmra.mxu0 %vm950_vm9, %v983_v7  ;;  %2653 = vpow2.f32 %v1592_v36 }
 0x5b1   : > { %2485 = vmatpush3.bf16.msra.mxu0 %v1204_v32  ;;  %v1179_v8 = vsel %vm950_vm9, %v2642_v37, 0.0  ;;  %v1188_v12 = vpack.c.bf16 %v2642_v37, %v3018_v31  ;;  %v2644_v9 = vpop.eup %2643  ;;  %v976_v31 = vsel %vm957_vm10, %v2638_v2, 0.0 }
 0x5b2   : > { %2496 = vmatprep.subr.bf16.mxu0 %v1413_v42  ;;  %1180 = vadd.xlane.f32.xlu1 %v1179_v8  ;;  %v1388_v13 = vsel %vm950_vm9, %v2644_v9, 0.0 }
 0x5b3   : > { %2486 = vmatprep.mubr.msk.bf16.mxu0 %vm950_vm9, %v1188_v12 }
 0x5b4   : > { %v2646_v29 = vpop.eup %2645 }
 0x5b5   : > { %v1391_v11 = vsel %vm957_vm10, %v2646_v29, 0.0  ;;  %v1398_v17 = vpack.c.bf16 %v2646_v29, %v2646_v29 }
 0x5b6   : > { %1392 = vadd.xlane.f32.xlu0 %v1391_v11  ;;  %1389 = vadd.xlane.f32.xlu1 %v1388_v13 }
 0x5b8   : > { %v2648_v15 = vpop.eup %2647  ;;  %2487 = vmatmul.mubr.msk.bf16.vlgmr.msra.gmra.mxu0 %vm950_vm9, %v1189_v14 }
 0x5b9   : > { %2497 = vmatpush3.bf16.msra.mxu0 %v1413_v42  ;;  %v1385_v18 = vsel %vm950_vm9, %v2648_v15, 0.0  ;;  %v1397_v19 = vpack.c.bf16 %v2644_v9, %v2648_v15  ;;  %v2650_v20 = vpop.eup %2649 }
 0x5ba   : > { %2508 = vmatprep.subr.bf16.mxu0 %v1622_v16  ;;  %1386 = vadd.xlane.f32.xlu0 %v1385_v18  ;;  %v1594_v25 = vsel %vm950_vm9, %v2650_v20, 0.0 }
 0x5bb   : > { %2498 = vmatprep.mubr.msk.bf16.mxu0 %vm950_vm9, %v1397_v19 }
 0x5bc   : > { %v2652_v23 = vpop.eup %2651 }
 0x5bd   : > { %v1597_v24 = vsel %vm950_vm9, %v2652_v23, 0.0  ;;  %v2654_v26 = vpop.eup %2653  ;;  %v1606_v28 = vpack.c.bf16 %v2652_v23, %v2650_v20 }
 0x5be   : > { %1598 = vadd.xlane.f32.xlu1 %v1597_v24  ;;  %1595 = vadd.xlane.f32.xlu0 %v1594_v25  ;;  %v1600_v33 = vsel %vm957_vm10, %v2654_v26, 0.0  ;;  %v1607_v41 = vpack.c.bf16 %v2654_v26, %v2654_v26  ;;  %v2597_v24 = vld [vmem:[%s3178_s3 + $0x38] sm:$0xff]   ;;  %v2598_v25 = vld [vmem:[%s3178_s3 + $0x30] sm:$0xff]   ;;  %vm1694_vm10 = vcmask 257216  }
 0x5bf   : > { %2514 = vmatprep.subr.bf16.mxu1 %v2597_v24 }
 0x5c0   : > { %2499 = vmatmul.mubr.msk.bf16.vlgmr.msra.gmra.mxu0 %vm950_vm9, %v1398_v17  ;;  %2515 = vmatpush3.bf16.msra.mxu1 %v2597_v24  ;;  %v2602_v24 = vld [vmem:[%s3178_s3 + $0x40] sm:$0xff]  }
 0x5c1   : > { %2509 = vmatpush3.bf16.msra.mxu0 %v1622_v16  ;;  %2510 = vmatprep.mubr.msk.bf16.mxu0 %vm950_vm9, %v1606_v28 }
 0x5c2   : > { %977 = vadd.xlane.f32.xlu1 %v976_v31  ;;  %1601 = vadd.xlane.f32.xlu0 %v1600_v33 }
 0x5c3   : > { %2516 = vmatprep.subr.bf16.mxu1 %v2598_v25 }
 0x5c4   : > { %2517 = vmatpush3.bf16.msra.mxu1 %v2598_v25 }
 0x5c6   : > { %974 = vadd.xlane.f32.xlu1 %v973_v34  ;;  %971 = vadd.xlane.f32.xlu0 %v970_v38 }
 0x5c8   : > { %2511 = vmatmul.mubr.msk.bf16.vlgmr.msra.gmra.mxu0 %vm950_vm9, %v1607_v41  ;;  %vm1485_vm9 = vcmask 191616  }
 0x5d5   : > { %v1178_v32 = vpop.xlane.xlu0 %1177 }
 0x5df   : > { %v1184_v44 = vpop.xlane.xlu1 %1183 }
 0x63b   : > { %v1181_v45 = vpop.xlane.xlu1 %1180 }
 0x63f   : > { %v1393_v30 = vpop.xlane.xlu0 %1392  ;;  %v1390_v47 = vpop.xlane.xlu1 %1389 }
 0x643   : > { %v1387_v46 = vpop.xlane.xlu0 %1386 }
 0x647   : > { %v1596_v48 = vpop.xlane.xlu0 %1595  ;;  %v1599_v49 = vpop.xlane.xlu1 %1598 }
 0x64b   : > { %v1602_v50 = vpop.xlane.xlu0 %1601  ;;  %v978_v51 = vpop.xlane.xlu1 %977 }
 0x64c   : > { %2655 = vrcp.f32 %v978_v51 }
 0x64f   : > { %v972_v52 = vpop.xlane.xlu0 %971  ;;  %v975_v53 = vpop.xlane.xlu1 %974 }
 0x650   : > { %2657 = vrcp.f32 %v972_v52 }
 0x651   : > { %2659 = vrcp.f32 %v975_v53 }
 0x652   : > { %2661 = vrcp.f32 %v1184_v44 }
 0x653   : > { %2663 = vrcp.f32 %v1178_v32 }
 0x654   : > { %2665 = vrcp.f32 %v1393_v30 }
 0x655   : > { %2667 = vrcp.f32 %v1181_v45 }
 0x656   : > { %2669 = vrcp.f32 %v1387_v46 }
 0x657   : > { %2671 = vrcp.f32 %v1390_v47 }
 0x658   : > { %2673 = vrcp.f32 %v1596_v48 }
 0x659   : > { %v2656_v54 = vpop.eup %2655  ;;  %2675 = vrcp.f32 %v1602_v50 }
 0x65a   : > { %2677 = vrcp.f32 %v1599_v49 }
 0x65d   : > { %v2658_v56 = vpop.eup %2657 }
 0x65e   : > { %v2660_v61 = vpop.eup %2659 }
 0x65f   : > { %v2662_v35 = vpop.eup %2661 }
 0x660   : > { %v2664_v4 = vpop.eup %2663 }
 0x661   : > { %v2666_v42 = vpop.eup %2665 }
 0x662   : > { %v2668_v12 = vpop.eup %2667 }
 0x663   : > { %v2670_v29 = vpop.eup %2669 }
 0x664   : > { %v2672_v18 = vpop.eup %2671 }
 0x665   : > { %v2674_v17 = vpop.eup %2673 }
 0x666   : > { %v2676_v34 = vpop.eup %2675 }
 0x667   : > { %v2678_v30 = vpop.eup %2677 }
 0x670   : > { %v2476_v55 = vpop.f32.mrf.mxu0 }
 0x671   : > { %v1052_v27 = vmul.f32 %v2656_v54, %v2476_v55 }
 0x672   : > { %v1036_v58 = vpop.f32.mrf.mxu0 }
 0x673   : > { %v2380_v22 = vpack.c.bf16 %v1052_v27, %v1052_v27  ;;  %v1050_v40 = vmul.f32 %v2658_v56, %v1036_v58 }
 0x674   : > { %v2477_v59 = vpop.f32.mrf.mxu0 }
 0x675   : > { %v1073_v60 = vsel %vm1071_vm14, %v2380_v22, %v1072_v57  ;;  %v2378_v39 = vpack.c.bf16 %v1050_v40, %v1050_v40  ;;  %vm1935_vm14 = vcmask 523520  }
 0x676   : > { %1074 = vst [vmem:[#allocation4 + $0x2c] sm:$0x1] %v1073_v60  ;;  %v1039_v62 = vpop.f32.mrf.mxu0 }
 0x677   : > { %1068 = vst.msk [vmem:[#allocation4 + $0x24] sm:$0xf] %vm1067_vm15, %v2378_v39  ;;  %v1051_v63 = vmul.f32 %v2660_v61, %v1039_v62 }
 0x678   : > { %v2488_v0 = vpop.f32.mrf.mxu0 }
 0x679   : > { %v2379_v2 = vpack.c.bf16 %v1051_v63, %v1051_v63  ;;  %v1256_v3 = vmul.f32 %v2662_v35, %v2488_v0  ;;  %v2691_v63 = vld [vmem:[%s2765_s26] sm:$0xff] }
 0x67a   : > { %v1240_v36 = vpop.f32.mrf.mxu0 }
 0x67b   : > { %1069 = vst.msk [vmem:[#allocation4 + $0x28] sm:$0xf] %vm1067_vm15, %v2379_v2  ;;  %v2383_v5 = vpack.c.bf16 %v1256_v3, %v1256_v3  ;;  %v1254_v43 = vmul.f32 %v2664_v4, %v1240_v36  ;;  %v2692_v4 = vld [vmem:[%s2765_s26 + $0x8] sm:$0xff]  ;;  %vm1949_vm15 = vcmask 785920  }
 0x67c   : > { %v2489_v21 = vpop.f32.mrf.mxu0 }
 0x67d   : > { %v2381_v7 = vpack.c.bf16 %v1254_v43, %v1254_v43  ;;  %1271 = vrot.lane.b32.xlu0 %v2383_v5, %s2708_s28  ;;  %v1281_v48 = vld [vmem:[#allocation4 + $0x2c] sm:$0x1]  ;;  %v2693_v5 = vld [vmem:[%s2765_s26 + $0x10] sm:$0x1] }
 0x67e   : > { %v1243_v37 = vpop.f32.mrf.mxu0 }
 0x67f   : > { %1267 = vrot.lane.b32.xlu1 %v2381_v7, %s2708_s28  ;;  %v1255_v11 = vmul.f32 %v2668_v12, %v1243_v37 }
 0x680   : > { %v2500_v8 = vpop.f32.mrf.mxu0 }
 0x681   : > { %v1465_v9 = vmul.f32 %v2666_v42, %v2500_v8  ;;  %v2382_v20 = vpack.c.bf16 %v1255_v11, %v1255_v11 }
 0x682   : > { %v1449_v10 = vpop.f32.mrf.mxu0 }
 0x683   : > { %v2386_v13 = vpack.c.bf16 %v1465_v9, %v1465_v9  ;;  %v1463_v14 = vmul.f32 %v2670_v29, %v1449_v10 }
 0x684   : > { %v2501_v15 = vpop.f32.mrf.mxu0 }
 0x685   : > { %v2384_v16 = vpack.c.bf16 %v1463_v14, %v1463_v14  ;;  %1480 = vrot.lane.b32.xlu1 %v2386_v13, %s2709_s29 }
 0x686   : > { %v1452_v19 = vpop.f32.mrf.mxu0 }
 0x687   : > { %v1464_v23 = vmul.f32 %v2672_v18, %v1452_v19  ;;  %1476 = vrot.lane.b32.xlu0 %v2384_v16, %s2709_s29 }
 0x688   : > { %v2512_v26 = vpop.f32.mrf.mxu0 }
 0x689   : > { %1269 = vrot.lane.b32.xlu1 %v2382_v20, %s2708_s28  ;;  %v2385_v31 = vpack.c.bf16 %v1464_v23, %v1464_v23  ;;  %v1674_v41 = vmul.f32 %v2676_v34, %v2512_v26  ;;  %v2601_v23 = vld [vmem:[%s3178_s3 + $0x48] sm:$0xff]  }
 0x68a   : > { %v1658_v28 = vpop.f32.mrf.mxu0  ;;  %2522 = vmatprep.subr.bf16.mxu0 %v2601_v23 }
 0x68b   : > { %v1672_v33 = vmul.f32 %v2674_v17, %v1658_v28  ;;  %v2389_v46 = vpack.c.bf16 %v1674_v41, %v1674_v41  ;;  %2523 = vmatpush3.bf16.msra.mxu0 %v2601_v23 }
 0x68c   : > { %v2513_v38 = vpop.f32.mrf.mxu0  ;;  %2524 = vmatprep.subr.bf16.mxu0 %v2602_v24 }
 0x68d   : > { %v2387_v32 = vpack.c.bf16 %v1672_v33, %v1672_v33  ;;  %1478 = vrot.lane.b32.xlu1 %v2385_v31, %s2709_s29 }
 0x68e   : > { %v1661_v44 = vpop.f32.mrf.mxu0 }
 0x68f   : > { %v1673_v45 = vmul.f32 %v2678_v30, %v1661_v44  ;;  %1685 = vrot.lane.b32.xlu0 %v2387_v32, %s2710_s10  ;;  %2525 = vmatpush3.bf16.msra.mxu0 %v2602_v24  ;;  %v2345_v44 = vld [vmem:[%s3176_s1 + $0xe] ss:$0 sm:$0xff] }
 0x691   : > { %v2388_v47 = vpack.c.bf16 %v1673_v45, %v1673_v45 }
 0x693   : > { %1687 = vrot.lane.b32.xlu1 %v2388_v47, %s2710_s10  ;;  %1689 = vrot.lane.b32.xlu0 %v2389_v46, %s2710_s10  ;;  %s251_s10 = scalar_lea.vmem %s3181_s6, %s2554_s23 }
 0x6ef   : > { %v1272_v49 = vpop.permute.xlu0 %1271 }
 0x6f0   : > { %v1282_v50 = vsel %vm1280_vm3, %v1272_v49, %v1281_v48  ;;  %v2346_v48 = vld [vmem:[%s3176_s1 + $0xf] ss:$0 sm:$0xff]  ;;  %vm1966_vm3 = vcmask 1041152  }
 0x6f1   : > { %1283 = vst [vmem:[#allocation4 + $0x2c] sm:$0x1] %v1282_v50  ;;  %v1268_v51 = vpop.permute.xlu1 %1267 }
 0x6f2   : > { %1277 = vst.msk [vmem:[#allocation4 + $0x24] sm:$0xf] %vm1276_vm5, %v1268_v51 }
 0x6f7   : > { %v1481_v52 = vpop.permute.xlu1 %1480 }
 0x6f8   : > { %v1490_v53 = vld [vmem:[#allocation4 + $0x2c] sm:$0x1] }
 0x6f9   : > { %v1491_v54 = vsel %vm1489_vm8, %v1481_v52, %v1490_v53  ;;  %v1477_v55 = vpop.permute.xlu0 %1476 }
 0x6fa   : > { %1492 = vst [vmem:[#allocation4 + $0x2c] sm:$0x1] %v1491_v54  ;;  %1486 = vst.msk [vmem:[#allocation4 + $0x24] sm:$0xf] %vm1485_vm9, %v1477_v55 }
 0x6fb   : > { %v1270_v27 = vpop.permute.xlu1 %1269 }
 0x6fc   : > { %1278 = vst.msk [vmem:[#allocation4 + $0x28] sm:$0xf] %vm1276_vm5, %v1270_v27 }
 0x6ff   : > { %v1479_v56 = vpop.permute.xlu1 %1478 }
 0x700   : > { %1487 = vst.msk [vmem:[#allocation4 + $0x28] sm:$0xf] %vm1485_vm9, %v1479_v56 }
 0x701   : > { %v1686_v57 = vpop.permute.xlu0 %1685  ;;  %v1699_v22 = vld [vmem:[#allocation4 + $0x2c] sm:$0x1] }
 0x702   : > { %1695 = vst.msk [vmem:[#allocation4 + $0x24] sm:$0xf] %vm1694_vm10, %v1686_v57  ;;  %v2351_v57 = vld [vmem:[%s3176_s1 + $0x10] ss:$0 sm:$0xff] }
 0x705   : > { %v1688_v58 = vpop.permute.xlu1 %1687  ;;  %v1690_v40 = vpop.permute.xlu0 %1689 }
 0x706   : > { %1696 = vst.msk [vmem:[#allocation4 + $0x28] sm:$0xf] %vm1694_vm10, %v1688_v58  ;;  %v1700_v59 = vsel %vm1698_vm12, %v1690_v40, %v1699_v22 }
 0x707   : > { %1701 = vst [vmem:[#allocation4 + $0x2c] sm:$0x1] %v1700_v59 }
 0x70d   : > { %v2599_v60 = vld [vmem:[#allocation4 + $0x24] sm:$0xff]  }
 0x70e   : > { %v2600_v39 = vld [vmem:[#allocation4 + $0x2c] ss:$0 sps:$4 sm:$0x11]   ;;  %2518 = vmatprep.mubr.msk.bf16.mxu1 %vm258_vm0, %v2599_v60 }
 0x70f   : > { %2519 = vmatmul.mubr.msk.bf16.vlgmr.msra.gmra.mxu1 %vm258_vm0, %v2600_v39 }
 0x7cf   : > { %v2520_v61 = vpop.f32.mrf.mxu1 }
 0x7d0   : > { %v3083_v43 = vadd.f32 %v2693_v5, %v2520_v61  ;;  %v2609_v5 = vld [vmem:[%s3180_s5 + $0x8] sm:$0xff]  }
 0x7d1   : > { %v1770_v62 = vpop.f32.mrf.mxu1 }
 0x7d2   : > { %v3075_v35 = vadd.f32 %v2691_v63, %v1770_v62  ;;  %v1795_v7 = vsel %vm265_vm1, %v3083_v43, 0.0  ;;  %v2603_v62 = vld [vmem:[%s3180_s5 + $0x38] sm:$0xff]   ;;  %v2604_v63 = vld [vmem:[%s3180_s5 + $0x30] sm:$0xff]  }
 0x7d3   : > { %v2521_v0 = vpop.f32.mrf.mxu1  ;;  %2530 = vmatprep.subr.bf16.mxu1 %v2603_v62 }
 0x7d4   : > { %v1789_v2 = vsel %vm258_vm0, %v3075_v35, 0.0  ;;  %2531 = vmatpush3.bf16.msra.mxu1 %v2603_v62  ;;  %v2605_v0 = vld [vmem:[%s3180_s5 + $0x28] sm:$0xff]  }
 0x7d5   : > { %1790 = vadd.xlane.f32.xlu1 %v1789_v2  ;;  %v1773_v3 = vpop.f32.mrf.mxu1  ;;  %2532 = vmatprep.subr.bf16.mxu1 %v2604_v63  ;;  %v2606_v2 = vld [vmem:[%s3180_s5 + $0x20] sm:$0xff]  }
 0x7d6   : > { %v3080_v36 = vadd.f32 %v2692_v4, %v1773_v3  ;;  %v2607_v3 = vld [vmem:[%s3180_s5 + $0x18] sm:$0xff]   ;;  %v2608_v4 = vld [vmem:[%s3180_s5 + $0x10] sm:$0xff]  }
 0x7d8   : > { %v1792_v21 = vsel %vm258_vm0, %v3080_v36, 0.0  ;;  %2533 = vmatpush3.bf16.msra.mxu1 %v2604_v63 }
 0x7d9   : > { %1793 = vadd.xlane.f32.xlu0 %v1792_v21  ;;  %2534 = vmatprep.subr.bf16.mxu1 %v2605_v0  ;;  %v2610_v21 = vld [vmem:[%s3180_s5] sm:$0xff]  }
 0x7dc   : > { %2535 = vmatpush3.bf16.msra.mxu1 %v2605_v0 }
 0x7dd   : > { %1796 = vadd.xlane.f32.xlu0 %v1795_v7  ;;  %2536 = vmatprep.subr.bf16.mxu1 %v2606_v2 }
 0x7e0   : > { %2537 = vmatpush3.bf16.msra.mxu1 %v2606_v2 }
 0x7e1   : > { %2538 = vmatprep.subr.bf16.mxu1 %v2607_v3 }
 0x7e4   : > { %2539 = vmatpush3.bf16.msra.mxu1 %v2607_v3 }
 0x7e5   : > { %2540 = vmatprep.subr.bf16.mxu1 %v2608_v4 }
 0x7e8   : > { %2541 = vmatpush3.bf16.msra.mxu1 %v2608_v4 }
 0x7e9   : > { %2542 = vmatprep.subr.bf16.mxu1 %v2609_v5 }
 0x7ec   : > { %2543 = vmatpush3.bf16.msra.mxu1 %v2609_v5 }
 0x7ed   : > { %2544 = vmatprep.subr.bf16.mxu1 %v2610_v21 }
 0x7f0   : > { %2545 = vmatpush3.bf16.msra.mxu1 %v2610_v21 }
 0x85e   : > { %v1791_v37 = vpop.xlane.xlu1 %1790 }
 0x85f   : > { %v1798_v42 = vmul.f32 0.03125, %v1791_v37 }
 0x861   : > { %v1801_v8 = vsub.f32 %v3075_v35, %v1798_v42 }
 0x862   : > { %v1794_v12 = vpop.xlane.xlu0 %1793 }
 0x863   : > { %v1799_v9 = vmul.f32 0.03125, %v1794_v12  ;;  %v1804_v29 = vmul.f32 %v1801_v8, %v1801_v8 }
 0x865   : > { %v1802_v10 = vsub.f32 %v3080_v36, %v1799_v9  ;;  %v1807_v11 = vsel %vm258_vm0, %v1804_v29, 0.0 }
 0x866   : > { %1808 = vadd.xlane.f32.xlu0 %v1807_v11  ;;  %v1797_v13 = vpop.xlane.xlu0 %1796 }
 0x867   : > { %v1800_v14 = vmul.f32 0.03125, %v1797_v13  ;;  %v1805_v15 = vmul.f32 %v1802_v10, %v1802_v10  ;;  %v2356_v13 = vld [vmem:[%s3179_s4] ss:$0 sm:$0xff] }
 0x869   : > { %v1803_v16 = vsub.f32 %v3083_v43, %v1800_v14  ;;  %v1810_v18 = vsel %vm258_vm0, %v1805_v15, 0.0  ;;  %v2357_v14 = vld [vmem:[%s3179_s4 + $0x1] ss:$0 sm:$0xff] }
 0x86a   : > { %1811 = vadd.xlane.f32.xlu1 %v1810_v18 }
 0x86b   : > { %v1806_v19 = vmul.f32 %v1803_v16, %v1803_v16 }
 0x86d   : > { %v1813_v20 = vsel %vm265_vm1, %v1806_v19, 0.0 }
 0x86e   : > { %1814 = vadd.xlane.f32.xlu0 %v1813_v20 }
 0x8ef   : > { %v1809_v25 = vpop.xlane.xlu0 %1808 }
 0x8f0   : > { %v1816_v26 = vmul.f32 0.03125, %v1809_v25 }
 0x8f2   : > { %v1819_v17 = vadd.f32 1e-05, %v1816_v26 }
 0x8f3   : > { %v1812_v28 = vpop.xlane.xlu1 %1811 }
 0x8f4   : > { %2679 = vrsqrt.f32 %v1819_v17  ;;  %v1817_v31 = vmul.f32 0.03125, %v1812_v28 }
 0x8f6   : > { %v1820_v33 = vadd.f32 1e-05, %v1817_v31 }
 0x8f7   : > { %v1815_v34 = vpop.xlane.xlu0 %1814 }
 0x8f8   : > { %2681 = vrsqrt.f32 %v1820_v33  ;;  %v1818_v38 = vmul.f32 0.03125, %v1815_v34  ;;  %v2000_v33 = vld [vmem:[#allocation3 + $0x12] sm:$0x1]  ;;  %v2359_v34 = vld [vmem:[%s3179_s4 + $0x3] ss:$0 sm:$0xff] }
 0x8fa   : > { %v1821_v41 = vadd.f32 1e-05, %v1818_v38 }
 0x8fc   : > { %2683 = vrsqrt.f32 %v1821_v41 }
 0x901   : > { %v2680_v32 = vpop.eup %2679 }
 0x902   : > { %v1825_v30 = vmul.f32 %v2680_v32, %v1801_v8 }
 0x904   : > { %v1832_v47 = vmul.f32 %v2345_v44, %v1825_v30 }
 0x905   : > { %v2682_v45 = vpop.eup %2681 }
 0x906   : > { %v1826_v46 = vmul.f32 %v2682_v45, %v1802_v10  ;;  %v3107_v52 = vadd.f32 %v2346_v48, %v1832_v47 }
 0x908   : > { %v1833_v49 = vmul.f32 %v2345_v44, %v1826_v46 }
 0x909   : > { %v2684_v50 = vpop.eup %2683 }
 0x90a   : > { %v1827_v51 = vmul.f32 %v2684_v50, %v1803_v16  ;;  %v1840_v53 = vadd.f32 %v2346_v48, %v1833_v49 }
 0x90c   : > { %v1847_v54 = vpack.c.bf16 %v1840_v53, %v3107_v52  ;;  %v1834_v55 = vmul.f32 %v2345_v44, %v1827_v51 }
 0x90e   : > { %2526 = vmatprep.mubr.msk.bf16.mxu0 %vm258_vm0, %v1847_v54  ;;  %v1841_v27 = vadd.f32 %v2346_v48, %v1834_v55 }
 0x910   : > { %v1848_v56 = vpack.c.bf16 %v1841_v27, %v1841_v27 }
 0x912   : > { %2527 = vmatmul.mubr.msk.bf16.vlgmr.msra.gmra.mxu0 %vm258_vm0, %v1848_v56 }
 0x9d2   : > { %v2528_v58 = vpop.f32.mrf.mxu0 }
 0x9d3   : > { %v1915_v22 = vadd.f32 %v2528_v58, %v2351_v57 }
 0x9d4   : > { %v1906_v40 = vpop.f32.mrf.mxu0 }
 0x9d5   : > { %1922 = vst.msk [vmem:[#allocation3 + $0x11] sm:$0x1] %vm265_vm1, %v1915_v22  ;;  %v1907_v59 = vadd.f32 %v2351_v57, %v1906_v40  ;;  %1930 = vrot.lane.b32.xlu1 %v1915_v22, %s2711_s20 }
 0x9d6   : > { %v2529_v60 = vpop.f32.mrf.mxu0 }
 0x9d7   : > { %1920 = vst.msk [vmem:[#allocation3 + $0x1] sm:$0xff] %vm258_vm0, %v1907_v59  ;;  %1954 = vrot.lane.b32.xlu0 %v1907_v59, %s2712_s24 }
 0x9d8   : > { %v1909_v39 = vpop.f32.mrf.mxu0 }
 0x9d9   : > { %v1910_v61 = vadd.f32 %v2351_v57, %v1909_v39  ;;  %1944 = vrot.lane.b32.xlu1 %v1915_v22, %s2713_s25 }
 0x9db   : > { %1921 = vst.msk [vmem:[#allocation3 + $0x9] sm:$0xff] %vm258_vm0, %v1910_v61  ;;  %1928 = vrot.lane.b32.xlu0 %v1910_v61, %s2711_s20 }
 0x9dd   : > { %1926 = vrot.lane.b32.xlu1 %v1907_v59, %s2711_s20 }
 0x9df   : > { %1956 = vrot.lane.b32.xlu0 %v1910_v61, %s2712_s24 }
 0x9e1   : > { %1940 = vrot.lane.b32.xlu1 %v1907_v59, %s2713_s25 }
 0x9e5   : > { %1942 = vrot.lane.b32.xlu1 %v1910_v61, %s2713_s25 }
 0x9e9   : > { %1958 = vrot.lane.b32.xlu1 %v1915_v22, %s2712_s24 }
 0xa47   : > { %v1931_v7 = vpop.permute.xlu1 %1930 }
 0xa48   : > { %1939 = vst.msk [vmem:[#allocation3 + $0x11] sm:$0x1] %vm1938_vm6, %v1931_v7 }
 0xa49   : > { %v1955_v37 = vpop.permute.xlu0 %1954 }
 0xa4b   : > { %v1945_v42 = vpop.permute.xlu1 %1944 }
 0xa4c   : > { %1953 = vst.msk [vmem:[#allocation3 + $0x11] sm:$0x1] %vm1952_vm13, %v1945_v42 }
 0xa4d   : > { %v1929_v8 = vpop.permute.xlu0 %1928 }
 0xa4e   : > { %1937 = vst.msk [vmem:[#allocation3 + $0x9] sm:$0xff] %vm1935_vm14, %v1929_v8 }
 0xa4f   : > { %v1927_v12 = vpop.permute.xlu1 %1926 }
 0xa50   : > { %1936 = vst.msk [vmem:[#allocation3 + $0x1] sm:$0xff] %vm1935_vm14, %v1927_v12 }
 0xa51   : > { %v1957_v10 = vpop.permute.xlu0 %1956 }
 0xa53   : > { %v1941_v9 = vpop.permute.xlu1 %1940 }
 0xa54   : > { %1950 = vst.msk [vmem:[#allocation3 + $0x1] sm:$0xff] %vm1949_vm15, %v1941_v9 }
 0xa55   : > { %1964 = vst.msk [vmem:[#allocation3 + $0x1] sm:$0xff] %vm1963_vm2, %v1955_v37 }
 0xa56   : > { %1968 = vst [vmem:[#allocation3] sm:$0x3] %v2702_v6  ;;  %v2358_v6 = vld [vmem:[%s3179_s4 + $0x2] ss:$0 sm:$0xff] }
 0xa57   : > { %v1943_v29 = vpop.permute.xlu1 %1942  ;;  %v2008_v47 = vmul.f32 %v2358_v6, %v2000_v33 }
 0xa58   : > { %1951 = vst.msk [vmem:[#allocation3 + $0x9] sm:$0xff] %vm1949_vm15, %v1943_v29 }
 0xa59   : > { %1965 = vst.msk [vmem:[#allocation3 + $0x9] sm:$0xff] %vm1963_vm2, %v1957_v10 }
 0xa5b   : > { %v1959_v11 = vpop.permute.xlu1 %1958 }
 0xa5c   : > { %1967 = vst.msk [vmem:[#allocation3 + $0x11] sm:$0x1] %vm1966_vm3, %v1959_v11 }
 0xa5d   : > { %v1970_v15 = vld [vmem:[#allocation3] sm:$0xff] }
 0xa5e   : > { %v1984_v16 = vld [vmem:[#allocation3 + $0x1] sm:$0xff]  ;;  %v1978_v18 = vmul.f32 %v2356_v13, %v1970_v15 }
 0xa5f   : > { %v1992_v19 = vmul.f32 %v2357_v14, %v1984_v16 }
 0xa60   : > { %v1971_v20 = vld [vmem:[#allocation3 + $0x8] sm:$0xff]  ;;  %v1972_v31 = vld [vmem:[#allocation3 + $0x10] sm:$0x1] }
 0xa61   : > { %v1985_v23 = vld [vmem:[#allocation3 + $0x9] sm:$0xff]  ;;  %v1995_v24 = vadd.f32 %v1992_v19, %v1978_v18  ;;  %v1979_v26 = vmul.f32 %v2356_v13, %v1971_v20  ;;  %v1980_v45 = vmul.f32 %v2356_v13, %v1972_v31 }
 0xa62   : > { %v1998_v25 = vld [vmem:[#allocation3 + $0x2] sm:$0xff]  ;;  %v1993_v17 = vmul.f32 %v2357_v14, %v1985_v23 }
 0xa63   : > { %v2006_v28 = vmul.f32 %v2358_v6, %v1998_v25  ;;  %v1999_v41 = vld [vmem:[#allocation3 + $0xa] sm:$0xff] }
 0xa64   : > { %v1996_v38 = vadd.f32 %v1993_v17, %v1979_v26  ;;  %v1986_v30 = vld [vmem:[#allocation3 + $0x11] sm:$0x1]  ;;  %v2007_v44 = vmul.f32 %v2358_v6, %v1999_v41 }
 0xa65   : > { %v2009_v32 = vadd.f32 %v2006_v28, %v1995_v24  ;;  %v1994_v46 = vmul.f32 %v2357_v14, %v1986_v30  ;;  %v2360_v14 = vld [vmem:[%s3176_s1 + $0x11] ss:$0 sm:$0xff] }
 0xa66   : > { %v2010_v49 = vadd.f32 %v2007_v44, %v1996_v38 }
 0xa67   : > { %v2017_v48 = vadd.f32 %v2359_v34, %v2009_v32  ;;  %v1997_v50 = vadd.f32 %v1994_v46, %v1980_v45 }
 0xa68   : > { %v2018_v53 = vadd.f32 %v2359_v34, %v2010_v49 }
 0xa69   : > { %v2023_v51 = vmul.f32 0.044715, %v2017_v48  ;;  %v2011_v54 = vadd.f32 %v2008_v47, %v1997_v50  ;;  %v2020_v21 = vmul.f32 0.5, %v2017_v48 }
 0xa6a   : > { %v2024_v27 = vmul.f32 0.044715, %v2018_v53  ;;  %v2021_v7 = vmul.f32 0.5, %v2018_v53 }
 0xa6b   : > { %v2026_v55 = vmul.f32 %v2023_v51, %v2017_v48  ;;  %v2019_v56 = vadd.f32 %v2359_v34, %v2011_v54 }
 0xa6c   : > { %v2027_v58 = vmul.f32 %v2024_v27, %v2018_v53 }
 0xa6d   : > { %v2029_v57 = vmul.f32 %v2026_v55, %v2017_v48  ;;  %v2025_v22 = vmul.f32 0.044715, %v2019_v56  ;;  %v2022_v9 = vmul.f32 0.5, %v2019_v56 }
 0xa6e   : > { %v2030_v59 = vmul.f32 %v2027_v58, %v2018_v53 }
 0xa6f   : > { %v2032_v40 = vadd.f32 %v2029_v57, %v2017_v48  ;;  %v2028_v60 = vmul.f32 %v2025_v22, %v2019_v56 }
 0xa70   : > { %v2033_v61 = vadd.f32 %v2030_v59, %v2018_v53 }
 0xa71   : > { %v2035_v39 = vmul.f32 0.7978846, %v2032_v40  ;;  %v2031_v62 = vmul.f32 %v2028_v60, %v2019_v56 }
 0xa72   : > { %v2036_v63 = vmul.f32 0.7978846, %v2033_v61 }
 0xa73   : > { %2685 = vtanh.f32 %v2035_v39  ;;  %v2034_v0 = vadd.f32 %v2031_v62, %v2019_v56 }
 0xa74   : > { %2687 = vtanh.f32 %v2036_v63 }
 0xa75   : > { %v2037_v2 = vmul.f32 0.7978846, %v2034_v0 }
 0xa77   : > { %2689 = vtanh.f32 %v2037_v2 }
 0xa80   : > { %v2686_v3 = vpop.eup %2685 }
 0xa81   : > { %v2041_v4 = vadd.f32 1.0, %v2686_v3  ;;  %v2688_v5 = vpop.eup %2687 }
 0xa82   : > { %v2042_v37 = vadd.f32 1.0, %v2688_v5 }
 0xa83   : > { %v2044_v8 = vmul.f32 %v2041_v4, %v2020_v21 }
 0xa84   : > { %v2690_v42 = vpop.eup %2689  ;;  %v2045_v12 = vmul.f32 %v2042_v37, %v2021_v7 }
 0xa85   : > { %v2043_v29 = vadd.f32 1.0, %v2690_v42 }
 0xa86   : > { %v2063_v10 = vpack.c.bf16 %v2045_v12, %v2044_v8 }
 0xa87   : > { %v2046_v11 = vmul.f32 %v2043_v29, %v2022_v9 }
 0xa88   : > { %2546 = vmatprep.mubr.bf16.mxu1 %v2063_v10 }
 0xa89   : > { %v2064_v13 = vpack.c.bf16 %v2046_v11, %v2046_v11 }
 0xa8b   : > { %2547 = vmatmul.mubr.bf16.vlgmr.msra.gmra.mxu1 %v2064_v13 }
 0xb4b   : > { %v2548_v15 = vpop.f32.mrf.mxu1 }
 0xb4c   : > { %v2161_v16 = vadd.f32 %v2548_v15, %v2360_v14 }
 0xb4d   : > { %v2152_v18 = vpop.f32.mrf.mxu1 }
 0xb4e   : > { %v2171_v19 = vadd.f32 %v2161_v16, %v3083_v43  ;;  %v2153_v6 = vadd.f32 %v2360_v14, %v2152_v18 }
 0xb4f   : > { %v2549_v20 = vpop.f32.mrf.mxu1 }
 0xb50   : > { %2174 = vst.msk [vmem:[%s251_s10 + $0x10] sm:$0x1] %vm265_vm1, %v2171_v19  ;;  %v2166_v23 = vsel %vm801_vm4, %v3107_v52, %v2153_v6 }
 0xb51   : > { %v2169_v24 = vadd.f32 %v2166_v23, %v3075_v35  ;;  %v2155_v25 = vpop.f32.mrf.mxu1 }
 0xb52   : > { %v2156_v26 = vadd.f32 %v2360_v14, %v2155_v25 }
 0xb53   : > { %2172 = vst.msk [vmem:[%s251_s10] sm:$0xff] %vm258_vm0, %v2169_v24 }
 0xb54   : > { %v2170_v17 = vadd.f32 %v2156_v26, %v3080_v36 }
 0xb56   : > { %2173 = vst.msk [vmem:[%s251_s10 + $0x8] sm:$0xff] %vm258_vm0, %v2170_v17 }
 0xb57 PF: > { %s16_s21 = sadd.s32 1, %s2700_s21  }
 0xb58   : > { %p13_p4 = scmp.ge.s32.totalorder %s16_s21, 4  }
 0xb5a   :  { %15 = sbr.rel (!%p13_p4) target bundleno = 1 (0x1), region = 88 }

// kernel: run_kernel.2
= control target key start
LH: loop header
LB: loop body
LE: loop exit
PB: predicated region body
PF: predicated region fallthrough
CT: control target
= control target key end

     0   :  { %11 = vsyncpa [#allocation6], 0  ;;  %s3289_s0 = inlined_call_operand.vmem [shape: f32[2,17,32], index: 0, kind: input, shape index: {}]   ;;  %s3290_s1 = inlined_call_operand.hbm [shape: f32[18,32], index: 1, kind: input, shape index: {}]   ;;  %s3291_s2 = inlined_call_operand.vmem [shape: f32[3,3,32], index: 2, kind: input, shape index: {}]   ;;  %s3292_s3 = inlined_call_operand.vmem [shape: bf16[5,32,32], index: 3, kind: input, shape index: {}]   ;;  %s3293_s4 = inlined_call_operand.vmem [shape: f32[4,128], index: 4, kind: input, shape index: {}]   ;;  %s3294_s5 = inlined_call_operand.hbm [shape: bf16[128,32], index: 5, kind: input, shape index: {}]   ;;  %s3295_s6 = inlined_call_operand.vmem [shape: f32[2,17,32], index: 6, kind: output, shape index: {}]  }
   0x1   :  { %12 = vsyncpa [#allocation8], 0  ;;  %s2896_s21 = smov 0  }
   0x2 LB: > { %s2843_s22 = smov [#allocation5]   ;;  %s2902_s24 = sadd.s32 4294967295, %s2841_s21   ;;  %s2841_s21 = sphi %s2896_s21, %s18_s21  }
   0x3   : > { %s192_s23 = sshll.u32 %s2843_s22, 4  ;;  %p2284_p0 = scmp.ge.s32.totalorder %s2841_s21, 1  ;;  %s193_s23 = int_to_ptr.vmem [resolvable:$true] %s192_s23 }
   0x4   : > { %p180_p1 = scmp.lt.s32.totalorder %s2841_s21, 3  ;;  %p2626_p3 = scmp.eq.s32.totalorder %s2902_s24, 0 }
   0x5   : > { %s2844_s26 = smov [#allocation7]   ;;  %s2786_s29 = scalar_lea.vmem %s193_s23, 384 }
   0x6   : > { %p2906_p2 = pnand %p2284_p0, %p180_p1  ;;  %s214_s27 = sshll.u32 %s2844_s26, 4  ;;  %s215_s27 = int_to_ptr.vmem [resolvable:$true] %s214_s27 }
   0x7   : > { %p2787_p7 = scmp.ne.s32.totalorder %s193_s23, %s2786_s29  ;;  %p2794_p10 = scmp.lt.s32.totalorder %s193_s23, %s193_s23 }
   0x8   : > { %p2619_p4 = pneg %p2906_p2  ;;  %p2795_p11 = scmp.lt.s32.totalorder %s2786_s29, %s2786_s29 }
   0xa   : > { %p2915_p5 = pnand %p2626_p3, %p2619_p4  ;;  %p2796_p12 = por %p2795_p11, %p2794_p10 }
   0xc   : > { %p2777_p6 = pneg %p2915_p5 }
   0xe   : > { %p2789_p8 = pnand %p2787_p7, %p2777_p6 }
  0x10   : > { %p2790_p9 = pneg %p2789_p8 }
  0x12   : > { %p2797_p13 = pnand %p2796_p12, %p2790_p9 }
  0x14   : > { %2800 = shalt.err (!%p2797_p13)
}
  0x15   : > { %s2845_s30 = smov 128   ;;  %s2846_s7 = smov 8  }
  0x16   : > { %2622 = dma.hbm_to_vmem [thread:$0]  (!%p2915_p5), %s3290_s1, 384, %s193_s23, [#allocation6], %s2845_s30, %s2845_s30, %s2846_s7  }
  0x17   : > { %s2812_s10 = scalar_lea.vmem %s215_s27, 1024  ;;  %p2820_p7 = scmp.lt.s32.totalorder %s215_s27, %s215_s27 }
  0x18   : > { %p2813_p0 = scmp.ne.s32.totalorder %s215_s27, %s2812_s10  ;;  %p2821_p8 = scmp.lt.s32.totalorder %s2812_s10, %s2812_s10 }
  0x1a   : > { %p2815_p1 = pnand %p2813_p0, %p2777_p6  ;;  %p2822_p10 = por %p2821_p8, %p2820_p7 }
  0x1c   : > { %p2816_p4 = pneg %p2815_p1 }
  0x1e   : > { %p2823_p9 = pnand %p2822_p10, %p2816_p4 }
  0x20   : > { %2826 = shalt.err (!%p2823_p9)
}
  0x21   : > { %s2847_s11 = smov 64   ;;  %s2848_s12 = smov 4  }
  0x22   : > { %2625 = dma.hbm_to_vmem [thread:$0]  (!%p2915_p5), %s3294_s5, 1024, %s215_s27, [#allocation8], %s2847_s11, %s2847_s11, %s2848_s12  }
  0x23   : > { %238 = sbr.rel (%p2906_p2) target bundleno = 2937 (0xb79), region = 44 }
  0x28   : > { %2832 = dma.done.wait (%p2626_p3), [#allocation6], 384  }
  0x29   : > { %2834 = vsyncadd (%p2626_p3), [#allocation6], 4294966912 }
  0x2a   : > { %2836 = dma.done.wait (%p2626_p3), [#allocation8], 1024  }
  0x2b   : > { %2838 = vsyncadd (%p2626_p3), [#allocation8], 4294966272  ;;  %p272_p6 = scmp.lt.s32.totalorder %s2902_s24, 1  ;;  %vm288_vm0 = vcmask 261120   ;;  %vm295_vm1 = vcmask 253952   ;;  %v2849_v6 = vmov 0.0  }
  0x2c   : > { %349 = vst.msk [vmem:[#allocation2 + $0x13] sm:$0x1] %vm295_vm1, %v2849_v6  ;;  %1999 = vst [vmem:[#allocation3 + $0x12] sm:$0x1] %v2849_v6  ;;  %v2656_v22 = vld [vmem:[%s3292_s3 + $0x8] sm:$0xff]   ;;  %v2657_v23 = vld [vmem:[%s3292_s3] sm:$0xff]  }
  0x2d   : > { %s3301_s24 = smov (!%p272_p6, %s2902_s24), 1  ;;  %2498 = vmatprep.subr.bf16.mxu0 %v2656_v22  ;;  %v2293_v34 = vld [vmem:[#allocation5] ss:$0 sm:$0xff]  ;;  %v2294_v36 = vld [vmem:[#allocation5 + $0x1] ss:$0 sm:$0xff]  ;;  %vm347_vm2 = vcmask 256000  }
  0x2e   : > { %s2610_s15 = smul.u32 24, %s3301_s24  ;;  %2499 = vmatpush3.bf16.msra.mxu0 %v2656_v22  ;;  %v2295_v47 = vld [vmem:[%s3291_s2] ss:$0 sm:$0xff]  ;;  %v2296_v48 = vld [vmem:[%s3291_s2 + $0x1] ss:$0 sm:$0xff]  ;;  %vm2850_vm3 = vmmov 0  }
  0x2f   : > { %2500 = vmatprep.subr.bf16.mxu0 %v2657_v23  ;;  %v2297_v53 = vld [vmem:[%s3291_s2 + $0x2] ss:$0 sm:$0xff]  ;;  %v2307_v54 = vld [vmem:[%s3291_s2 + $0x4] ss:$0 sm:$0xff]  ;;  %v2309_v58 = vld [vmem:[%s3291_s2 + $0x5] ss:$0 sm:$0xff] }
  0x30   : > { %s2957_s18 = scalar_lea.vmem %s3289_s0, %s2610_s15  ;;  %vm863_vm5 = vcmask 257024   ;;  %vm867_vm6 = vsmask.f32 256  ;;  %vm922_vm8 = vcmask 64512   ;;  %s2851_s7 = smov 120   ;;  %vm980_vm9 = vcmask 72704  }
  0x31   : > { %v283_v0 = vld [vmem:[%s2957_s18] sm:$0xff]  ;;  %v285_v1 = vld [vmem:[%s2957_s18 + $0x10] sm:$0x1]  ;;  %v284_v2 = vld [vmem:[%s2957_s18 + $0x8] sm:$0xff]  ;;  %s2852_s8 = smov 112   ;;  %s2853_s9 = smov 104  }
  0x32   : > { %v289_v3 = vsel %vm288_vm0, %v283_v0, 0.0  ;;  %v296_v4 = vsel %vm295_vm1, %v285_v1, 0.0  ;;  %v292_v5 = vsel %vm288_vm0, %v284_v2, 0.0  ;;  %2501 = vmatpush3.bf16.msra.mxu0 %v2657_v23  ;;  %vm3065_vm7 = vmand %vm295_vm1, %vm867_vm6  ;;  %vm987_vm10 = vcmask 65536   ;;  %s2855_s10 = smov 8   ;;  %s2856_s11 = smov 16  }
  0x33   : > { %290 = vadd.xlane.f32.xlu0 %v289_v3  ;;  %297 = vadd.xlane.f32.xlu1 %v296_v4  ;;  %v380_v57 = vld [vmem:[#allocation2 + $0x13] sm:$0x1]  ;;  %vm1025_vm11 = vcmask 1043456   ;;  %vm1026_vm12 = vcmask 1044480   ;;  %vm1100_vm13 = vcmask 57344   ;;  %vm1097_vm15 = vcmask 60416   ;;  %s281_s13 = scalar_lea.vmem %s3295_s6, %s2610_s15 }
  0x34   : > { %2506 = vmatprep.subr.bf16.mxu0 %v2849_v6  ;;  %vm1101_vm14 = vmand %vm1100_vm13, %vm867_vm6  ;;  %s2857_s17 = smov 24   ;;  %s2858_s23 = smov 32   ;;  %vm1982_vm13 = vcmask 778752  }
  0x35   : > { %s2859_s25 = smov 96   ;;  %s2860_s26 = smov 64  }
  0x37   : > { %293 = vadd.xlane.f32.xlu0 %v292_v5 }
  0xbc   : > { %v291_v7 = vpop.xlane.xlu0 %290  ;;  %v298_v8 = vpop.xlane.xlu1 %297 }
  0xbd   : > { %v300_v9 = vmul.f32 0.03125, %v291_v7  ;;  %v302_v10 = vmul.f32 0.03125, %v298_v8  ;;  %v388_v8 = vmul.f32 %v2297_v53, %v380_v57  ;;  %v2329_v57 = vld [vmem:[#allocation5 + $0x6] ss:$0 sm:$0xff] }
  0xbf   : > { %v303_v11 = vsub.f32 %v283_v0, %v300_v9  ;;  %v305_v12 = vsub.f32 %v285_v1, %v302_v10 }
  0xc0   : > { %v294_v13 = vpop.xlane.xlu0 %293 }
  0xc1   : > { %v301_v14 = vmul.f32 0.03125, %v294_v13  ;;  %v306_v15 = vmul.f32 %v303_v11, %v303_v11  ;;  %v308_v16 = vmul.f32 %v305_v12, %v305_v12 }
  0xc3   : > { %v304_v17 = vsub.f32 %v284_v2, %v301_v14  ;;  %v309_v18 = vsel %vm288_vm0, %v306_v15, 0.0  ;;  %v315_v19 = vsel %vm295_vm1, %v308_v16, 0.0 }
  0xc4   : > { %310 = vadd.xlane.f32.xlu1 %v309_v18 }
  0xc5   : > { %v307_v20 = vmul.f32 %v304_v17, %v304_v17 }
  0xc7   : > { %v312_v21 = vsel %vm288_vm0, %v307_v20, 0.0  ;;  %v2311_v20 = vld [vmem:[%s3291_s2 + $0x6] ss:$0 sm:$0xff] }
  0xc8   : > { %316 = vadd.xlane.f32.xlu1 %v315_v19  ;;  %313 = vadd.xlane.f32.xlu0 %v312_v21 }
 0x14d   : > { %v311_v24 = vpop.xlane.xlu1 %310 }
 0x14e   : > { %v318_v25 = vmul.f32 0.03125, %v311_v24 }
 0x150   : > { %v321_v26 = vadd.f32 1e-05, %v318_v25 }
 0x151   : > { %v317_v27 = vpop.xlane.xlu1 %316  ;;  %v314_v28 = vpop.xlane.xlu0 %313 }
 0x152   : > { %2692 = vrsqrt.f32 %v321_v26  ;;  %v320_v29 = vmul.f32 0.03125, %v317_v27  ;;  %v319_v30 = vmul.f32 0.03125, %v314_v28  ;;  %v2324_v27 = vld [vmem:[%s3291_s2 + $0x8] ss:$0 sm:$0xff]  ;;  %v2326_v28 = vld [vmem:[%s3291_s2 + $0x9] ss:$0 sm:$0xff] }
 0x154   : > { %v323_v31 = vadd.f32 1e-05, %v320_v29  ;;  %v322_v32 = vadd.f32 1e-05, %v319_v30 }
 0x156   : > { %2694 = vrsqrt.f32 %v323_v31 }
 0x157   : > { %2696 = vrsqrt.f32 %v322_v32 }
 0x15f   : > { %v2693_v33 = vpop.eup %2692 }
 0x160   : > { %v327_v35 = vmul.f32 %v2693_v33, %v303_v11 }
 0x162   : > { %v334_v37 = vmul.f32 %v2293_v34, %v327_v35  ;;  %v2658_v35 = vld [vmem:[%s3292_s3 + $0x18] sm:$0xff]  }
 0x163   : > { %v2695_v38 = vpop.eup %2694 }
 0x164   : > { %v2697_v39 = vpop.eup %2696  ;;  %v2978_v40 = vadd.f32 %v2294_v36, %v334_v37  ;;  %v329_v41 = vmul.f32 %v2695_v38, %v305_v12 }
 0x165   : > { %v328_v42 = vmul.f32 %v2697_v39, %v304_v17  ;;  %v2298_v17 = vld [vmem:[#allocation5 + $0x2] ss:$0 sm:$0xff] }
 0x166   : > { %344 = vst.msk [vmem:[#allocation2 + $0x2] sm:$0xff] %vm288_vm0, %v2978_v40  ;;  %v336_v43 = vmul.f32 %v2293_v34, %v329_v41 }
 0x167   : > { %348 = vst.msk [vmem:[#allocation2] sm:$0x7] %vm347_vm2, %v2849_v6  ;;  %v335_v44 = vmul.f32 %v2293_v34, %v328_v42  ;;  %vm1309_vm2 = vcmask 122944  }
 0x168   : > { %v343_v45 = vadd.f32 %v2294_v36, %v336_v43 }
 0x169   : > { %v342_v46 = vadd.f32 %v2294_v36, %v335_v44  ;;  %v2312_v44 = vld [vmem:[#allocation5 + $0x4] ss:$0 sm:$0xff] }
 0x16a   : > { %346 = vst.msk [vmem:[#allocation2 + $0x12] sm:$0x1] %vm295_vm1, %v343_v45  ;;  %v2659_v45 = vld [vmem:[%s3292_s3 + $0x10] sm:$0xff]  }
 0x16b   : > { %345 = vst.msk [vmem:[#allocation2 + $0xa] sm:$0xff] %vm288_vm0, %v342_v46  ;;  %v2328_v46 = vld [vmem:[%s3291_s2 + $0xa] ss:$0 sm:$0xff] }
 0x16e   : > { %v350_v49 = vld [vmem:[#allocation2 + $0x1] sm:$0xff] }
 0x16f   : > { %v364_v50 = vld [vmem:[#allocation2 + $0x2] sm:$0xff]  ;;  %v358_v51 = vmul.f32 %v2295_v47, %v350_v49 }
 0x170   : > { %v372_v52 = vmul.f32 %v2296_v48, %v364_v50 }
 0x171   : > { %v366_v56 = vld [vmem:[#allocation2 + $0x12] sm:$0x1] }
 0x172   : > { %v375_v55 = vadd.f32 %v372_v52, %v358_v51  ;;  %v351_v59 = vld [vmem:[#allocation2 + $0x9] sm:$0xff]  ;;  %v374_v62 = vmul.f32 %v2296_v48, %v366_v56  ;;  %v352_v3 = vld [vmem:[#allocation2 + $0x11] sm:$0x1]  ;;  %v561_v23 = vld [vmem:[#allocation2 + $0x12] ss:$2 sm:$0x1] }
 0x173   : > { %v365_v60 = vld [vmem:[#allocation2 + $0xa] sm:$0xff]  ;;  %v359_v63 = vmul.f32 %v2295_v47, %v351_v59  ;;  %v360_v7 = vmul.f32 %v2295_v47, %v352_v3  ;;  %v568_v33 = vmul.f32 %v2311_v20, %v561_v23  ;;  %v710_v52 = vmul.f32 %v2328_v46, %v561_v23 }
 0x174   : > { %v378_v61 = vld [vmem:[#allocation2 + $0x3] sm:$0xff]  ;;  %v373_v0 = vmul.f32 %v2296_v48, %v365_v60  ;;  %v379_v1 = vld [vmem:[#allocation2 + $0xb] sm:$0xff] }
 0x175   : > { %v386_v2 = vmul.f32 %v2297_v53, %v378_v61  ;;  %v532_v4 = vld [vmem:[#allocation2] ss:$2 sm:$0xff]  ;;  %v387_v5 = vmul.f32 %v2297_v53, %v379_v1  ;;  %v534_v9 = vld [vmem:[#allocation2 + $0x10] ss:$2 sm:$0x1]  ;;  %v377_v18 = vadd.f32 %v374_v62, %v360_v7  ;;  %v2660_v53 = vld [vmem:[%s3292_s3 + $0x28] sm:$0xff]  }
 0x176   : > { %v541_v10 = vmul.f32 %v2307_v54, %v532_v4  ;;  %v546_v11 = vld [vmem:[#allocation2 + $0x1] ss:$2 sm:$0xff]  ;;  %v376_v12 = vadd.f32 %v373_v0, %v359_v63  ;;  %v542_v14 = vmul.f32 %v2307_v54, %v534_v9  ;;  %v548_v15 = vld [vmem:[#allocation2 + $0x11] ss:$2 sm:$0x1]  ;;  %v691_v36 = vmul.f32 %v2324_v27, %v532_v4 }
 0x177   : > { %v389_v13 = vadd.f32 %v386_v2, %v375_v55  ;;  %v554_v16 = vmul.f32 %v2309_v58, %v546_v11  ;;  %v555_v19 = vmul.f32 %v2309_v58, %v548_v15  ;;  %v559_v22 = vld [vmem:[#allocation2 + $0x2] ss:$2 sm:$0xff]  ;;  %v391_v24 = vadd.f32 %v388_v8, %v377_v18  ;;  %v2317_v2 = vld [vmem:[#allocation5 + $0x5] ss:$0 sm:$0xff] }
 0x178   : > { %v390_v21 = vadd.f32 %v387_v5, %v376_v12  ;;  %v567_v32 = vmul.f32 %v2311_v20, %v559_v22  ;;  %v692_v37 = vmul.f32 %v2324_v27, %v534_v9  ;;  %v700_v38 = vmul.f32 %v2326_v28, %v546_v11  ;;  %v2661_v58 = vld [vmem:[%s3292_s3 + $0x20] sm:$0xff]   ;;  %v2299_v5 = vld [vmem:[#allocation5 + $0x3] ss:$0 sm:$0xff] }
 0x179   : > { %v556_v25 = vadd.f32 %v554_v16, %v541_v10  ;;  %v557_v26 = vadd.f32 %v555_v19, %v542_v14  ;;  %v397_v29 = vadd.f32 %v2298_v17, %v389_v13  ;;  %v399_v31 = vadd.f32 %v2298_v17, %v391_v24 }
 0x17a   : > { %v398_v30 = vadd.f32 %v2298_v17, %v390_v21  ;;  %v701_v43 = vmul.f32 %v2326_v28, %v548_v15  ;;  %v702_v49 = vadd.f32 %v700_v38, %v691_v36  ;;  %v709_v51 = vmul.f32 %v2328_v46, %v559_v22 }
 0x17b   : > { %v405_v39 = vpack.c.bf16 %v399_v31, %v399_v31  ;;  %v569_v41 = vadd.f32 %v567_v32, %v556_v25  ;;  %v570_v42 = vadd.f32 %v568_v33, %v557_v26 }
 0x17c   : > { %v404_v34 = vpack.c.bf16 %v398_v30, %v397_v29  ;;  %v703_v50 = vadd.f32 %v701_v43, %v692_v37  ;;  %v711_v55 = vadd.f32 %v709_v51, %v702_v49 }
 0x17d   : > { %v576_v47 = vadd.f32 %v2312_v44, %v569_v41  ;;  %v577_v48 = vadd.f32 %v2312_v44, %v570_v42 }
 0x17e   : > { %2502 = vmatprep.mubr.msk.bf16.mxu0 %vm288_vm0, %v404_v34  ;;  %v712_v56 = vadd.f32 %v710_v52, %v703_v50  ;;  %v718_v59 = vadd.f32 %v2329_v57, %v711_v55 }
 0x17f   : > { %2503 = vmatmul.mubr.msk.bf16.vlgmr.msra.gmra.mxu0 %vm288_vm0, %v405_v39  ;;  %v583_v54 = vpack.c.bf16 %v577_v48, %v576_v47 }
 0x180   : > { %2507 = vmatpush3.bf16.msra.mxu0 %v2658_v35  ;;  %2510 = vmatprep.mubr.msk.bf16.mxu0 %vm2850_vm3, %v2849_v6  ;;  %v719_v60 = vadd.f32 %v2329_v57, %v712_v56 }
 0x181   : > { %2508 = vmatprep.subr.bf16.mxu0 %v2849_v6 }
 0x182   : > { %v725_v61 = vpack.c.bf16 %v719_v60, %v718_v59 }
 0x184   : > { %2509 = vmatpush3.bf16.msra.mxu0 %v2659_v45 }
 0x185   : > { %2514 = vmatprep.subr.bf16.mxu0 %v2849_v6 }
 0x187   : > { %2511 = vmatmul.mubr.msk.bf16.vlgmr.msra.gmra.mxu0 %vm288_vm0, %v583_v54 }
 0x188   : > { %2515 = vmatpush3.bf16.msra.mxu0 %v2660_v53  ;;  %2518 = vmatprep.mubr.msk.bf16.mxu0 %vm2850_vm3, %v2849_v6  ;;  %vm1310_vm3 = vmand %vm1309_vm2, %vm867_vm6  ;;  %vm1993_vm2 = vcmask 1048320  }
 0x189   : > { %2516 = vmatprep.subr.bf16.mxu0 %v2849_v6 }
 0x18c   : > { %2517 = vmatpush3.bf16.msra.mxu0 %v2661_v58 }
 0x18f   : > { %2519 = vmatmul.mubr.msk.bf16.vlgmr.msra.gmra.mxu0 %vm288_vm0, %v725_v61 }
 0x23f   : > { %v2504_v62 = vpop.f32.mrf.mxu0 }
 0x240   : > { %v472_v13 = vadd.f32 %v2504_v62, %v2299_v5  ;;  %v827_v62 = vlaneseq }
 0x241   : > { %v463_v63 = vpop.f32.mrf.mxu0 }
 0x242   : > { %v464_v8 = vadd.f32 %v2299_v5, %v463_v63  ;;  %v485_v20 = vsel %vm295_vm1, %v472_v13, 0.0 }
 0x243   : > { %v2505_v0 = vpop.f32.mrf.mxu0 }
 0x244   : > { %v479_v16 = vsel %vm288_vm0, %v464_v8, 0.0 }
 0x245   : > { %v466_v1 = vpop.f32.mrf.mxu0 }
 0x246   : > { %v467_v14 = vadd.f32 %v2299_v5, %v466_v1  ;;  %v3049_v1 = vshrl.u32 %v827_v62, 7 }
 0x247   : > { %v638_v3 = vpop.f32.mrf.mxu0 }
 0x248   : > { %v639_v4 = vadd.f32 %v2317_v2, %v638_v3  ;;  %v482_v19 = vsel %vm288_vm0, %v467_v14, 0.0  ;;  %v2321_v3 = vld [vmem:[#allocation5 + $0xa] ss:$0 sm:$0xff]  ;;  %vm831_vm4 = vcmp.eq.s32.totalorder %v3049_v1, 0 }
 0x249   : > { %v2512_v7 = vpop.f32.mrf.mxu0 }
 0x24a   : > { %v647_v9 = vsel %vm288_vm0, %v639_v4, 0.0  ;;  %v2322_v7 = vld [vmem:[#allocation5 + $0xb] ss:$0 sm:$0xff] }
 0x24b   : > { %648 = vadd.xlane.f32.xlu0 %v647_v9  ;;  %v641_v10 = vpop.f32.mrf.mxu0 }
 0x24c   : > { %v642_v11 = vadd.f32 %v2317_v2, %v641_v10  ;;  %v2304_v10 = vld [vmem:[#allocation5 + $0x8] ss:$0 sm:$0xff] }
 0x24d   : > { %v2513_v12 = vpop.f32.mrf.mxu0 }
 0x24e   : > { %v650_v15 = vsel %vm295_vm1, %v642_v11, 0.0 }
 0x24f   : > { %651 = vadd.xlane.f32.xlu1 %v650_v15  ;;  %v3038_v17 = vpop.f32.mrf.mxu0  ;;  %480 = vadd.xlane.f32.xlu0 %v479_v16  ;;  %v2305_v15 = vld [vmem:[#allocation5 + $0x9] ss:$0 sm:$0xff] }
 0x251   : > { %v2520_v18 = vpop.f32.mrf.mxu0 }
 0x253   : > { %v3042_v21 = vpop.f32.mrf.mxu0  ;;  %483 = vadd.xlane.f32.xlu1 %v482_v19  ;;  %486 = vadd.xlane.f32.xlu0 %v485_v20 }
 0x255   : > { %v2521_v22 = vpop.f32.mrf.mxu0 }
 0x2d4   : > { %v649_v23 = vpop.xlane.xlu0 %648 }
 0x2d5   : > { %v653_v24 = vmul.f32 0.03125, %v649_v23 }
 0x2d7   : > { %v655_v25 = vsub.f32 %v639_v4, %v653_v24  ;;  %v842_v4 = vsub.s32 0, %v3049_v1 }
 0x2d8   : > { %v652_v26 = vpop.xlane.xlu1 %651  ;;  %v481_v27 = vpop.xlane.xlu0 %480 }
 0x2d9   : > { %v654_v28 = vmul.f32 0.03125, %v652_v26  ;;  %v488_v29 = vmul.f32 0.03125, %v481_v27  ;;  %v657_v30 = vmul.f32 %v655_v25, %v655_v25  ;;  %v3054_v12 = vrot.slane %v2978_v40, %v842_v4 }
 0x2db   : > { %v656_v31 = vsub.f32 %v642_v11, %v654_v28  ;;  %v491_v32 = vsub.f32 %v464_v8, %v488_v29  ;;  %v659_v33 = vsel %vm288_vm0, %v657_v30, 0.0  ;;  %v884_v30 = vld [vmem:[#allocation4 + $0x10] sm:$0x1] }
 0x2dc   : > { %660 = vadd.xlane.f32.xlu1 %v659_v33  ;;  %v484_v34 = vpop.xlane.xlu1 %483  ;;  %v487_v35 = vpop.xlane.xlu0 %486 }
 0x2dd   : > { %v489_v36 = vmul.f32 0.03125, %v484_v34  ;;  %v490_v37 = vmul.f32 0.03125, %v487_v35  ;;  %v658_v38 = vmul.f32 %v656_v31, %v656_v31  ;;  %v494_v39 = vmul.f32 %v491_v32, %v491_v32 }
 0x2df   : > { %v492_v41 = vsub.f32 %v467_v14, %v489_v36  ;;  %v493_v42 = vsub.f32 %v472_v13, %v490_v37  ;;  %v662_v43 = vsel %vm295_vm1, %v658_v38, 0.0  ;;  %v497_v44 = vsel %vm288_vm0, %v494_v39, 0.0 }
 0x2e0   : > { %663 = vadd.xlane.f32.xlu0 %v662_v43  ;;  %498 = vadd.xlane.f32.xlu1 %v497_v44 }
 0x2e1   : > { %v495_v45 = vmul.f32 %v492_v41, %v492_v41  ;;  %v496_v46 = vmul.f32 %v493_v42, %v493_v42 }
 0x2e3   : > { %v500_v47 = vsel %vm288_vm0, %v495_v45, 0.0  ;;  %v503_v48 = vsel %vm295_vm1, %v496_v46, 0.0 }
 0x2e4   : > { %501 = vadd.xlane.f32.xlu0 %v500_v47  ;;  %504 = vadd.xlane.f32.xlu1 %v503_v48 }
 0x365   : > { %v661_v49 = vpop.xlane.xlu1 %660 }
 0x366   : > { %v665_v50 = vmul.f32 0.03125, %v661_v49 }
 0x368   : > { %v667_v51 = vadd.f32 1e-05, %v665_v50 }
 0x369   : > { %v499_v52 = vpop.xlane.xlu1 %498  ;;  %v664_v53 = vpop.xlane.xlu0 %663 }
 0x36a   : > { %2698 = vrsqrt.f32 %v667_v51  ;;  %v506_v54 = vmul.f32 0.03125, %v499_v52  ;;  %v666_v55 = vmul.f32 0.03125, %v664_v53 }
 0x36c   : > { %v509_v56 = vadd.f32 1e-05, %v506_v54  ;;  %v668_v57 = vadd.f32 1e-05, %v666_v55 }
 0x36d   : > { %v505_v58 = vpop.xlane.xlu1 %504  ;;  %v502_v59 = vpop.xlane.xlu0 %501 }
 0x36e   : > { %2700 = vrsqrt.f32 %v509_v56  ;;  %v508_v60 = vmul.f32 0.03125, %v505_v58  ;;  %v507_v61 = vmul.f32 0.03125, %v502_v59  ;;  %v2334_v59 = vld [vmem:[#allocation5 + $0x7] ss:$0 sm:$0xff] }
 0x36f   : > { %2702 = vrsqrt.f32 %v668_v57  ;;  %v781_v62 = vadd.f32 %v2334_v59, %v3038_v17 }
 0x370   : > { %v511_v63 = vadd.f32 1e-05, %v508_v60  ;;  %v510_v0 = vadd.f32 1e-05, %v507_v61  ;;  %v784_v60 = vadd.f32 %v2334_v59, %v3042_v21 }
 0x372   : > { %2704 = vrsqrt.f32 %v511_v63  ;;  %v792_v61 = vsel %vm295_vm1, %v784_v60, 0.0  ;;  %v789_v63 = vsel %vm288_vm0, %v781_v62, 0.0 }
 0x373   : > { %2706 = vrsqrt.f32 %v510_v0 }
 0x377   : > { %v2699_v2 = vpop.eup %2698 }
 0x378   : > { %v671_v5 = vmul.f32 %v2699_v2, %v655_v25 }
 0x37a   : > { %v677_v8 = vmul.f32 %v2321_v3, %v671_v5 }
 0x37b   : > { %v2701_v9 = vpop.eup %2700 }
 0x37c   : > { %v2703_v11 = vpop.eup %2702  ;;  %v683_v13 = vadd.f32 %v2322_v7, %v677_v8  ;;  %v515_v14 = vmul.f32 %v2701_v9, %v491_v32 }
 0x37d   : > { %v672_v16 = vmul.f32 %v2703_v11, %v656_v31 }
 0x37e   : > { %v872_v18 = vsel %vm831_vm4, %v3054_v12, %v683_v13  ;;  %v522_v19 = vmul.f32 %v2304_v10, %v515_v14 }
 0x37f   : > { %v2705_v20 = vpop.eup %2704  ;;  %v2430_v22 = vpack.c.bf16 %v872_v18, %v872_v18  ;;  %v678_v23 = vmul.f32 %v2321_v3, %v672_v16 }
 0x380   : > { %v2707_v24 = vpop.eup %2706  ;;  %v529_v25 = vadd.f32 %v2305_v15, %v522_v19  ;;  %v517_v26 = vmul.f32 %v2705_v20, %v493_v42 }
 0x381   : > { %883 = vst.msk [vmem:[#allocation4 + $0xc] sm:$0xf] %vm863_vm5, %v2430_v22  ;;  %v684_v40 = vadd.f32 %v2322_v7, %v678_v23  ;;  %v516_v27 = vmul.f32 %v2707_v24, %v492_v41  ;;  %v869_v41 = vld [vmem:[#allocation4 + $0x8] sm:$0x1] }
 0x382   : > { %v844_v28 = vsel %vm831_vm4, %v3054_v12, %v529_v25  ;;  %v524_v31 = vmul.f32 %v2304_v10, %v517_v26 }
 0x383   : > { %v847_v32 = vmul.f32 0.35355338, %v844_v28  ;;  %v2431_v33 = vpack.c.bf16 %v684_v40, %v684_v40  ;;  %v523_v34 = vmul.f32 %v2304_v10, %v516_v27 }
 0x384   : > { %v531_v35 = vadd.f32 %v2305_v15, %v524_v31 }
 0x385   : > { %v2427_v36 = vpack.c.bf16 %v847_v32, %v847_v32  ;;  %v885_v37 = vsel %vm3065_vm7, %v2431_v33, %v884_v30  ;;  %v530_v38 = vadd.f32 %v2305_v15, %v523_v34 }
 0x386   : > { %886 = vst [vmem:[#allocation4 + $0x10] sm:$0x1] %v885_v37  ;;  %v849_v39 = vmul.f32 0.35355338, %v531_v35 }
 0x387   : > { %864 = vst.msk [vmem:[#allocation4] sm:$0xf] %vm863_vm5, %v2427_v36  ;;  %v848_v42 = vmul.f32 0.35355338, %v530_v38 }
 0x388   : > { %v2429_v43 = vpack.c.bf16 %v849_v39, %v849_v39 }
 0x389   : > { %v2428_v44 = vpack.c.bf16 %v848_v42, %v848_v42 }
 0x38a   : > { %v870_v45 = vsel %vm3065_vm7, %v2429_v43, %v869_v41 }
 0x38b   : > { %871 = vst [vmem:[#allocation4 + $0x8] sm:$0x1] %v870_v45  ;;  %865 = vst.msk [vmem:[#allocation4 + $0x4] sm:$0xf] %vm863_vm5, %v2428_v44 }
 0x38d   : > { %v2662_v46 = vld [vmem:[#allocation4 + $0xc] sm:$0x1f]  }
 0x38e   : > { %v2663_v47 = vld [vmem:[#allocation4 + $0xc] sm:$0x1f]   ;;  %1129 = vrot.lane.b32.xlu0 %v2662_v46, %s2851_s7 }
 0x38f   : > { %2606 = vmatprep.subr.msk.bf16.mxu1 %vm922_vm8, %v2663_v47  ;;  %v930_v48 = vsel %vm922_vm8, %v2663_v47, 0  ;;  %v2668_v52 = vld [vmem:[#allocation4 + $0xc] sm:$0x1f]  }
 0x390   : > { %2523 = vmatpush3.bf16.xpose.msra.mxu1 %v930_v48  ;;  %v2671_v56 = vld [vmem:[#allocation4 + $0xc] sm:$0x1f]  }
 0x392   : > { %v2664_v49 = vld [vmem:[#allocation4] sm:$0xff]   ;;  %v2667_v53 = vld [vmem:[#allocation4 + $0x8] ss:$0 sps:$4 sm:$0x11]  }
 0x393   : > { %v2665_v50 = vld [vmem:[#allocation4] sm:$0xff]   ;;  %1329 = vrot.lane.b32.xlu0 %v2664_v49, %s2852_s8  ;;  %v2669_v54 = vld [vmem:[#allocation4 + $0x8] ss:$0 sps:$4 sm:$0x11]  }
 0x394   : > { %v2666_v51 = vld [vmem:[#allocation4] sm:$0xff]   ;;  %1120 = vrot.lane.b32.xlu1 %v2665_v50, %s2851_s7  ;;  %v2670_v55 = vld [vmem:[#allocation4 + $0x8] ss:$0 sps:$4 sm:$0x11]  }
 0x395   : > { %2524 = vmatprep.mubr.msk.bf16.mxu1 %vm922_vm8, %v2666_v51  ;;  %v2672_v57 = vld [vmem:[#allocation4 + $0x8] ss:$0 sps:$4 sm:$0x11]   ;;  %v2673_v58 = vld [vmem:[#allocation4] sm:$0xff]  }
 0x397   : > { %2525 = vmatmul.mubr.msk.bf16.vlgmr.msra.gmra.mxu1 %vm922_vm8, %v2667_v53  ;;  %1547 = vrot.lane.b32.xlu0 %v2668_v52, %s2853_s9 }
 0x398   : > { %1122 = vrot.lane.b32.xlu1 %v2669_v54, %s2851_s7  ;;  %v2338_v54 = vld [vmem:[#allocation5 + $0xc] ss:$0 sm:$0xff] }
 0x39b   : > { %1540 = vrot.lane.b32.xlu0 %v2670_v55, %s2853_s9 }
 0x39c   : > { %1338 = vrot.lane.b32.xlu1 %v2671_v56, %s2852_s8  ;;  %v2339_v56 = vld [vmem:[#allocation5 + $0xd] ss:$0 sm:$0xff] }
 0x3a0   : > { %1331 = vrot.lane.b32.xlu1 %v2672_v57, %s2852_s8 }
 0x3a4   : > { %1538 = vrot.lane.b32.xlu1 %v2673_v58, %s2853_s9 }
 0x3ba   : > { %793 = vadd.xlane.f32.xlu0 %v792_v61 }
 0x3c8   : > { %790 = vadd.xlane.f32.xlu1 %v789_v63 }
 0x400   : > { %v1130_v0 = vpop.permute.xlu0 %1129 }
 0x401   : > { %v1138_v2 = vsel %vm922_vm8, %v1130_v0, 0  ;;  %2607 = vmatprep.subr.msk.bf16.mxu1 %vm922_vm8, %v1130_v0 }
 0x402   : > { %2535 = vmatpush3.bf16.xpose.msra.mxu1 %v1138_v2  ;;  %v899_v2 = vld [vmem:[#allocation4 + $0x1c] sm:$0x1] }
 0x405   : > { %v1330_v4 = vpop.permute.xlu0 %1329 }
 0x406   : > { %v1121_v3 = vpop.permute.xlu1 %1120 }
 0x407   : > { %2536 = vmatprep.mubr.msk.bf16.mxu1 %vm922_vm8, %v1121_v3 }
 0x409   : > { %v1548_v7 = vpop.permute.xlu0 %1547 }
 0x40a   : > { %v1123_v5 = vpop.permute.xlu1 %1122  ;;  %v1556_v10 = vsel %vm922_vm8, %v1548_v7, 0 }
 0x40b   : > { %2537 = vmatmul.mubr.msk.bf16.vlgmr.msra.gmra.mxu1 %vm922_vm8, %v1123_v5  ;;  %v2854_v5 = vmov 65535  }
 0x40c   : > { %2548 = vmatprep.mubr.msk.bf16.mxu1 %vm922_vm8, %v1330_v4 }
 0x40d   : > { %v1541_v11 = vpop.permute.xlu0 %1540 }
 0x40e   : > { %v1339_v21 = vpop.permute.xlu1 %1338 }
 0x40f   : > { %v1347_v17 = vsel %vm922_vm8, %v1339_v21, 0  ;;  %2608 = vmatprep.subr.msk.bf16.mxu1 %vm922_vm8, %v1339_v21  ;;  %v1027_v21 = vsel %vm1025_vm11, 4294967295, %v2854_v5  ;;  %vm1727_vm11 = vcmask 254144  }
 0x410   : > { %2547 = vmatpush3.bf16.xpose.msra.mxu1 %v1347_v17  ;;  %v3146_v17 = vsel %vm1026_vm12, %v1027_v21, 0  ;;  %vm1728_vm12 = vmand %vm1727_vm11, %vm867_vm6 }
 0x411   : > { %2609 = vmatprep.subr.msk.bf16.mxu1 %vm922_vm8, %v1548_v7 }
 0x412   : > { %v1332_v8 = vpop.permute.xlu1 %1331 }
 0x416   : > { %v1539_v9 = vpop.permute.xlu1 %1538 }
 0x417   : > { %2549 = vmatmul.mubr.msk.bf16.vlgmr.msra.gmra.mxu1 %vm922_vm8, %v1332_v8 }
 0x418   : > { %2559 = vmatpush3.bf16.xpose.msra.mxu1 %v1556_v10  ;;  %2560 = vmatprep.mubr.msk.bf16.mxu1 %vm922_vm8, %v1539_v9 }
 0x41f   : > { %2561 = vmatmul.mubr.msk.bf16.vlgmr.msra.gmra.mxu1 %vm922_vm8, %v1541_v11 }
 0x443   : > { %v794_v13 = vpop.xlane.xlu0 %793 }
 0x444   : > { %v796_v14 = vmul.f32 0.03125, %v794_v13 }
 0x446   : > { %v798_v18 = vsub.f32 %v784_v60, %v796_v14 }
 0x448   : > { %v800_v24 = vmul.f32 %v798_v18, %v798_v18 }
 0x44a   : > { %v804_v40 = vsel %vm295_vm1, %v800_v24, 0.0 }
 0x451   : > { %v791_v15 = vpop.xlane.xlu1 %790 }
 0x452   : > { %v795_v16 = vmul.f32 0.03125, %v791_v15 }
 0x454   : > { %v797_v19 = vsub.f32 %v781_v62, %v795_v16 }
 0x456   : > { %v799_v20 = vmul.f32 %v797_v19, %v797_v19 }
 0x457   : > { %v3104_v22 = vpop.f32.mrf.mxu1 }
 0x458   : > { %v801_v23 = vsel %vm288_vm0, %v799_v20, 0.0  ;;  %v988_v29 = vsel %vm987_vm10, %v3104_v22, -inf }
 0x459   : > { %802 = vadd.xlane.f32.xlu0 %v801_v23  ;;  %v3107_v25 = vpop.f32.mrf.mxu1 }
 0x45a   : > { %v981_v10 = vsel %vm980_vm9, %v3107_v25, -inf }
 0x45b   : > { %v2527_v26 = vpop.f32.mrf.mxu1 }
 0x45d   : > { %v3110_v27 = vpop.f32.mrf.mxu1  ;;  %805 = vadd.xlane.f32.xlu0 %v804_v40 }
 0x45e   : > { %v984_v28 = vsel %vm980_vm9, %v3110_v27, -inf }
 0x461   : > { %985 = vmax.xlane.f32.xlu0 %v984_v28 }
 0x4cb   : > { %v3114_v30 = vpop.f32.mrf.mxu1 }
 0x4cc   : > { %v1194_v31 = vsel %vm987_vm10, %v3114_v30, -inf }
 0x4cd   : > { %v3118_v32 = vpop.f32.mrf.mxu1  ;;  %1195 = vmax.xlane.f32.xlu0 %v1194_v31 }
 0x4ce   : > { %v1188_v34 = vsel %vm980_vm9, %v3118_v32, -inf }
 0x4cf   : > { %v2539_v33 = vpop.f32.mrf.mxu1 }
 0x4d1   : > { %1189 = vmax.xlane.f32.xlu0 %v1188_v34  ;;  %v3122_v35 = vpop.f32.mrf.mxu1 }
 0x4d2   : > { %v1191_v11 = vsel %vm980_vm9, %v3122_v35, -inf }
 0x4d7   : > { %v3124_v36 = vpop.f32.mrf.mxu1 }
 0x4d8   : > { %v1403_v13 = vsel %vm987_vm10, %v3124_v36, -inf }
 0x4d9   : > { %v3126_v37 = vpop.f32.mrf.mxu1 }
 0x4da   : > { %v1397_v14 = vsel %vm980_vm9, %v3126_v37, -inf }
 0x4db   : > { %v2551_v38 = vpop.f32.mrf.mxu1 }
 0x4dd   : > { %v3128_v39 = vpop.f32.mrf.mxu1 }
 0x4de   : > { %v1400_v41 = vsel %vm980_vm9, %v3128_v39, -inf }
 0x4df   : > { %v3132_v42 = vpop.f32.mrf.mxu1  ;;  %1401 = vmax.xlane.f32.xlu0 %v1400_v41 }
 0x4e0   : > { %v1612_v45 = vsel %vm987_vm10, %v3132_v42, -inf }
 0x4e1   : > { %v3134_v43 = vpop.f32.mrf.mxu1 }
 0x4e2   : > { %v803_v44 = vpop.xlane.xlu0 %802  ;;  %v1606_v50 = vsel %vm980_vm9, %v3134_v43, -inf }
 0x4e3   : > { %v807_v46 = vmul.f32 0.03125, %v803_v44  ;;  %v2563_v47 = vpop.f32.mrf.mxu1  ;;  %1613 = vmax.xlane.f32.xlu0 %v1612_v45 }
 0x4e5   : > { %v809_v48 = vadd.f32 1e-05, %v807_v46  ;;  %v3161_v15 = vpop.f32.mrf.mxu1 }
 0x4e6   : > { %v806_v49 = vpop.xlane.xlu0 %805  ;;  %v1609_v16 = vsel %vm980_vm9, %v3161_v15, -inf }
 0x4e7   : > { %2708 = vrsqrt.f32 %v809_v48  ;;  %v808_v51 = vmul.f32 0.03125, %v806_v49  ;;  %1607 = vmax.xlane.f32.xlu0 %v1606_v50 }
 0x4e9   : > { %v810_v52 = vadd.f32 1e-05, %v808_v51 }
 0x4eb   : > { %2710 = vrsqrt.f32 %v810_v52 }
 0x4f4   : > { %v2709_v53 = vpop.eup %2708 }
 0x4f5   : > { %v813_v55 = vmul.f32 %v2709_v53, %v797_v19 }
 0x4f7   : > { %v819_v57 = vmul.f32 %v2338_v54, %v813_v55 }
 0x4f8   : > { %v2711_v58 = vpop.eup %2710 }
 0x4f9   : > { %v825_v59 = vadd.f32 %v2339_v56, %v819_v57  ;;  %v814_v60 = vmul.f32 %v2711_v58, %v798_v18  ;;  %v986_v18 = vpop.xlane.xlu0 %985 }
 0x4fb   : > { %v887_v61 = vsel %vm831_vm4, %v3054_v12, %v825_v59  ;;  %v820_v62 = vmul.f32 %v2338_v54, %v814_v60 }
 0x4fc   : > { %v2432_v63 = vpack.c.bf16 %v887_v61, %v887_v61 }
 0x4fd   : > { %v826_v0 = vadd.f32 %v2339_v56, %v820_v62 }
 0x4fe   : > { %898 = vst.msk [vmem:[#allocation4 + $0x18] sm:$0xf] %vm863_vm5, %v2432_v63  ;;  %vm1306_vm5 = vcmask 126016  }
 0x4ff   : > { %v2433_v3 = vpack.c.bf16 %v826_v0, %v826_v0 }
 0x501   : > { %v900_v4 = vsel %vm3065_vm7, %v2433_v3, %v899_v2  ;;  %vm1518_vm7 = vcmask 188544  }
 0x502   : > { %901 = vst [vmem:[#allocation4 + $0x1c] sm:$0x1] %v900_v4  ;;  %vm1519_vm8 = vmand %vm1518_vm7, %vm867_vm6  ;;  %vm1968_vm6 = vcmask 516352  }
 0x509   : > { %v2674_v7 = vld [vmem:[#allocation4 + $0x18] sm:$0x1f]  }
 0x50a   : > { %v2675_v8 = vld [vmem:[#allocation4 + $0x18] sm:$0x1f]   ;;  %1434 = vrot.lane.b32.xlu0 %v2674_v7, %s2852_s8 }
 0x50b   : > { %v2676_v12 = vld [vmem:[#allocation4 + $0x18] sm:$0x1f]   ;;  %1225 = vrot.lane.b32.xlu1 %v2675_v8, %s2851_s7 }
 0x50c   : > { %v1030_v9 = vand.u32 %v2676_v12, %v3146_v17  ;;  %v2677_v19 = vld [vmem:[#allocation4 + $0x18] sm:$0x1f]  }
 0x50e   : > { %2528 = vmatprep.subr.bf16.mxu0 %v1030_v9 }
 0x50f   : > { %2529 = vmatpush3.bf16.msra.mxu0 %v1030_v9 }
 0x52f   : > { %989 = vmax.xlane.f32.xlu1 %v988_v29 }
 0x533   : > { %982 = vmax.xlane.f32.xlu1 %v981_v10 }
 0x537   : > { %1192 = vmax.xlane.f32.xlu1 %v1191_v11 }
 0x53b   : > { %1404 = vmax.xlane.f32.xlu1 %v1403_v13 }
 0x53f   : > { %1398 = vmax.xlane.f32.xlu1 %v1397_v14 }
 0x543   : > { %1610 = vmax.xlane.f32.xlu1 %v1609_v16 }
 0x554   : > { %1643 = vrot.lane.b32.xlu1 %v2677_v19, %s2853_s9 }
 0x556   : > { %v1196_v20 = vpop.xlane.xlu0 %1195 }
 0x557   : > { %v1199_v40 = vsub.f32 %v3114_v30, %v1196_v20  ;;  %v992_v30 = vsub.f32 %v3110_v27, %v986_v18 }
 0x559   : > { %v1204_v28 = vmul.f32 1.442695, %v1199_v40  ;;  %v996_v47 = vmul.f32 1.442695, %v992_v30 }
 0x55a   : > { %v1190_v23 = vpop.xlane.xlu0 %1189 }
 0x55b   : > { %v1197_v24 = vsub.f32 %v3118_v32, %v1190_v23 }
 0x55d   : > { %v1200_v26 = vmul.f32 1.442695, %v1197_v24 }
 0x55f   : > { %2712 = vpow2.f32 %v1200_v26 }
 0x560   : > { %2714 = vpow2.f32 %v1204_v28 }
 0x561   : > { %2716 = vpow2.f32 %v996_v47 }
 0x568   : > { %v1402_v44 = vpop.xlane.xlu0 %1401 }
 0x569   : > { %v1407_v52 = vsub.f32 %v3128_v39, %v1402_v44 }
 0x56b   : > { %v1411_v27 = vmul.f32 1.442695, %v1407_v52 }
 0x56c   : > { %v3168_v31 = vpop.eup %2712  ;;  %v1614_v51 = vpop.xlane.xlu0 %1613 }
 0x56d   : > { %v1206_v33 = vsel %vm980_vm9, %v3168_v31, 0.0  ;;  %v3172_v34 = vpop.eup %2714  ;;  %v1617_v61 = vsub.f32 %v3132_v42, %v1614_v51 }
 0x56e   : > { %1207 = vadd.xlane.f32.xlu0 %v1206_v33  ;;  %v1212_v38 = vsel %vm987_vm10, %v3172_v34, 0.0  ;;  %v1219_v14 = vpack.c.bf16 %v3172_v34, %v3172_v34 }
 0x570   : > { %v1608_v57 = vpop.xlane.xlu0 %1607 }
 0x578   : > { %1213 = vadd.xlane.f32.xlu1 %v1212_v38 }
 0x57c   : > { %v1435_v5 = vpop.permute.xlu0 %1434 }
 0x57d   : > { %v1226_v41 = vpop.permute.xlu1 %1225  ;;  %v1443_v42 = vand.u32 %v1435_v5, %v3146_v17 }
 0x57e   : > { %v1234_v32 = vand.u32 %v1226_v41, %v3146_v17 }
 0x580   : > { %2540 = vmatprep.subr.bf16.mxu0 %v1234_v32 }
 0x5b8   : > { %v990_v45 = vpop.xlane.xlu1 %989 }
 0x5b9   : > { %v993_v46 = vsub.f32 %v3104_v22, %v990_v45 }
 0x5bb   : > { %v998_v48 = vmul.f32 1.442695, %v993_v46 }
 0x5bc   : > { %v983_v49 = vpop.xlane.xlu1 %982 }
 0x5bd   : > { %v991_v50 = vsub.f32 %v3107_v25, %v983_v49  ;;  %2718 = vpow2.f32 %v998_v48  ;;  %v1615_v25 = vsub.f32 %v3134_v43, %v1608_v57  ;;  %v1102_v57 = vld [vmem:[#allocation4 + $0x2c] sm:$0x1] }
 0x5bf   : > { %v994_v53 = vmul.f32 1.442695, %v991_v50  ;;  %v1618_v62 = vmul.f32 1.442695, %v1615_v25 }
 0x5c0   : > { %v1193_v54 = vpop.xlane.xlu1 %1192 }
 0x5c1   : > { %2720 = vpow2.f32 %v994_v53  ;;  %v1198_v55 = vsub.f32 %v3122_v35, %v1193_v54  ;;  %v2717_v35 = vpop.eup %2716 }
 0x5c2   : > { %v1003_v34 = vsel %vm980_vm9, %v2717_v35, 0.0 }
 0x5c3   : > { %v1202_v56 = vmul.f32 1.442695, %v1198_v55 }
 0x5c4   : > { %v1405_v58 = vpop.xlane.xlu1 %1404 }
 0x5c5   : > { %2722 = vpow2.f32 %v1202_v56  ;;  %v1408_v22 = vsub.f32 %v3124_v36, %v1405_v58  ;;  %v1622_v36 = vmul.f32 1.442695, %v1617_v61 }
 0x5c6   : > { %2724 = vpow2.f32 %v1411_v27 }
 0x5c7   : > { %v1413_v59 = vmul.f32 1.442695, %v1408_v22 }
 0x5c8   : > { %v1399_v60 = vpop.xlane.xlu1 %1398 }
 0x5c9   : > { %2726 = vpow2.f32 %v1413_v59  ;;  %v1406_v39 = vsub.f32 %v3126_v37, %v1399_v60 }
 0x5ca   : > { %v2719_v2 = vpop.eup %2718 }
 0x5cb   : > { %v1409_v63 = vmul.f32 1.442695, %v1406_v39  ;;  %v1013_v7 = vpack.c.bf16 %v2719_v2, %v2719_v2 }
 0x5cc   : > { %v1611_v0 = vpop.xlane.xlu1 %1610 }
 0x5cd   : > { %2728 = vpow2.f32 %v1409_v63  ;;  %v1616_v3 = vsub.f32 %v3161_v15, %v1611_v0 }
 0x5ce   : > { %v2721_v4 = vpop.eup %2720  ;;  %2730 = vpow2.f32 %v1618_v62 }
 0x5cf   : > { %v1620_v43 = vmul.f32 1.442695, %v1616_v3  ;;  %v1012_v21 = vpack.c.bf16 %v2717_v35, %v2721_v4  ;;  %v1000_v38 = vsel %vm980_vm9, %v2721_v4, 0.0 }
 0x5d0   : > { %v1644_v10 = vpop.permute.xlu1 %1643 }
 0x5d1   : > { %2732 = vpow2.f32 %v1620_v43  ;;  %2530 = vmatprep.mubr.msk.bf16.mxu0 %vm980_vm9, %v1012_v21  ;;  %v1652_v16 = vand.u32 %v1644_v10, %v3146_v17 }
 0x5d2   : > { %v2723_v37 = vpop.eup %2722  ;;  %2531 = vmatmul.mubr.msk.bf16.vlgmr.msra.gmra.mxu0 %vm980_vm9, %v1013_v7  ;;  %2734 = vpow2.f32 %v1622_v36 }
 0x5d3   : > { %2541 = vmatpush3.bf16.msra.mxu0 %v1234_v32  ;;  %v1209_v8 = vsel %vm980_vm9, %v2723_v37, 0.0  ;;  %v1218_v12 = vpack.c.bf16 %v2723_v37, %v3168_v31  ;;  %v2725_v9 = vpop.eup %2724  ;;  %v1006_v31 = vsel %vm987_vm10, %v2719_v2, 0.0 }
 0x5d4   : > { %2552 = vmatprep.subr.bf16.mxu0 %v1443_v42  ;;  %1210 = vadd.xlane.f32.xlu1 %v1209_v8  ;;  %v1418_v13 = vsel %vm980_vm9, %v2725_v9, 0.0 }
 0x5d5   : > { %2542 = vmatprep.mubr.msk.bf16.mxu0 %vm980_vm9, %v1218_v12 }
 0x5d6   : > { %v2727_v29 = vpop.eup %2726 }
 0x5d7   : > { %v1421_v11 = vsel %vm987_vm10, %v2727_v29, 0.0  ;;  %v1428_v17 = vpack.c.bf16 %v2727_v29, %v2727_v29 }
 0x5d8   : > { %1422 = vadd.xlane.f32.xlu0 %v1421_v11  ;;  %1419 = vadd.xlane.f32.xlu1 %v1418_v13 }
 0x5da   : > { %v2729_v15 = vpop.eup %2728  ;;  %2543 = vmatmul.mubr.msk.bf16.vlgmr.msra.gmra.mxu0 %vm980_vm9, %v1219_v14 }
 0x5db   : > { %2553 = vmatpush3.bf16.msra.mxu0 %v1443_v42  ;;  %v1415_v18 = vsel %vm980_vm9, %v2729_v15, 0.0  ;;  %v1427_v19 = vpack.c.bf16 %v2725_v9, %v2729_v15  ;;  %v2731_v20 = vpop.eup %2730 }
 0x5dc   : > { %2564 = vmatprep.subr.bf16.mxu0 %v1652_v16  ;;  %1416 = vadd.xlane.f32.xlu0 %v1415_v18  ;;  %v1624_v26 = vsel %vm980_vm9, %v2731_v20, 0.0 }
 0x5dd   : > { %2554 = vmatprep.mubr.msk.bf16.mxu0 %vm980_vm9, %v1427_v19 }
 0x5de   : > { %v2733_v23 = vpop.eup %2732 }
 0x5df   : > { %v1627_v24 = vsel %vm980_vm9, %v2733_v23, 0.0  ;;  %v2735_v40 = vpop.eup %2734  ;;  %v1636_v28 = vpack.c.bf16 %v2733_v23, %v2731_v20 }
 0x5e0   : > { %1628 = vadd.xlane.f32.xlu1 %v1627_v24  ;;  %1625 = vadd.xlane.f32.xlu0 %v1624_v26  ;;  %v1630_v33 = vsel %vm987_vm10, %v2735_v40, 0.0  ;;  %v1637_v41 = vpack.c.bf16 %v2735_v40, %v2735_v40  ;;  %v2678_v24 = vld [vmem:[%s3292_s3 + $0x38] sm:$0xff]   ;;  %v2679_v26 = vld [vmem:[%s3292_s3 + $0x30] sm:$0xff]   ;;  %vm1724_vm10 = vcmask 257216  }
 0x5e1   : > { %2570 = vmatprep.subr.bf16.mxu1 %v2678_v24 }
 0x5e2   : > { %2555 = vmatmul.mubr.msk.bf16.vlgmr.msra.gmra.mxu0 %vm980_vm9, %v1428_v17  ;;  %2571 = vmatpush3.bf16.msra.mxu1 %v2678_v24  ;;  %v2683_v24 = vld [vmem:[%s3292_s3 + $0x40] sm:$0xff]  }
 0x5e3   : > { %2565 = vmatpush3.bf16.msra.mxu0 %v1652_v16  ;;  %2566 = vmatprep.mubr.msk.bf16.mxu0 %vm980_vm9, %v1636_v28 }
 0x5e4   : > { %1007 = vadd.xlane.f32.xlu1 %v1006_v31  ;;  %1631 = vadd.xlane.f32.xlu0 %v1630_v33 }
 0x5e5   : > { %2572 = vmatprep.subr.bf16.mxu1 %v2679_v26 }
 0x5e6   : > { %2573 = vmatpush3.bf16.msra.mxu1 %v2679_v26 }
 0x5e8   : > { %1004 = vadd.xlane.f32.xlu1 %v1003_v34  ;;  %1001 = vadd.xlane.f32.xlu0 %v1000_v38 }
 0x5ea   : > { %2567 = vmatmul.mubr.msk.bf16.vlgmr.msra.gmra.mxu0 %vm980_vm9, %v1637_v41  ;;  %vm1515_vm9 = vcmask 191616  }
 0x5f7   : > { %v1208_v32 = vpop.xlane.xlu0 %1207 }
 0x601   : > { %v1214_v44 = vpop.xlane.xlu1 %1213 }
 0x65d   : > { %v1211_v45 = vpop.xlane.xlu1 %1210 }
 0x661   : > { %v1423_v30 = vpop.xlane.xlu0 %1422  ;;  %v1420_v47 = vpop.xlane.xlu1 %1419 }
 0x665   : > { %v1417_v46 = vpop.xlane.xlu0 %1416 }
 0x669   : > { %v1626_v48 = vpop.xlane.xlu0 %1625  ;;  %v1629_v49 = vpop.xlane.xlu1 %1628 }
 0x66d   : > { %v1632_v50 = vpop.xlane.xlu0 %1631  ;;  %v1008_v51 = vpop.xlane.xlu1 %1007 }
 0x66e   : > { %2736 = vrcp.f32 %v1008_v51 }
 0x671   : > { %v1002_v52 = vpop.xlane.xlu0 %1001  ;;  %v1005_v53 = vpop.xlane.xlu1 %1004 }
 0x672   : > { %2738 = vrcp.f32 %v1002_v52 }
 0x673   : > { %2740 = vrcp.f32 %v1005_v53 }
 0x674   : > { %2742 = vrcp.f32 %v1214_v44 }
 0x675   : > { %2744 = vrcp.f32 %v1208_v32 }
 0x676   : > { %2746 = vrcp.f32 %v1423_v30 }
 0x677   : > { %2748 = vrcp.f32 %v1211_v45 }
 0x678   : > { %2750 = vrcp.f32 %v1417_v46 }
 0x679   : > { %2752 = vrcp.f32 %v1420_v47 }
 0x67a   : > { %2754 = vrcp.f32 %v1626_v48 }
 0x67b   : > { %v2737_v54 = vpop.eup %2736  ;;  %2756 = vrcp.f32 %v1632_v50 }
 0x67c   : > { %2758 = vrcp.f32 %v1629_v49 }
 0x67f   : > { %v2739_v56 = vpop.eup %2738 }
 0x680   : > { %v2741_v61 = vpop.eup %2740 }
 0x681   : > { %v2743_v35 = vpop.eup %2742 }
 0x682   : > { %v2745_v4 = vpop.eup %2744 }
 0x683   : > { %v2747_v42 = vpop.eup %2746 }
 0x684   : > { %v2749_v12 = vpop.eup %2748 }
 0x685   : > { %v2751_v29 = vpop.eup %2750 }
 0x686   : > { %v2753_v18 = vpop.eup %2752 }
 0x687   : > { %v2755_v17 = vpop.eup %2754 }
 0x688   : > { %v2757_v34 = vpop.eup %2756 }
 0x689   : > { %v2759_v30 = vpop.eup %2758 }
 0x692   : > { %v2532_v55 = vpop.f32.mrf.mxu0 }
 0x693   : > { %v1082_v27 = vmul.f32 %v2737_v54, %v2532_v55 }
 0x694   : > { %v1066_v58 = vpop.f32.mrf.mxu0 }
 0x695   : > { %v2436_v22 = vpack.c.bf16 %v1082_v27, %v1082_v27  ;;  %v1080_v25 = vmul.f32 %v2739_v56, %v1066_v58 }
 0x696   : > { %v2533_v59 = vpop.f32.mrf.mxu0 }
 0x697   : > { %v1103_v60 = vsel %vm1101_vm14, %v2436_v22, %v1102_v57  ;;  %v2434_v39 = vpack.c.bf16 %v1080_v25, %v1080_v25  ;;  %vm1965_vm14 = vcmask 523520  }
 0x698   : > { %1104 = vst [vmem:[#allocation4 + $0x2c] sm:$0x1] %v1103_v60  ;;  %v1069_v62 = vpop.f32.mrf.mxu0 }
 0x699   : > { %1098 = vst.msk [vmem:[#allocation4 + $0x24] sm:$0xf] %vm1097_vm15, %v2434_v39  ;;  %v1081_v63 = vmul.f32 %v2741_v61, %v1069_v62 }
 0x69a   : > { %v2544_v0 = vpop.f32.mrf.mxu0 }
 0x69b   : > { %v2435_v2 = vpack.c.bf16 %v1081_v63, %v1081_v63  ;;  %v1286_v3 = vmul.f32 %v2743_v35, %v2544_v0  ;;  %v2772_v63 = vld [vmem:[%s2957_s18] sm:$0xff] }
 0x69c   : > { %v1270_v36 = vpop.f32.mrf.mxu0 }
 0x69d   : > { %1099 = vst.msk [vmem:[#allocation4 + $0x28] sm:$0xf] %vm1097_vm15, %v2435_v2  ;;  %v2439_v5 = vpack.c.bf16 %v1286_v3, %v1286_v3  ;;  %v1284_v43 = vmul.f32 %v2745_v4, %v1270_v36  ;;  %v2773_v4 = vld [vmem:[%s2957_s18 + $0x8] sm:$0xff]  ;;  %vm1979_vm15 = vcmask 785920  }
 0x69e   : > { %v2545_v21 = vpop.f32.mrf.mxu0 }
 0x69f   : > { %v2437_v7 = vpack.c.bf16 %v1284_v43, %v1284_v43  ;;  %1301 = vrot.lane.b32.xlu0 %v2439_v5, %s2855_s10  ;;  %v1311_v48 = vld [vmem:[#allocation4 + $0x2c] sm:$0x1]  ;;  %v2774_v5 = vld [vmem:[%s2957_s18 + $0x10] sm:$0x1] }
 0x6a0   : > { %v1273_v37 = vpop.f32.mrf.mxu0 }
 0x6a1   : > { %1297 = vrot.lane.b32.xlu1 %v2437_v7, %s2855_s10  ;;  %v1285_v11 = vmul.f32 %v2749_v12, %v1273_v37 }
 0x6a2   : > { %v2556_v8 = vpop.f32.mrf.mxu0 }
 0x6a3   : > { %v1495_v9 = vmul.f32 %v2747_v42, %v2556_v8  ;;  %v2438_v20 = vpack.c.bf16 %v1285_v11, %v1285_v11 }
 0x6a4   : > { %v1479_v10 = vpop.f32.mrf.mxu0 }
 0x6a5   : > { %v2442_v13 = vpack.c.bf16 %v1495_v9, %v1495_v9  ;;  %v1493_v14 = vmul.f32 %v2751_v29, %v1479_v10 }
 0x6a6   : > { %v2557_v15 = vpop.f32.mrf.mxu0 }
 0x6a7   : > { %v2440_v16 = vpack.c.bf16 %v1493_v14, %v1493_v14  ;;  %1510 = vrot.lane.b32.xlu1 %v2442_v13, %s2856_s11 }
 0x6a8   : > { %v1482_v19 = vpop.f32.mrf.mxu0 }
 0x6a9   : > { %v1494_v23 = vmul.f32 %v2753_v18, %v1482_v19  ;;  %1506 = vrot.lane.b32.xlu0 %v2440_v16, %s2856_s11 }
 0x6aa   : > { %v2568_v40 = vpop.f32.mrf.mxu0 }
 0x6ab   : > { %1299 = vrot.lane.b32.xlu1 %v2438_v20, %s2855_s10  ;;  %v2441_v31 = vpack.c.bf16 %v1494_v23, %v1494_v23  ;;  %v1704_v41 = vmul.f32 %v2757_v34, %v2568_v40  ;;  %v2682_v23 = vld [vmem:[%s3292_s3 + $0x48] sm:$0xff]  }
 0x6ac   : > { %v1688_v28 = vpop.f32.mrf.mxu0  ;;  %2578 = vmatprep.subr.bf16.mxu0 %v2682_v23 }
 0x6ad   : > { %v1702_v33 = vmul.f32 %v2755_v17, %v1688_v28  ;;  %v2445_v46 = vpack.c.bf16 %v1704_v41, %v1704_v41  ;;  %2579 = vmatpush3.bf16.msra.mxu0 %v2682_v23 }
 0x6ae   : > { %v2569_v38 = vpop.f32.mrf.mxu0  ;;  %2580 = vmatprep.subr.bf16.mxu0 %v2683_v24 }
 0x6af   : > { %v2443_v32 = vpack.c.bf16 %v1702_v33, %v1702_v33  ;;  %1508 = vrot.lane.b32.xlu1 %v2441_v31, %s2856_s11 }
 0x6b0   : > { %v1691_v44 = vpop.f32.mrf.mxu0 }
 0x6b1   : > { %v1703_v45 = vmul.f32 %v2759_v30, %v1691_v44  ;;  %1715 = vrot.lane.b32.xlu0 %v2443_v32, %s2857_s17  ;;  %2581 = vmatpush3.bf16.msra.mxu0 %v2683_v24  ;;  %v2401_v44 = vld [vmem:[#allocation5 + $0xe] ss:$0 sm:$0xff] }
 0x6b3   : > { %v2444_v47 = vpack.c.bf16 %v1703_v45, %v1703_v45 }
 0x6b5   : > { %1717 = vrot.lane.b32.xlu1 %v2444_v47, %s2857_s17  ;;  %1719 = vrot.lane.b32.xlu0 %v2445_v46, %s2857_s17 }
 0x711   : > { %v1302_v49 = vpop.permute.xlu0 %1301 }
 0x712   : > { %v1312_v50 = vsel %vm1310_vm3, %v1302_v49, %v1311_v48  ;;  %v2402_v48 = vld [vmem:[#allocation5 + $0xf] ss:$0 sm:$0xff]  ;;  %vm1996_vm3 = vcmask 1041152  }
 0x713   : > { %1313 = vst [vmem:[#allocation4 + $0x2c] sm:$0x1] %v1312_v50  ;;  %v1298_v51 = vpop.permute.xlu1 %1297 }
 0x714   : > { %1307 = vst.msk [vmem:[#allocation4 + $0x24] sm:$0xf] %vm1306_vm5, %v1298_v51 }
 0x719   : > { %v1511_v52 = vpop.permute.xlu1 %1510 }
 0x71a   : > { %v1520_v53 = vld [vmem:[#allocation4 + $0x2c] sm:$0x1] }
 0x71b   : > { %v1521_v54 = vsel %vm1519_vm8, %v1511_v52, %v1520_v53  ;;  %v1507_v55 = vpop.permute.xlu0 %1506 }
 0x71c   : > { %1522 = vst [vmem:[#allocation4 + $0x2c] sm:$0x1] %v1521_v54  ;;  %1516 = vst.msk [vmem:[#allocation4 + $0x24] sm:$0xf] %vm1515_vm9, %v1507_v55 }
 0x71d   : > { %v1300_v27 = vpop.permute.xlu1 %1299 }
 0x71e   : > { %1308 = vst.msk [vmem:[#allocation4 + $0x28] sm:$0xf] %vm1306_vm5, %v1300_v27 }
 0x721   : > { %v1509_v56 = vpop.permute.xlu1 %1508 }
 0x722   : > { %1517 = vst.msk [vmem:[#allocation4 + $0x28] sm:$0xf] %vm1515_vm9, %v1509_v56 }
 0x723   : > { %v1716_v57 = vpop.permute.xlu0 %1715  ;;  %v1729_v22 = vld [vmem:[#allocation4 + $0x2c] sm:$0x1] }
 0x724   : > { %1725 = vst.msk [vmem:[#allocation4 + $0x24] sm:$0xf] %vm1724_vm10, %v1716_v57  ;;  %v2407_v57 = vld [vmem:[#allocation5 + $0x10] ss:$0 sm:$0xff] }
 0x727   : > { %v1718_v58 = vpop.permute.xlu1 %1717  ;;  %v1720_v25 = vpop.permute.xlu0 %1719 }
 0x728   : > { %1726 = vst.msk [vmem:[#allocation4 + $0x28] sm:$0xf] %vm1724_vm10, %v1718_v58  ;;  %v1730_v59 = vsel %vm1728_vm12, %v1720_v25, %v1729_v22 }
 0x729   : > { %1731 = vst [vmem:[#allocation4 + $0x2c] sm:$0x1] %v1730_v59 }
 0x72f   : > { %v2680_v60 = vld [vmem:[#allocation4 + $0x24] sm:$0xff]  }
 0x730   : > { %v2681_v39 = vld [vmem:[#allocation4 + $0x2c] ss:$0 sps:$4 sm:$0x11]   ;;  %2574 = vmatprep.mubr.msk.bf16.mxu1 %vm288_vm0, %v2680_v60 }
 0x731   : > { %2575 = vmatmul.mubr.msk.bf16.vlgmr.msra.gmra.mxu1 %vm288_vm0, %v2681_v39 }
 0x7f1   : > { %v2576_v61 = vpop.f32.mrf.mxu1 }
 0x7f2   : > { %v3233_v43 = vadd.f32 %v2774_v5, %v2576_v61  ;;  %v2690_v5 = vld [vmem:[#allocation7 + $0x8] sm:$0xff]  }
 0x7f3   : > { %v1800_v62 = vpop.f32.mrf.mxu1 }
 0x7f4   : > { %v3225_v35 = vadd.f32 %v2772_v63, %v1800_v62  ;;  %v1825_v7 = vsel %vm295_vm1, %v3233_v43, 0.0  ;;  %v2684_v62 = vld [vmem:[#allocation7 + $0x38] sm:$0xff]   ;;  %v2685_v63 = vld [vmem:[#allocation7 + $0x30] sm:$0xff]  }
 0x7f5   : > { %v2577_v0 = vpop.f32.mrf.mxu1  ;;  %2586 = vmatprep.subr.bf16.mxu1 %v2684_v62 }
 0x7f6   : > { %v1819_v2 = vsel %vm288_vm0, %v3225_v35, 0.0  ;;  %2587 = vmatpush3.bf16.msra.mxu1 %v2684_v62  ;;  %v2686_v0 = vld [vmem:[#allocation7 + $0x28] sm:$0xff]  }
 0x7f7   : > { %1820 = vadd.xlane.f32.xlu1 %v1819_v2  ;;  %v1803_v3 = vpop.f32.mrf.mxu1  ;;  %2588 = vmatprep.subr.bf16.mxu1 %v2685_v63  ;;  %v2687_v2 = vld [vmem:[#allocation7 + $0x20] sm:$0xff]  }
 0x7f8   : > { %v3230_v36 = vadd.f32 %v2773_v4, %v1803_v3  ;;  %v2688_v3 = vld [vmem:[#allocation7 + $0x18] sm:$0xff]   ;;  %v2689_v4 = vld [vmem:[#allocation7 + $0x10] sm:$0xff]  }
 0x7fa   : > { %v1822_v21 = vsel %vm288_vm0, %v3230_v36, 0.0  ;;  %2589 = vmatpush3.bf16.msra.mxu1 %v2685_v63 }
 0x7fb   : > { %1823 = vadd.xlane.f32.xlu0 %v1822_v21  ;;  %2590 = vmatprep.subr.bf16.mxu1 %v2686_v0  ;;  %v2691_v21 = vld [vmem:[#allocation7] sm:$0xff]  }
 0x7fe   : > { %2591 = vmatpush3.bf16.msra.mxu1 %v2686_v0 }
 0x7ff   : > { %1826 = vadd.xlane.f32.xlu0 %v1825_v7  ;;  %2592 = vmatprep.subr.bf16.mxu1 %v2687_v2 }
 0x802   : > { %2593 = vmatpush3.bf16.msra.mxu1 %v2687_v2 }
 0x803   : > { %2594 = vmatprep.subr.bf16.mxu1 %v2688_v3 }
 0x806   : > { %2595 = vmatpush3.bf16.msra.mxu1 %v2688_v3 }
 0x807   : > { %2596 = vmatprep.subr.bf16.mxu1 %v2689_v4 }
 0x80a   : > { %2597 = vmatpush3.bf16.msra.mxu1 %v2689_v4 }
 0x80b   : > { %2598 = vmatprep.subr.bf16.mxu1 %v2690_v5 }
 0x80e   : > { %2599 = vmatpush3.bf16.msra.mxu1 %v2690_v5 }
 0x80f   : > { %2600 = vmatprep.subr.bf16.mxu1 %v2691_v21 }
 0x812   : > { %2601 = vmatpush3.bf16.msra.mxu1 %v2691_v21 }
 0x880   : > { %v1821_v37 = vpop.xlane.xlu1 %1820 }
 0x881   : > { %v1828_v42 = vmul.f32 0.03125, %v1821_v37 }
 0x883   : > { %v1831_v8 = vsub.f32 %v3225_v35, %v1828_v42 }
 0x884   : > { %v1824_v12 = vpop.xlane.xlu0 %1823 }
 0x885   : > { %v1829_v9 = vmul.f32 0.03125, %v1824_v12  ;;  %v1834_v29 = vmul.f32 %v1831_v8, %v1831_v8 }
 0x887   : > { %v1832_v10 = vsub.f32 %v3230_v36, %v1829_v9  ;;  %v1837_v11 = vsel %vm288_vm0, %v1834_v29, 0.0 }
 0x888   : > { %1838 = vadd.xlane.f32.xlu0 %v1837_v11  ;;  %v1827_v13 = vpop.xlane.xlu0 %1826 }
 0x889   : > { %v1830_v14 = vmul.f32 0.03125, %v1827_v13  ;;  %v1835_v15 = vmul.f32 %v1832_v10, %v1832_v10  ;;  %v2412_v13 = vld [vmem:[%s3293_s4] ss:$0 sm:$0xff] }
 0x88b   : > { %v1833_v16 = vsub.f32 %v3233_v43, %v1830_v14  ;;  %v1840_v18 = vsel %vm288_vm0, %v1835_v15, 0.0  ;;  %v2413_v14 = vld [vmem:[%s3293_s4 + $0x1] ss:$0 sm:$0xff] }
 0x88c   : > { %1841 = vadd.xlane.f32.xlu1 %v1840_v18 }
 0x88d   : > { %v1836_v19 = vmul.f32 %v1833_v16, %v1833_v16 }
 0x88f   : > { %v1843_v20 = vsel %vm295_vm1, %v1836_v19, 0.0 }
 0x890   : > { %1844 = vadd.xlane.f32.xlu0 %v1843_v20 }
 0x911   : > { %v1839_v26 = vpop.xlane.xlu0 %1838 }
 0x912   : > { %v1846_v40 = vmul.f32 0.03125, %v1839_v26 }
 0x914   : > { %v1849_v17 = vadd.f32 1e-05, %v1846_v40 }
 0x915   : > { %v1842_v28 = vpop.xlane.xlu1 %1841 }
 0x916   : > { %2760 = vrsqrt.f32 %v1849_v17  ;;  %v1847_v31 = vmul.f32 0.03125, %v1842_v28 }
 0x918   : > { %v1850_v33 = vadd.f32 1e-05, %v1847_v31 }
 0x919   : > { %v1845_v34 = vpop.xlane.xlu0 %1844 }
 0x91a   : > { %2762 = vrsqrt.f32 %v1850_v33  ;;  %v1848_v38 = vmul.f32 0.03125, %v1845_v34  ;;  %v2030_v33 = vld [vmem:[#allocation3 + $0x12] sm:$0x1]  ;;  %v2415_v34 = vld [vmem:[%s3293_s4 + $0x3] ss:$0 sm:$0xff] }
 0x91c   : > { %v1851_v41 = vadd.f32 1e-05, %v1848_v38 }
 0x91e   : > { %2764 = vrsqrt.f32 %v1851_v41 }
 0x923   : > { %v2761_v32 = vpop.eup %2760 }
 0x924   : > { %v1855_v30 = vmul.f32 %v2761_v32, %v1831_v8 }
 0x926   : > { %v1862_v47 = vmul.f32 %v2401_v44, %v1855_v30 }
 0x927   : > { %v2763_v45 = vpop.eup %2762 }
 0x928   : > { %v1856_v46 = vmul.f32 %v2763_v45, %v1832_v10  ;;  %v3251_v52 = vadd.f32 %v2402_v48, %v1862_v47 }
 0x92a   : > { %v1863_v49 = vmul.f32 %v2401_v44, %v1856_v46 }
 0x92b   : > { %v2765_v50 = vpop.eup %2764 }
 0x92c   : > { %v1857_v51 = vmul.f32 %v2765_v50, %v1833_v16  ;;  %v1870_v53 = vadd.f32 %v2402_v48, %v1863_v49 }
 0x92e   : > { %v1877_v54 = vpack.c.bf16 %v1870_v53, %v3251_v52  ;;  %v1864_v55 = vmul.f32 %v2401_v44, %v1857_v51 }
 0x930   : > { %2582 = vmatprep.mubr.msk.bf16.mxu0 %vm288_vm0, %v1877_v54  ;;  %v1871_v27 = vadd.f32 %v2402_v48, %v1864_v55 }
 0x932   : > { %v1878_v56 = vpack.c.bf16 %v1871_v27, %v1871_v27 }
 0x934   : > { %2583 = vmatmul.mubr.msk.bf16.vlgmr.msra.gmra.mxu0 %vm288_vm0, %v1878_v56 }
 0x9f4   : > { %v2584_v58 = vpop.f32.mrf.mxu0 }
 0x9f5   : > { %v1945_v22 = vadd.f32 %v2584_v58, %v2407_v57 }
 0x9f6   : > { %v1936_v25 = vpop.f32.mrf.mxu0 }
 0x9f7   : > { %1952 = vst.msk [vmem:[#allocation3 + $0x11] sm:$0x1] %vm295_vm1, %v1945_v22  ;;  %v1937_v59 = vadd.f32 %v2407_v57, %v1936_v25  ;;  %1960 = vrot.lane.b32.xlu1 %v1945_v22, %s2858_s23 }
 0x9f8   : > { %v2585_v60 = vpop.f32.mrf.mxu0 }
 0x9f9   : > { %1950 = vst.msk [vmem:[#allocation3 + $0x1] sm:$0xff] %vm288_vm0, %v1937_v59  ;;  %1984 = vrot.lane.b32.xlu0 %v1937_v59, %s2859_s25 }
 0x9fa   : > { %v1939_v39 = vpop.f32.mrf.mxu0 }
 0x9fb   : > { %v1940_v61 = vadd.f32 %v2407_v57, %v1939_v39  ;;  %1974 = vrot.lane.b32.xlu1 %v1945_v22, %s2860_s26 }
 0x9fd   : > { %1951 = vst.msk [vmem:[#allocation3 + $0x9] sm:$0xff] %vm288_vm0, %v1940_v61  ;;  %1958 = vrot.lane.b32.xlu0 %v1940_v61, %s2858_s23 }
 0x9ff   : > { %1956 = vrot.lane.b32.xlu1 %v1937_v59, %s2858_s23 }
 0xa01   : > { %1986 = vrot.lane.b32.xlu0 %v1940_v61, %s2859_s25 }
 0xa03   : > { %1970 = vrot.lane.b32.xlu1 %v1937_v59, %s2860_s26 }
 0xa07   : > { %1972 = vrot.lane.b32.xlu1 %v1940_v61, %s2860_s26 }
 0xa0b   : > { %1988 = vrot.lane.b32.xlu1 %v1945_v22, %s2859_s25 }
 0xa69   : > { %v1961_v7 = vpop.permute.xlu1 %1960 }
 0xa6a   : > { %1969 = vst.msk [vmem:[#allocation3 + $0x11] sm:$0x1] %vm1968_vm6, %v1961_v7 }
 0xa6b   : > { %v1985_v37 = vpop.permute.xlu0 %1984 }
 0xa6d   : > { %v1975_v42 = vpop.permute.xlu1 %1974 }
 0xa6e   : > { %1983 = vst.msk [vmem:[#allocation3 + $0x11] sm:$0x1] %vm1982_vm13, %v1975_v42 }
 0xa6f   : > { %v1959_v8 = vpop.permute.xlu0 %1958 }
 0xa70   : > { %1967 = vst.msk [vmem:[#allocation3 + $0x9] sm:$0xff] %vm1965_vm14, %v1959_v8 }
 0xa71   : > { %v1957_v12 = vpop.permute.xlu1 %1956 }
 0xa72   : > { %1966 = vst.msk [vmem:[#allocation3 + $0x1] sm:$0xff] %vm1965_vm14, %v1957_v12 }
 0xa73   : > { %v1987_v10 = vpop.permute.xlu0 %1986 }
 0xa75   : > { %v1971_v9 = vpop.permute.xlu1 %1970 }
 0xa76   : > { %1980 = vst.msk [vmem:[#allocation3 + $0x1] sm:$0xff] %vm1979_vm15, %v1971_v9 }
 0xa77   : > { %1994 = vst.msk [vmem:[#allocation3 + $0x1] sm:$0xff] %vm1993_vm2, %v1985_v37 }
 0xa78   : > { %1998 = vst [vmem:[#allocation3] sm:$0x3] %v2849_v6  ;;  %v2414_v6 = vld [vmem:[%s3293_s4 + $0x2] ss:$0 sm:$0xff] }
 0xa79   : > { %v1973_v29 = vpop.permute.xlu1 %1972  ;;  %v2038_v47 = vmul.f32 %v2414_v6, %v2030_v33 }
 0xa7a   : > { %1981 = vst.msk [vmem:[#allocation3 + $0x9] sm:$0xff] %vm1979_vm15, %v1973_v29 }
 0xa7b   : > { %1995 = vst.msk [vmem:[#allocation3 + $0x9] sm:$0xff] %vm1993_vm2, %v1987_v10 }
 0xa7d   : > { %v1989_v11 = vpop.permute.xlu1 %1988 }
 0xa7e   : > { %1997 = vst.msk [vmem:[#allocation3 + $0x11] sm:$0x1] %vm1996_vm3, %v1989_v11 }
 0xa7f   : > { %v2000_v15 = vld [vmem:[#allocation3] sm:$0xff] }
 0xa80   : > { %v2014_v16 = vld [vmem:[#allocation3 + $0x1] sm:$0xff]  ;;  %v2008_v18 = vmul.f32 %v2412_v13, %v2000_v15 }
 0xa81   : > { %v2022_v19 = vmul.f32 %v2413_v14, %v2014_v16 }
 0xa82   : > { %v2001_v20 = vld [vmem:[#allocation3 + $0x8] sm:$0xff]  ;;  %v2002_v31 = vld [vmem:[#allocation3 + $0x10] sm:$0x1] }
 0xa83   : > { %v2015_v23 = vld [vmem:[#allocation3 + $0x9] sm:$0xff]  ;;  %v2025_v24 = vadd.f32 %v2022_v19, %v2008_v18  ;;  %v2009_v40 = vmul.f32 %v2412_v13, %v2001_v20  ;;  %v2010_v45 = vmul.f32 %v2412_v13, %v2002_v31 }
 0xa84   : > { %v2028_v26 = vld [vmem:[#allocation3 + $0x2] sm:$0xff]  ;;  %v2023_v17 = vmul.f32 %v2413_v14, %v2015_v23 }
 0xa85   : > { %v2036_v28 = vmul.f32 %v2414_v6, %v2028_v26  ;;  %v2029_v41 = vld [vmem:[#allocation3 + $0xa] sm:$0xff] }
 0xa86   : > { %v2026_v38 = vadd.f32 %v2023_v17, %v2009_v40  ;;  %v2016_v30 = vld [vmem:[#allocation3 + $0x11] sm:$0x1]  ;;  %v2037_v44 = vmul.f32 %v2414_v6, %v2029_v41 }
 0xa87   : > { %v2039_v32 = vadd.f32 %v2036_v28, %v2025_v24  ;;  %v2024_v46 = vmul.f32 %v2413_v14, %v2016_v30  ;;  %v2416_v14 = vld [vmem:[#allocation5 + $0x11] ss:$0 sm:$0xff] }
 0xa88   : > { %v2040_v49 = vadd.f32 %v2037_v44, %v2026_v38 }
 0xa89   : > { %v2047_v48 = vadd.f32 %v2415_v34, %v2039_v32  ;;  %v2027_v50 = vadd.f32 %v2024_v46, %v2010_v45 }
 0xa8a   : > { %v2048_v53 = vadd.f32 %v2415_v34, %v2040_v49 }
 0xa8b   : > { %v2053_v51 = vmul.f32 0.044715, %v2047_v48  ;;  %v2041_v54 = vadd.f32 %v2038_v47, %v2027_v50  ;;  %v2050_v21 = vmul.f32 0.5, %v2047_v48 }
 0xa8c   : > { %v2054_v27 = vmul.f32 0.044715, %v2048_v53  ;;  %v2051_v7 = vmul.f32 0.5, %v2048_v53 }
 0xa8d   : > { %v2056_v55 = vmul.f32 %v2053_v51, %v2047_v48  ;;  %v2049_v56 = vadd.f32 %v2415_v34, %v2041_v54 }
 0xa8e   : > { %v2057_v58 = vmul.f32 %v2054_v27, %v2048_v53 }
 0xa8f   : > { %v2059_v57 = vmul.f32 %v2056_v55, %v2047_v48  ;;  %v2055_v22 = vmul.f32 0.044715, %v2049_v56  ;;  %v2052_v9 = vmul.f32 0.5, %v2049_v56 }
 0xa90   : > { %v2060_v59 = vmul.f32 %v2057_v58, %v2048_v53 }
 0xa91   : > { %v2062_v25 = vadd.f32 %v2059_v57, %v2047_v48  ;;  %v2058_v60 = vmul.f32 %v2055_v22, %v2049_v56 }
 0xa92   : > { %v2063_v61 = vadd.f32 %v2060_v59, %v2048_v53 }
 0xa93   : > { %v2065_v39 = vmul.f32 0.7978846, %v2062_v25  ;;  %v2061_v62 = vmul.f32 %v2058_v60, %v2049_v56 }
 0xa94   : > { %v2066_v63 = vmul.f32 0.7978846, %v2063_v61 }
 0xa95   : > { %2766 = vtanh.f32 %v2065_v39  ;;  %v2064_v0 = vadd.f32 %v2061_v62, %v2049_v56 }
 0xa96   : > { %2768 = vtanh.f32 %v2066_v63 }
 0xa97   : > { %v2067_v2 = vmul.f32 0.7978846, %v2064_v0 }
 0xa99   : > { %2770 = vtanh.f32 %v2067_v2 }
 0xaa2   : > { %v2767_v3 = vpop.eup %2766 }
 0xaa3   : > { %v2071_v4 = vadd.f32 1.0, %v2767_v3  ;;  %v2769_v5 = vpop.eup %2768 }
 0xaa4   : > { %v2072_v37 = vadd.f32 1.0, %v2769_v5 }
 0xaa5   : > { %v2074_v8 = vmul.f32 %v2071_v4, %v2050_v21 }
 0xaa6   : > { %v2771_v42 = vpop.eup %2770  ;;  %v2075_v12 = vmul.f32 %v2072_v37, %v2051_v7 }
 0xaa7   : > { %v2073_v29 = vadd.f32 1.0, %v2771_v42 }
 0xaa8   : > { %v2093_v10 = vpack.c.bf16 %v2075_v12, %v2074_v8 }
 0xaa9   : > { %v2076_v11 = vmul.f32 %v2073_v29, %v2052_v9 }
 0xaaa   : > { %2602 = vmatprep.mubr.bf16.mxu1 %v2093_v10 }
 0xaab   : > { %v2094_v13 = vpack.c.bf16 %v2076_v11, %v2076_v11 }
 0xaad   : > { %2603 = vmatmul.mubr.bf16.vlgmr.msra.gmra.mxu1 %v2094_v13 }
 0xb6d   : > { %v2604_v15 = vpop.f32.mrf.mxu1 }
 0xb6e   : > { %v2191_v16 = vadd.f32 %v2604_v15, %v2416_v14 }
 0xb6f   : > { %v2182_v18 = vpop.f32.mrf.mxu1 }
 0xb70   : > { %v2201_v19 = vadd.f32 %v2191_v16, %v3233_v43  ;;  %v2183_v6 = vadd.f32 %v2416_v14, %v2182_v18 }
 0xb71   : > { %v2605_v20 = vpop.f32.mrf.mxu1 }
 0xb72   : > { %2204 = vst.msk [vmem:[%s281_s13 + $0x10] sm:$0x1] %vm295_vm1, %v2201_v19  ;;  %v2196_v23 = vsel %vm831_vm4, %v3251_v52, %v2183_v6 }
 0xb73   : > { %v2199_v24 = vadd.f32 %v2196_v23, %v3225_v35  ;;  %v2185_v26 = vpop.f32.mrf.mxu1 }
 0xb74   : > { %v2186_v40 = vadd.f32 %v2416_v14, %v2185_v26 }
 0xb75   : > { %2202 = vst.msk [vmem:[%s281_s13] sm:$0xff] %vm288_vm0, %v2199_v24 }
 0xb76   : > { %v2200_v17 = vadd.f32 %v2186_v40, %v3230_v36 }
 0xb78   : > { %2203 = vst.msk [vmem:[%s281_s13 + $0x8] sm:$0xff] %vm288_vm0, %v2200_v17 }
 0xb79 PF: > { %s18_s21 = sadd.s32 1, %s2841_s21  }
 0xb7a   : > { %p15_p2 = scmp.ge.s32.totalorder %s18_s21, 4  }
 0xb7c   :  { %17 = sbr.rel (!%p15_p2) target bundleno = 2 (0x2), region = 97 }
 0xb81   :  { %2226 = vsyncpa [#allocation6], 1 }
 0xb82   :  { %2228 = vsyncpa [#allocation6 + $0x1], 1 }
 0xb83   :  { %2229 = vsyncpa [#allocation8], 1 }

</bundles_post_ra>
